<compile_context>
chip_gen: v5e
topology: v5e:2x2
jax: 0.10.0
libtpu: 0.0.40
codegen_flags: <defaults>
</compile_context>

<pallas_src>
import functools

import jax
import jax.numpy as jnp
import numpy as np
from jax import lax
from jax.experimental import pallas as pl
from jax.experimental.pallas import tpu as pltpu


# ----------------------------------------------------------------------------
# Quantization helpers (wrapper / calibration side)
# ----------------------------------------------------------------------------
def _quant_params(x, n_bits):
    """Per-tensor min/max calibration (UniformAffineQuantizer style)."""
    levels = jnp.float32(2.0 ** n_bits - 1.0)
    x_min = jnp.minimum(jnp.min(x), 0.0)
    x_max = jnp.maximum(jnp.max(x), 0.0)
    delta = jnp.maximum((x_max - x_min) / levels, 1e-8)
    zp = jnp.round(-x_min / delta)
    return delta.astype(jnp.float32), zp.astype(jnp.float32), levels


def _fake_quant_act(x, n_bits):
    """Per-tensor activation fake-quant (reference path)."""
    d, z, m = _quant_params(x, n_bits)
    return (jnp.clip(jnp.round(x * (1.0 / d)) + z, 0.0, m) - z) * d


def _fake_quant_weight(w, n_bits, axis):
    """Per-output-channel weight fake-quant (channel_wise=True, reference path)."""
    levels = jnp.float32(2.0 ** n_bits - 1.0)
    red = tuple(i for i in range(w.ndim) if i != axis)
    w_min = jnp.minimum(jnp.min(w, axis=red, keepdims=True), 0.0)
    w_max = jnp.maximum(jnp.max(w, axis=red, keepdims=True), 0.0)
    d = jnp.maximum((w_max - w_min) / levels, 1e-8)
    z = jnp.round(-w_min / d)
    return (jnp.clip(jnp.round(w * (1.0 / d)) + z, 0.0, levels) - z) * d


def _prepare_qweight(w_mat, n_bits=4):
    """Pre-quantize a [K, N] weight per output channel (column).

    Returns integer-valued (w_q - zp) cast to bf16 (exact: |v| <= 15) plus the
    per-channel delta.  Done ONCE in the wrapper since weights are static, so
    the kernel never re-quantizes weights.
    """
    levels = jnp.float32(2.0 ** n_bits - 1.0)
    w_min = jnp.minimum(jnp.min(w_mat, axis=0), 0.0)
    w_max = jnp.maximum(jnp.max(w_mat, axis=0), 0.0)
    delta = jnp.maximum((w_max - w_min) / levels, 1e-8).astype(jnp.float32)
    zp = jnp.round(-w_min / delta)
    w_int = jnp.clip(jnp.round(w_mat * (1.0 / delta)) + zp, 0.0, levels) - zp
    return w_int.astype(jnp.bfloat16), delta


# ----------------------------------------------------------------------------
# Fused fake-quant GEMM kernel
# ----------------------------------------------------------------------------
def _qmm_kernel(qp_ref, a_ref, w_ref, s_ref, b_ref, o_ref, *, apply_silu):
    """fake-quant(A) -> bf16 integer GEMM vs pre-quantized weight -> epilogue.

    Accumulates directly into the resident output block across the k grid axis
    (no VMEM scratch); the per-output-channel dequant scale, bias and optional
    SiLU are applied only on the last k step.
    """
    k = pl.program_id(2)

    # Activation quant params live in SMEM (free scalar reads); 1/delta stored
    # so the per-element op is a multiply, not a divide.
    inv_a_d = qp_ref[0]
    a_zp = qp_ref[1]
    a_lvl = qp_ref[2]

    # Fake-quantize the activation tile to integer values (f32 VPU math, exact
    # in bf16 since |v| <= 255), then feed the MXU in bf16.
    a = a_ref[...]
    a_int = jnp.clip(jnp.round(a * inv_a_d) + a_zp, 0.0, a_lvl) - a_zp
    part = jnp.dot(a_int.astype(jnp.bfloat16), w_ref[...],
                   preferred_element_type=jnp.float32)

    @pl.when(k == 0)
    def _():
        o_ref[...] = part

    @pl.when(k != 0)
    def _():
        o_ref[...] = o_ref[...] + part

    @pl.when(k == pl.num_programs(2) - 1)
    def _():
        out = o_ref[...] * s_ref[...] + b_ref[...]
        if apply_silu:
            out = out * jax.nn.sigmoid(out)
        o_ref[...] = out


def _round_up(n, m):
    return ((n + m - 1) // m) * m


def _pad_to(x, shape):
    return jnp.pad(x, [(0, s - d) for d, s in zip(x.shape, shape)])


def _choose_tile(dim_p, unit, t_max):
    """Largest tile <= t_max that is a multiple of `unit` and divides dim_p."""
    t = max(unit, min(dim_p, (t_max // unit) * unit))
    while dim_p % t != 0:
        t -= unit
    return t


def quant_matmul(a, w_int, w_delta, bias, *, act_qparams=None, n_bits_a=8,
                 apply_silu=False, tm=256, tn=256, tk=512):
    """out = SiLU?( (fq8(a)_int @ w_int) * (delta_a * delta_w[col]) + bias )

    a       : [M, K] float32 activations (fake-quantized inside the kernel)
    w_int   : [K, N] bf16 integer-valued pre-quantized weights (w_q - zp)
    w_delta : [N]    float32 per-output-channel weight delta
    bias    : [N]    float32
    """
    M, K = a.shape
    K2, N = w_int.shape
    assert K == K2

    if act_qparams is None:
        a_d, a_zp, a_lvl = _quant_params(a, n_bits_a)
    else:
        a_d, a_zp, a_lvl = act_qparams
    qp = jnp.stack([1.0 / a_d, a_zp, a_lvl,
                    jnp.float32(0.0)]).astype(jnp.float32)       # SMEM scalars
    scale = (a_d * w_delta).reshape(1, N).astype(jnp.float32)    # per-channel dequant

    Mp, Kp, Np = _round_up(M, 8), _round_up(K, 128), _round_up(N, 128)
    tm_e = _choose_tile(Mp, 8, tm)
    tk_e = _choose_tile(Kp, 128, tk)
    tn_e = _choose_tile(Np, 128, tn)

    a_p = _pad_to(a.astype(jnp.float32), (Mp, Kp))
    w_p = _pad_to(w_int.astype(jnp.bfloat16), (Kp, Np))
    s_p = _pad_to(scale, (1, Np))
    b_p = _pad_to(bias.astype(jnp.float32).reshape(1, N), (1, Np))

    grid = (Mp // tm_e, Np // tn_e, Kp // tk_e)
    out = pl.pallas_call(
        functools.partial(_qmm_kernel, apply_silu=apply_silu),
        out_shape=jax.ShapeDtypeStruct((Mp, Np), jnp.float32),
        grid=grid,
        in_specs=[
            pl.BlockSpec(memory_space=pltpu.MemorySpace.SMEM),    # act quant params
            pl.BlockSpec((tm_e, tk_e), lambda i, j, k: (i, k)),   # activations (f32)
            pl.BlockSpec((tk_e, tn_e), lambda i, j, k: (k, j)),   # int weights (bf16)
            pl.BlockSpec((1, tn_e), lambda i, j, k: (0, j)),      # dequant scale row
            pl.BlockSpec((1, tn_e), lambda i, j, k: (0, j)),      # bias row
        ],
        out_specs=pl.BlockSpec((tm_e, tn_e), lambda i, j, k: (i, j)),
        compiler_params=pltpu.CompilerParams(
            dimension_semantics=("parallel", "parallel", "arbitrary")),
    )(qp, a_p, w_p, s_p, b_p)
    return out[:M, :N]


# ----------------------------------------------------------------------------
# Quantized Conv2d (3x3, stride 1, SAME) via im2col + fused fake-quant GEMM
# ----------------------------------------------------------------------------
def _im2col(x, kh, kw, pad):
    """NCHW -> [B*H*W, C*kh*kw] patch matrix (GEMM A operand)."""
    B, C, H, W = x.shape
    xp = jnp.pad(x, ((0, 0), (0, 0), (pad, pad), (pad, pad)))
    cols = [xp[:, :, i:i + H, j:j + W] for i in range(kh) for j in range(kw)]
    patches = jnp.stack(cols, axis=2)                      # [B, C, kh*kw, H, W]
    patches = patches.reshape(B, C * kh * kw, H, W)
    return patches.transpose(0, 2, 3, 1).reshape(B * H * W, C * kh * kw)
# TODO(synk): for large UNet feature maps the HBM im2col + layout transposes should
# be replaced by an in-kernel 9-tap shifted GEMM (extra 'arbitrary' grid axis over
# kh*kw); kept in XLA here for clarity at these toy shapes.


def quant_conv2d(x, w_int, w_delta, bias, *, kh=3, kw=3, apply_silu=False):
    """x NCHW [B,Cin,H,W]; w_int [Cin*kh*kw, Cout] pre-quantized; SAME, stride 1."""
    B, Cin, H, W = x.shape
    Cout = w_int.shape[1]
    # Activation quant params from the (9x smaller) pre-im2col tensor; identical
    # result since padded zeros never change the zero-clamped min/max.
    act_qp = _quant_params(x, 8)
    a = _im2col(x.astype(jnp.float32), kh, kw, kh // 2)     # [B*H*W, Cin*kh*kw]
    o = quant_matmul(a, w_int, w_delta, bias, act_qparams=act_qp,
                     apply_silu=apply_silu)                 # [B*H*W, Cout]
    return o.reshape(B, H, W, Cout).transpose(0, 3, 1, 2)   # NCHW


# ----------------------------------------------------------------------------
# Synthetic wrapped model: forward(x, timesteps, context) — the signature
# QuantModelMultiQ.forward delegates to.
# ----------------------------------------------------------------------------
def _timestep_embedding(t, dim):
    half = dim // 2
    freqs = jnp.exp(-jnp.log(10000.0) * jnp.arange(half, dtype=jnp.float32) / half)
    args = t.astype(jnp.float32)[:, None] * freqs[None, :]
    return jnp.concatenate([jnp.cos(args), jnp.sin(args)], axis=-1)


def prepare_model_params(raw):
    """One-time weight quantization (weights are static -> hoisted out of kernel)."""
    p = {}
    for name in ('t_w1', 't_w2', 'c_w'):
        p[name], p[name + '_d'] = _prepare_qweight(raw[name], 4)
    for name in ('conv1_w', 'conv2_w'):
        Cout, Cin, kh, kw = raw[name].shape
        w_mat = raw[name].reshape(Cout, Cin * kh * kw).T
        p[name], p[name + '_d'] = _prepare_qweight(w_mat, 4)
    for name in ('t_b1', 't_b2', 'c_b', 'conv1_b', 'conv2_b'):
        p[name] = raw[name].astype(jnp.float32)
    return p


def quant_model_forward(p, x, timesteps, context, *, temb_dim):
    B, C, H, W = x.shape
    # timestep-embedding MLP (quantized linears, fused SiLU)
    temb = _timestep_embedding(timesteps, temb_dim)
    temb = quant_matmul(temb, p['t_w1'], p['t_w1_d'], p['t_b1'], apply_silu=True)
    temb = quant_matmul(temb, p['t_w2'], p['t_w2_d'], p['t_b2'])
    # context projection (quantized linear), pooled over sequence
    Bc, S, Dctx = context.shape
    ctx = quant_matmul(context.reshape(B * S, Dctx), p['c_w'], p['c_w_d'], p['c_b'])
    ctx = ctx.reshape(B, S, -1).mean(axis=1)
    # conv block
    h = quant_conv2d(x, p['conv1_w'], p['conv1_w_d'], p['conv1_b'], apply_silu=True)
    h = h + temb[:, :, None, None] + ctx[:, :, None, None]
    out = quant_conv2d(h, p['conv2_w'], p['conv2_w_d'], p['conv2_b'])
    return out
# TODO(synk): the real wrapped UNet (attention / QuantBasicTransformerBlock specials)
# is external to QuantModelMultiQ and not reproduced here.


# ----------------------------------------------------------------------------
# Pure-JAX reference (same fake-quant semantics) for correctness check
# ----------------------------------------------------------------------------
def _ref_qlin(a, w, b, silu=False):
    o = jnp.dot(_fake_quant_act(a, 8), _fake_quant_weight(w, 4, axis=1),
                precision=lax.Precision.HIGHEST) + b
    return o * jax.nn.sigmoid(o) if silu else o


def _ref_qconv(x, w, b, silu=False):
    o = lax.conv_general_dilated(
        _fake_quant_act(x, 8), _fake_quant_weight(w, 4, axis=0), (1, 1), 'SAME',
        dimension_numbers=('NCHW', 'OIHW', 'NCHW'),
        precision=lax.Precision.HIGHEST)
    o = o + b[None, :, None, None]
    return o * jax.nn.sigmoid(o) if silu else o


def ref_forward(raw, x, timesteps, context, *, temb_dim):
    B, C, H, W = x.shape
    temb = _timestep_embedding(timesteps, temb_dim)
    temb = _ref_qlin(temb, raw['t_w1'], raw['t_b1'], silu=True)
    temb = _ref_qlin(temb, raw['t_w2'], raw['t_b2'])
    Bc, S, Dctx = context.shape
    ctx = _ref_qlin(context.reshape(B * S, Dctx), raw['c_w'], raw['c_b'])
    ctx = ctx.reshape(B, S, -1).mean(axis=1)
    h = _ref_qconv(x, raw['conv1_w'], raw['conv1_b'], silu=True)
    h = h + temb[:, :, None, None] + ctx[:, :, None, None]
    return _ref_qconv(h, raw['conv2_w'], raw['conv2_b'])


# ----------------------------------------------------------------------------
if __name__ == "__main__":
    B, C, H, W = 2, 4, 16, 16       # in_channels = 4, image_size = 16
    hidden, temb_dim, S, ctx_dim = 32, 32, 8, 32

    key = jax.random.PRNGKey(0)
    ks = jax.random.split(key, 12)
    raw = {
        'conv1_w': 0.1 * jax.random.normal(ks[0], (hidden, C, 3, 3), jnp.float32),
        'conv1_b': 0.1 * jax.random.normal(ks[1], (hidden,), jnp.float32),
        'conv2_w': 0.1 * jax.random.normal(ks[2], (C, hidden, 3, 3), jnp.float32),
        'conv2_b': 0.1 * jax.random.normal(ks[3], (C,), jnp.float32),
        't_w1': 0.1 * jax.random.normal(ks[4], (temb_dim, hidden), jnp.float32),
        't_b1': 0.1 * jax.random.normal(ks[5], (hidden,), jnp.float32),
        't_w2': 0.1 * jax.random.normal(ks[6], (hidden, hidden), jnp.float32),
        't_b2': 0.1 * jax.random.normal(ks[7], (hidden,), jnp.float32),
        'c_w': 0.1 * jax.random.normal(ks[8], (ctx_dim, hidden), jnp.float32),
        'c_b': 0.1 * jax.random.normal(ks[9], (hidden,), jnp.float32),
    }
    x = jax.random.normal(ks[10], (B, C, H, W), jnp.float32)
    context = jax.random.normal(ks[11], (B, S, ctx_dim), jnp.float32)
    timesteps = jnp.array([10.0, 500.0], dtype=jnp.float32)

    # one-time weight quantization (hoisted out of the kernel / forward)
    qparams = prepare_model_params(raw)

    fwd = jax.jit(functools.partial(quant_model_forward, temb_dim=temb_dim))
    out = jax.block_until_ready(fwd(qparams, x, timesteps, context))
    assert out.shape == (B, C, H, W)

    # 1) tight check of one fused quant-conv layer (identical inputs on both
    #    paths, so only f32 rounding differs; the integer GEMM itself is exact).
    conv1 = jax.block_until_ready(
        quant_conv2d(x, qparams['conv1_w'], qparams['conv1_w_d'],
                     qparams['conv1_b'], apply_silu=True))
    conv1_ref = jax.block_until_ready(
        _ref_qconv(x, raw['conv1_w'], raw['conv1_b'], silu=True))
    np.testing.assert_allclose(np.asarray(conv1), np.asarray(conv1_ref),
                               rtol=5e-4, atol=5e-4)

    # 2) end-to-end check.  The intermediate activation h is re-fake-quantized
    #    with a dynamically calibrated delta, so ulp-level differences between
    #    the two paths can flip a quantization level (each flip perturbs the
    #    output by ~delta_h*|w| ~ 5e-3); tolerance sized for a few such flips.
    ref = jax.block_until_ready(
        ref_forward(raw, x, timesteps, context, temb_dim=temb_dim))
    np.testing.assert_allclose(np.asarray(out), np.asarray(ref),
                               rtol=3e-2, atol=3e-2)
    print("KERNEL_OK")
</pallas_src>

<mosaic_0001>
module attributes {stable_mosaic.version = 11 : i64} {
  func.func @_qmm_kernel(%arg0: i32, %arg1: i32, %arg2: i32, %arg3: memref<4xf32, #tpu.memory_space<smem>>, %arg4: memref<256x128xf32, #tpu.memory_space<vmem>>, %arg5: memref<128x128xbf16, #tpu.memory_space<vmem>>, %arg6: memref<1x128xf32, #tpu.memory_space<vmem>>, %arg7: memref<1x128xf32, #tpu.memory_space<vmem>>, %arg8: memref<256x128xf32, #tpu.memory_space<vmem>>) attributes {dimension_semantics = [#tpu.dimension_semantics<parallel>, #tpu.dimension_semantics<parallel>, #tpu.dimension_semantics<arbitrary>], iteration_bounds = array<i64: 2, 1, 1>, scalar_prefetch = 0 : i64, scratch_operands = 0 : i64, tpu.core_type = #tpu.core_type<tc>, window_params = [{transform_indices = @transform_0, window_bounds = array<i64: 4>}, {transform_indices = @transform_1, window_bounds = array<i64: 256, 128>}, {transform_indices = @transform_2, window_bounds = array<i64: 128, 128>}, {transform_indices = @transform_3, window_bounds = array<i64: 1, 128>}, {transform_indices = @transform_4, window_bounds = array<i64: 1, 128>}, {transform_indices = @transform_5, window_bounds = array<i64: 256, 128>}]} {
    %c0 = arith.constant 0 : index
    %0 = memref.load %arg3[%c0] : memref<4xf32, #tpu.memory_space<smem>>
    %c1 = arith.constant 1 : index
    %1 = memref.load %arg3[%c1] : memref<4xf32, #tpu.memory_space<smem>>
    %c2 = arith.constant 2 : index
    %2 = memref.load %arg3[%c2] : memref<4xf32, #tpu.memory_space<smem>>
    %c0_0 = arith.constant 0 : index
    %c0_1 = arith.constant 0 : index
    %3 = vector.load %arg4[%c0_0, %c0_1] : memref<256x128xf32, #tpu.memory_space<vmem>>, vector<256x128xf32>
    %4 = vector.broadcast %0 : f32 to vector<256x128xf32>
    %5 = arith.mulf %3, %4 : vector<256x128xf32>
    %6 = math.roundeven %5 : vector<256x128xf32>
    %7 = vector.broadcast %1 : f32 to vector<256x128xf32>
    %8 = arith.addf %6, %7 : vector<256x128xf32>
    %cst = arith.constant 0.000000e+00 : f32
    %9 = vector.broadcast %cst : f32 to vector<256x128xf32>
    %10 = arith.maximumf %9, %8 : vector<256x128xf32>
    %11 = vector.broadcast %2 : f32 to vector<256x128xf32>
    %12 = arith.minimumf %11, %10 : vector<256x128xf32>
    %13 = vector.broadcast %1 : f32 to vector<256x128xf32>
    %14 = arith.subf %12, %13 : vector<256x128xf32>
    %15 = arith.truncf %14 : vector<256x128xf32> to vector<256x128xbf16>
    %c0_2 = arith.constant 0 : index
    %c0_3 = arith.constant 0 : index
    %16 = vector.load %arg5[%c0_2, %c0_3] : memref<128x128xbf16, #tpu.memory_space<vmem>>, vector<128x128xbf16>
    %cst_4 = arith.constant dense<0.000000e+00> : vector<256x128xf32>
    %17 = tpu.matmul %15, %16, %cst_4 {dimension_numbers = #tpu.dot_dimension_numbers<[1], [0], [0], [1], [0, 0, 1, 1], [], []>} : vector<256x128xbf16>, vector<128x128xbf16>, vector<256x128xf32> -> vector<256x128xf32>
    %c0_i32 = arith.constant 0 : i32
    %18 = arith.cmpi eq, %arg2, %c0_i32 : i32
    %19 = arith.extui %18 : i1 to i32
    %c0_i32_5 = arith.constant 0 : i32
    %20 = arith.cmpi ne, %19, %c0_i32_5 : i32
    scf.if %20 {
      %c0_10 = arith.constant 0 : index
      %c0_11 = arith.constant 0 : index
      %27 = vector.load %arg8[%c0_10, %c0_11] : memref<256x128xf32, #tpu.memory_space<vmem>>, vector<256x128xf32>
      tpu.vector_store %arg8[%c0_10, %c0_11], %17 {strides = array<i32>} : memref<256x128xf32, #tpu.memory_space<vmem>>, vector<256x128xf32>,
    } else {
    }
    %c0_i32_6 = arith.constant 0 : i32
    %21 = arith.cmpi ne, %arg2, %c0_i32_6 : i32
    %22 = arith.extui %21 : i1 to i32
    %c0_i32_7 = arith.constant 0 : i32
    %23 = arith.cmpi ne, %22, %c0_i32_7 : i32
    scf.if %23 {
      %c0_10 = arith.constant 0 : index
      %c0_11 = arith.constant 0 : index
      %27 = vector.load %arg8[%c0_10, %c0_11] : memref<256x128xf32, #tpu.memory_space<vmem>>, vector<256x128xf32>
      %28 = arith.addf %27, %17 : vector<256x128xf32>
      %c0_12 = arith.constant 0 : index
      %c0_13 = arith.constant 0 : index
      %29 = vector.load %arg8[%c0_12, %c0_13] : memref<256x128xf32, #tpu.memory_space<vmem>>, vector<256x128xf32>
      tpu.vector_store %arg8[%c0_12, %c0_13], %28 {strides = array<i32>} : memref<256x128xf32, #tpu.memory_space<vmem>>, vector<256x128xf32>,
    } else {
    }
    %c0_i32_8 = arith.constant 0 : i32
    %24 = arith.cmpi eq, %arg2, %c0_i32_8 : i32
    %25 = arith.extui %24 : i1 to i32
    %c0_i32_9 = arith.constant 0 : i32
    %26 = arith.cmpi ne, %25, %c0_i32_9 : i32
    scf.if %26 {
      %c0_10 = arith.constant 0 : index
      %c0_11 = arith.constant 0 : index
      %27 = vector.load %arg8[%c0_10, %c0_11] : memref<256x128xf32, #tpu.memory_space<vmem>>, vector<256x128xf32>
      %c0_12 = arith.constant 0 : index
      %c0_13 = arith.constant 0 : index
      %28 = vector.load %arg6[%c0_12, %c0_13] : memref<1x128xf32, #tpu.memory_space<vmem>>, vector<1x128xf32>
      %29 = vector.broadcast %28 : vector<1x128xf32> to vector<256x128xf32>
      %30 = arith.mulf %27, %29 : vector<256x128xf32>
      %c0_14 = arith.constant 0 : index
      %c0_15 = arith.constant 0 : index
      %31 = vector.load %arg7[%c0_14, %c0_15] : memref<1x128xf32, #tpu.memory_space<vmem>>, vector<1x128xf32>
      %32 = vector.broadcast %31 : vector<1x128xf32> to vector<256x128xf32>
      %33 = arith.addf %30, %32 : vector<256x128xf32>
      %34 = arith.negf %33 : vector<256x128xf32>
      %35 = math.exp %34 : vector<256x128xf32>
      %cst_16 = arith.constant 1.000000e+00 : f32
      %36 = vector.broadcast %cst_16 : f32 to vector<256x128xf32>
      %37 = arith.addf %36, %35 : vector<256x128xf32>
      %38 = arith.divf %36, %37 : vector<256x128xf32>
      %39 = arith.mulf %33, %38 : vector<256x128xf32>
      %c0_17 = arith.constant 0 : index
      %c0_18 = arith.constant 0 : index
      %40 = vector.load %arg8[%c0_17, %c0_18] : memref<256x128xf32, #tpu.memory_space<vmem>>, vector<256x128xf32>
      tpu.vector_store %arg8[%c0_17, %c0_18], %39 {strides = array<i32>} : memref<256x128xf32, #tpu.memory_space<vmem>>, vector<256x128xf32>,
    } else {
    }
    return
  }
  func.func @transform_0(%arg0: i32, %arg1: i32, %arg2: i32) -> i32 {
    %c0_i32 = arith.constant 0 : i32
    %c0_i32_0 = arith.constant 0 : i32
    return %c0_i32 : i32
  }
  func.func @transform_1(%arg0: i32, %arg1: i32, %arg2: i32) -> (i32, i32) {
    %c0_i32 = arith.constant 0 : i32
    return %arg0, %arg2 : i32, i32
  }
  func.func @transform_2(%arg0: i32, %arg1: i32, %arg2: i32) -> (i32, i32) {
    %c0_i32 = arith.constant 0 : i32
    return %arg2, %arg1 : i32, i32
  }
  func.func @transform_3(%arg0: i32, %arg1: i32, %arg2: i32) -> (i32, i32) {
    %c0_i32 = arith.constant 0 : i32
    %c0_i32_0 = arith.constant 0 : i32
    return %c0_i32, %arg1 : i32, i32
  }
  func.func @transform_4(%arg0: i32, %arg1: i32, %arg2: i32) -> (i32, i32) {
    %c0_i32 = arith.constant 0 : i32
    %c0_i32_0 = arith.constant 0 : i32
    return %c0_i32, %arg1 : i32, i32
  }
  func.func @transform_5(%arg0: i32, %arg1: i32, %arg2: i32) -> (i32, i32) {
    %c0_i32 = arith.constant 0 : i32
    return %arg0, %arg1 : i32, i32
  }
}

module attributes {stable_mosaic.version = 11 : i64} {
  func.func @_qmm_kernel(%arg0: i32, %arg1: i32, %arg2: i32, %arg3: memref<4xf32, #tpu.memory_space<smem>>, %arg4: memref<16x128xf32, #tpu.memory_space<vmem>>, %arg5: memref<128x128xbf16, #tpu.memory_space<vmem>>, %arg6: memref<1x128xf32, #tpu.memory_space<vmem>>, %arg7: memref<1x128xf32, #tpu.memory_space<vmem>>, %arg8: memref<16x128xf32, #tpu.memory_space<vmem>>) attributes {dimension_semantics = [#tpu.dimension_semantics<parallel>, #tpu.dimension_semantics<parallel>, #tpu.dimension_semantics<arbitrary>], iteration_bounds = array<i64: 1, 1, 1>, scalar_prefetch = 0 : i64, scratch_operands = 0 : i64, tpu.core_type = #tpu.core_type<tc>, window_params = [{transform_indices = @transform_0, window_bounds = array<i64: 4>}, {transform_indices = @transform_1, window_bounds = array<i64: 16, 128>}, {transform_indices = @transform_2, window_bounds = array<i64: 128, 128>}, {transform_indices = @transform_3, window_bounds = array<i64: 1, 128>}, {transform_indices = @transform_4, window_bounds = array<i64: 1, 128>}, {transform_indices = @transform_5, window_bounds = array<i64: 16, 128>}]} {
    %c0 = arith.constant 0 : index
    %0 = memref.load %arg3[%c0] : memref<4xf32, #tpu.memory_space<smem>>
    %c1 = arith.constant 1 : index
    %1 = memref.load %arg3[%c1] : memref<4xf32, #tpu.memory_space<smem>>
    %c2 = arith.constant 2 : index
    %2 = memref.load %arg3[%c2] : memref<4xf32, #tpu.memory_space<smem>>
    %c0_0 = arith.constant 0 : index
    %c0_1 = arith.constant 0 : index
    %3 = vector.load %arg4[%c0_0, %c0_1] : memref<16x128xf32, #tpu.memory_space<vmem>>, vector<16x128xf32>
    %4 = vector.broadcast %0 : f32 to vector<16x128xf32>
    %5 = arith.mulf %3, %4 : vector<16x128xf32>
    %6 = math.roundeven %5 : vector<16x128xf32>
    %7 = vector.broadcast %1 : f32 to vector<16x128xf32>
    %8 = arith.addf %6, %7 : vector<16x128xf32>
    %cst = arith.constant 0.000000e+00 : f32
    %9 = vector.broadcast %cst : f32 to vector<16x128xf32>
    %10 = arith.maximumf %9, %8 : vector<16x128xf32>
    %11 = vector.broadcast %2 : f32 to vector<16x128xf32>
    %12 = arith.minimumf %11, %10 : vector<16x128xf32>
    %13 = vector.broadcast %1 : f32 to vector<16x128xf32>
    %14 = arith.subf %12, %13 : vector<16x128xf32>
    %15 = arith.truncf %14 : vector<16x128xf32> to vector<16x128xbf16>
    %c0_2 = arith.constant 0 : index
    %c0_3 = arith.constant 0 : index
    %16 = vector.load %arg5[%c0_2, %c0_3] : memref<128x128xbf16, #tpu.memory_space<vmem>>, vector<128x128xbf16>
    %cst_4 = arith.constant dense<0.000000e+00> : vector<16x128xf32>
    %17 = tpu.matmul %15, %16, %cst_4 {dimension_numbers = #tpu.dot_dimension_numbers<[1], [0], [0], [1], [0, 0, 1, 1], [], []>} : vector<16x128xbf16>, vector<128x128xbf16>, vector<16x128xf32> -> vector<16x128xf32>
    %c0_i32 = arith.constant 0 : i32
    %18 = arith.cmpi eq, %arg2, %c0_i32 : i32
    %19 = arith.extui %18 : i1 to i32
    %c0_i32_5 = arith.constant 0 : i32
    %20 = arith.cmpi ne, %19, %c0_i32_5 : i32
    scf.if %20 {
      %c0_10 = arith.constant 0 : index
      %c0_11 = arith.constant 0 : index
      %27 = vector.load %arg8[%c0_10, %c0_11] : memref<16x128xf32, #tpu.memory_space<vmem>>, vector<16x128xf32>
      tpu.vector_store %arg8[%c0_10, %c0_11], %17 {strides = array<i32>} : memref<16x128xf32, #tpu.memory_space<vmem>>, vector<16x128xf32>,
    } else {
    }
    %c0_i32_6 = arith.constant 0 : i32
    %21 = arith.cmpi ne, %arg2, %c0_i32_6 : i32
    %22 = arith.extui %21 : i1 to i32
    %c0_i32_7 = arith.constant 0 : i32
    %23 = arith.cmpi ne, %22, %c0_i32_7 : i32
    scf.if %23 {
      %c0_10 = arith.constant 0 : index
      %c0_11 = arith.constant 0 : index
      %27 = vector.load %arg8[%c0_10, %c0_11] : memref<16x128xf32, #tpu.memory_space<vmem>>, vector<16x128xf32>
      %28 = arith.addf %27, %17 : vector<16x128xf32>
      %c0_12 = arith.constant 0 : index
      %c0_13 = arith.constant 0 : index
      %29 = vector.load %arg8[%c0_12, %c0_13] : memref<16x128xf32, #tpu.memory_space<vmem>>, vector<16x128xf32>
      tpu.vector_store %arg8[%c0_12, %c0_13], %28 {strides = array<i32>} : memref<16x128xf32, #tpu.memory_space<vmem>>, vector<16x128xf32>,
    } else {
    }
    %c0_i32_8 = arith.constant 0 : i32
    %24 = arith.cmpi eq, %arg2, %c0_i32_8 : i32
    %25 = arith.extui %24 : i1 to i32
    %c0_i32_9 = arith.constant 0 : i32
    %26 = arith.cmpi ne, %25, %c0_i32_9 : i32
    scf.if %26 {
      %c0_10 = arith.constant 0 : index
      %c0_11 = arith.constant 0 : index
      %27 = vector.load %arg8[%c0_10, %c0_11] : memref<16x128xf32, #tpu.memory_space<vmem>>, vector<16x128xf32>
      %c0_12 = arith.constant 0 : index
      %c0_13 = arith.constant 0 : index
      %28 = vector.load %arg6[%c0_12, %c0_13] : memref<1x128xf32, #tpu.memory_space<vmem>>, vector<1x128xf32>
      %29 = vector.broadcast %28 : vector<1x128xf32> to vector<16x128xf32>
      %30 = arith.mulf %27, %29 : vector<16x128xf32>
      %c0_14 = arith.constant 0 : index
      %c0_15 = arith.constant 0 : index
      %31 = vector.load %arg7[%c0_14, %c0_15] : memref<1x128xf32, #tpu.memory_space<vmem>>, vector<1x128xf32>
      %32 = vector.broadcast %31 : vector<1x128xf32> to vector<16x128xf32>
      %33 = arith.addf %30, %32 : vector<16x128xf32>
      %c0_16 = arith.constant 0 : index
      %c0_17 = arith.constant 0 : index
      %34 = vector.load %arg8[%c0_16, %c0_17] : memref<16x128xf32, #tpu.memory_space<vmem>>, vector<16x128xf32>
      tpu.vector_store %arg8[%c0_16, %c0_17], %33 {strides = array<i32>} : memref<16x128xf32, #tpu.memory_space<vmem>>, vector<16x128xf32>,
    } else {
    }
    return
  }
  func.func @transform_0(%arg0: i32, %arg1: i32, %arg2: i32) -> i32 {
    %c0_i32 = arith.constant 0 : i32
    %c0_i32_0 = arith.constant 0 : i32
    return %c0_i32 : i32
  }
  func.func @transform_1(%arg0: i32, %arg1: i32, %arg2: i32) -> (i32, i32) {
    %c0_i32 = arith.constant 0 : i32
    return %arg0, %arg2 : i32, i32
  }
  func.func @transform_2(%arg0: i32, %arg1: i32, %arg2: i32) -> (i32, i32) {
    %c0_i32 = arith.constant 0 : i32
    return %arg2, %arg1 : i32, i32
  }
  func.func @transform_3(%arg0: i32, %arg1: i32, %arg2: i32) -> (i32, i32) {
    %c0_i32 = arith.constant 0 : i32
    %c0_i32_0 = arith.constant 0 : i32
    return %c0_i32, %arg1 : i32, i32
  }
  func.func @transform_4(%arg0: i32, %arg1: i32, %arg2: i32) -> (i32, i32) {
    %c0_i32 = arith.constant 0 : i32
    %c0_i32_0 = arith.constant 0 : i32
    return %c0_i32, %arg1 : i32, i32
  }
  func.func @transform_5(%arg0: i32, %arg1: i32, %arg2: i32) -> (i32, i32) {
    %c0_i32 = arith.constant 0 : i32
    return %arg0, %arg1 : i32, i32
  }
}

module attributes {stable_mosaic.version = 11 : i64} {
  func.func @_qmm_kernel(%arg0: i32, %arg1: i32, %arg2: i32, %arg3: memref<4xf32, #tpu.memory_space<smem>>, %arg4: memref<8x128xf32, #tpu.memory_space<vmem>>, %arg5: memref<128x128xbf16, #tpu.memory_space<vmem>>, %arg6: memref<1x128xf32, #tpu.memory_space<vmem>>, %arg7: memref<1x128xf32, #tpu.memory_space<vmem>>, %arg8: memref<8x128xf32, #tpu.memory_space<vmem>>) attributes {dimension_semantics = [#tpu.dimension_semantics<parallel>, #tpu.dimension_semantics<parallel>, #tpu.dimension_semantics<arbitrary>], iteration_bounds = array<i64: 1, 1, 1>, scalar_prefetch = 0 : i64, scratch_operands = 0 : i64, tpu.core_type = #tpu.core_type<tc>, window_params = [{transform_indices = @transform_0, window_bounds = array<i64: 4>}, {transform_indices = @transform_1, window_bounds = array<i64: 8, 128>}, {transform_indices = @transform_2, window_bounds = array<i64: 128, 128>}, {transform_indices = @transform_3, window_bounds = array<i64: 1, 128>}, {transform_indices = @transform_4, window_bounds = array<i64: 1, 128>}, {transform_indices = @transform_5, window_bounds = array<i64: 8, 128>}]} {
    %c0 = arith.constant 0 : index
    %0 = memref.load %arg3[%c0] : memref<4xf32, #tpu.memory_space<smem>>
    %c1 = arith.constant 1 : index
    %1 = memref.load %arg3[%c1] : memref<4xf32, #tpu.memory_space<smem>>
    %c2 = arith.constant 2 : index
    %2 = memref.load %arg3[%c2] : memref<4xf32, #tpu.memory_space<smem>>
    %c0_0 = arith.constant 0 : index
    %c0_1 = arith.constant 0 : index
    %3 = vector.load %arg4[%c0_0, %c0_1] : memref<8x128xf32, #tpu.memory_space<vmem>>, vector<8x128xf32>
    %4 = vector.broadcast %0 : f32 to vector<8x128xf32>
    %5 = arith.mulf %3, %4 : vector<8x128xf32>
    %6 = math.roundeven %5 : vector<8x128xf32>
    %7 = vector.broadcast %1 : f32 to vector<8x128xf32>
    %8 = arith.addf %6, %7 : vector<8x128xf32>
    %cst = arith.constant 0.000000e+00 : f32
    %9 = vector.broadcast %cst : f32 to vector<8x128xf32>
    %10 = arith.maximumf %9, %8 : vector<8x128xf32>
    %11 = vector.broadcast %2 : f32 to vector<8x128xf32>
    %12 = arith.minimumf %11, %10 : vector<8x128xf32>
    %13 = vector.broadcast %1 : f32 to vector<8x128xf32>
    %14 = arith.subf %12, %13 : vector<8x128xf32>
    %15 = arith.truncf %14 : vector<8x128xf32> to vector<8x128xbf16>
    %c0_2 = arith.constant 0 : index
    %c0_3 = arith.constant 0 : index
    %16 = vector.load %arg5[%c0_2, %c0_3] : memref<128x128xbf16, #tpu.memory_space<vmem>>, vector<128x128xbf16>
    %cst_4 = arith.constant dense<0.000000e+00> : vector<8x128xf32>
    %17 = tpu.matmul %15, %16, %cst_4 {dimension_numbers = #tpu.dot_dimension_numbers<[1], [0], [0], [1], [0, 0, 1, 1], [], []>} : vector<8x128xbf16>, vector<128x128xbf16>, vector<8x128xf32> -> vector<8x128xf32>
    %c0_i32 = arith.constant 0 : i32
    %18 = arith.cmpi eq, %arg2, %c0_i32 : i32
    %19 = arith.extui %18 : i1 to i32
    %c0_i32_5 = arith.constant 0 : i32
    %20 = arith.cmpi ne, %19, %c0_i32_5 : i32
    scf.if %20 {
      %c0_10 = arith.constant 0 : index
      %c0_11 = arith.constant 0 : index
      %27 = vector.load %arg8[%c0_10, %c0_11] : memref<8x128xf32, #tpu.memory_space<vmem>>, vector<8x128xf32>
      tpu.vector_store %arg8[%c0_10, %c0_11], %17 {strides = array<i32>} : memref<8x128xf32, #tpu.memory_space<vmem>>, vector<8x128xf32>,
    } else {
    }
    %c0_i32_6 = arith.constant 0 : i32
    %21 = arith.cmpi ne, %arg2, %c0_i32_6 : i32
    %22 = arith.extui %21 : i1 to i32
    %c0_i32_7 = arith.constant 0 : i32
    %23 = arith.cmpi ne, %22, %c0_i32_7 : i32
    scf.if %23 {
      %c0_10 = arith.constant 0 : index
      %c0_11 = arith.constant 0 : index
      %27 = vector.load %arg8[%c0_10, %c0_11] : memref<8x128xf32, #tpu.memory_space<vmem>>, vector<8x128xf32>
      %28 = arith.addf %27, %17 : vector<8x128xf32>
      %c0_12 = arith.constant 0 : index
      %c0_13 = arith.constant 0 : index
      %29 = vector.load %arg8[%c0_12, %c0_13] : memref<8x128xf32, #tpu.memory_space<vmem>>, vector<8x128xf32>
      tpu.vector_store %arg8[%c0_12, %c0_13], %28 {strides = array<i32>} : memref<8x128xf32, #tpu.memory_space<vmem>>, vector<8x128xf32>,
    } else {
    }
    %c0_i32_8 = arith.constant 0 : i32
    %24 = arith.cmpi eq, %arg2, %c0_i32_8 : i32
    %25 = arith.extui %24 : i1 to i32
    %c0_i32_9 = arith.constant 0 : i32
    %26 = arith.cmpi ne, %25, %c0_i32_9 : i32
    scf.if %26 {
      %c0_10 = arith.constant 0 : index
      %c0_11 = arith.constant 0 : index
      %27 = vector.load %arg8[%c0_10, %c0_11] : memref<8x128xf32, #tpu.memory_space<vmem>>, vector<8x128xf32>
      %c0_12 = arith.constant 0 : index
      %c0_13 = arith.constant 0 : index
      %28 = vector.load %arg6[%c0_12, %c0_13] : memref<1x128xf32, #tpu.memory_space<vmem>>, vector<1x128xf32>
      %29 = vector.broadcast %28 : vector<1x128xf32> to vector<8x128xf32>
      %30 = arith.mulf %27, %29 : vector<8x128xf32>
      %c0_14 = arith.constant 0 : index
      %c0_15 = arith.constant 0 : index
      %31 = vector.load %arg7[%c0_14, %c0_15] : memref<1x128xf32, #tpu.memory_space<vmem>>, vector<1x128xf32>
      %32 = vector.broadcast %31 : vector<1x128xf32> to vector<8x128xf32>
      %33 = arith.addf %30, %32 : vector<8x128xf32>
      %34 = arith.negf %33 : vector<8x128xf32>
      %35 = math.exp %34 : vector<8x128xf32>
      %cst_16 = arith.constant 1.000000e+00 : f32
      %36 = vector.broadcast %cst_16 : f32 to vector<8x128xf32>
      %37 = arith.addf %36, %35 : vector<8x128xf32>
      %38 = arith.divf %36, %37 : vector<8x128xf32>
      %39 = arith.mulf %33, %38 : vector<8x128xf32>
      %c0_17 = arith.constant 0 : index
      %c0_18 = arith.constant 0 : index
      %40 = vector.load %arg8[%c0_17, %c0_18] : memref<8x128xf32, #tpu.memory_space<vmem>>, vector<8x128xf32>
      tpu.vector_store %arg8[%c0_17, %c0_18], %39 {strides = array<i32>} : memref<8x128xf32, #tpu.memory_space<vmem>>, vector<8x128xf32>,
    } else {
    }
    return
  }
  func.func @transform_0(%arg0: i32, %arg1: i32, %arg2: i32) -> i32 {
    %c0_i32 = arith.constant 0 : i32
    %c0_i32_0 = arith.constant 0 : i32
    return %c0_i32 : i32
  }
  func.func @transform_1(%arg0: i32, %arg1: i32, %arg2: i32) -> (i32, i32) {
    %c0_i32 = arith.constant 0 : i32
    return %arg0, %arg2 : i32, i32
  }
  func.func @transform_2(%arg0: i32, %arg1: i32, %arg2: i32) -> (i32, i32) {
    %c0_i32 = arith.constant 0 : i32
    return %arg2, %arg1 : i32, i32
  }
  func.func @transform_3(%arg0: i32, %arg1: i32, %arg2: i32) -> (i32, i32) {
    %c0_i32 = arith.constant 0 : i32
    %c0_i32_0 = arith.constant 0 : i32
    return %c0_i32, %arg1 : i32, i32
  }
  func.func @transform_4(%arg0: i32, %arg1: i32, %arg2: i32) -> (i32, i32) {
    %c0_i32 = arith.constant 0 : i32
    %c0_i32_0 = arith.constant 0 : i32
    return %c0_i32, %arg1 : i32, i32
  }
  func.func @transform_5(%arg0: i32, %arg1: i32, %arg2: i32) -> (i32, i32) {
    %c0_i32 = arith.constant 0 : i32
    return %arg0, %arg1 : i32, i32
  }
}

module attributes {stable_mosaic.version = 11 : i64} {
  func.func @_qmm_kernel(%arg0: i32, %arg1: i32, %arg2: i32, %arg3: memref<4xf32, #tpu.memory_space<smem>>, %arg4: memref<8x128xf32, #tpu.memory_space<vmem>>, %arg5: memref<128x128xbf16, #tpu.memory_space<vmem>>, %arg6: memref<1x128xf32, #tpu.memory_space<vmem>>, %arg7: memref<1x128xf32, #tpu.memory_space<vmem>>, %arg8: memref<8x128xf32, #tpu.memory_space<vmem>>) attributes {dimension_semantics = [#tpu.dimension_semantics<parallel>, #tpu.dimension_semantics<parallel>, #tpu.dimension_semantics<arbitrary>], iteration_bounds = array<i64: 1, 1, 1>, scalar_prefetch = 0 : i64, scratch_operands = 0 : i64, tpu.core_type = #tpu.core_type<tc>, window_params = [{transform_indices = @transform_0, window_bounds = array<i64: 4>}, {transform_indices = @transform_1, window_bounds = array<i64: 8, 128>}, {transform_indices = @transform_2, window_bounds = array<i64: 128, 128>}, {transform_indices = @transform_3, window_bounds = array<i64: 1, 128>}, {transform_indices = @transform_4, window_bounds = array<i64: 1, 128>}, {transform_indices = @transform_5, window_bounds = array<i64: 8, 128>}]} {
    %c0 = arith.constant 0 : index
    %0 = memref.load %arg3[%c0] : memref<4xf32, #tpu.memory_space<smem>>
    %c1 = arith.constant 1 : index
    %1 = memref.load %arg3[%c1] : memref<4xf32, #tpu.memory_space<smem>>
    %c2 = arith.constant 2 : index
    %2 = memref.load %arg3[%c2] : memref<4xf32, #tpu.memory_space<smem>>
    %c0_0 = arith.constant 0 : index
    %c0_1 = arith.constant 0 : index
    %3 = vector.load %arg4[%c0_0, %c0_1] : memref<8x128xf32, #tpu.memory_space<vmem>>, vector<8x128xf32>
    %4 = vector.broadcast %0 : f32 to vector<8x128xf32>
    %5 = arith.mulf %3, %4 : vector<8x128xf32>
    %6 = math.roundeven %5 : vector<8x128xf32>
    %7 = vector.broadcast %1 : f32 to vector<8x128xf32>
    %8 = arith.addf %6, %7 : vector<8x128xf32>
    %cst = arith.constant 0.000000e+00 : f32
    %9 = vector.broadcast %cst : f32 to vector<8x128xf32>
    %10 = arith.maximumf %9, %8 : vector<8x128xf32>
    %11 = vector.broadcast %2 : f32 to vector<8x128xf32>
    %12 = arith.minimumf %11, %10 : vector<8x128xf32>
    %13 = vector.broadcast %1 : f32 to vector<8x128xf32>
    %14 = arith.subf %12, %13 : vector<8x128xf32>
    %15 = arith.truncf %14 : vector<8x128xf32> to vector<8x128xbf16>
    %c0_2 = arith.constant 0 : index
    %c0_3 = arith.constant 0 : index
    %16 = vector.load %arg5[%c0_2, %c0_3] : memref<128x128xbf16, #tpu.memory_space<vmem>>, vector<128x128xbf16>
    %cst_4 = arith.constant dense<0.000000e+00> : vector<8x128xf32>
    %17 = tpu.matmul %15, %16, %cst_4 {dimension_numbers = #tpu.dot_dimension_numbers<[1], [0], [0], [1], [0, 0, 1, 1], [], []>} : vector<8x128xbf16>, vector<128x128xbf16>, vector<8x128xf32> -> vector<8x128xf32>
    %c0_i32 = arith.constant 0 : i32
    %18 = arith.cmpi eq, %arg2, %c0_i32 : i32
    %19 = arith.extui %18 : i1 to i32
    %c0_i32_5 = arith.constant 0 : i32
    %20 = arith.cmpi ne, %19, %c0_i32_5 : i32
    scf.if %20 {
      %c0_10 = arith.constant 0 : index
      %c0_11 = arith.constant 0 : index
      %27 = vector.load %arg8[%c0_10, %c0_11] : memref<8x128xf32, #tpu.memory_space<vmem>>, vector<8x128xf32>
      tpu.vector_store %arg8[%c0_10, %c0_11], %17 {strides = array<i32>} : memref<8x128xf32, #tpu.memory_space<vmem>>, vector<8x128xf32>,
    } else {
    }
    %c0_i32_6 = arith.constant 0 : i32
    %21 = arith.cmpi ne, %arg2, %c0_i32_6 : i32
    %22 = arith.extui %21 : i1 to i32
    %c0_i32_7 = arith.constant 0 : i32
    %23 = arith.cmpi ne, %22, %c0_i32_7 : i32
    scf.if %23 {
      %c0_10 = arith.constant 0 : index
      %c0_11 = arith.constant 0 : index
      %27 = vector.load %arg8[%c0_10, %c0_11] : memref<8x128xf32, #tpu.memory_space<vmem>>, vector<8x128xf32>
      %28 = arith.addf %27, %17 : vector<8x128xf32>
      %c0_12 = arith.constant 0 : index
      %c0_13 = arith.constant 0 : index
      %29 = vector.load %arg8[%c0_12, %c0_13] : memref<8x128xf32, #tpu.memory_space<vmem>>, vector<8x128xf32>
      tpu.vector_store %arg8[%c0_12, %c0_13], %28 {strides = array<i32>} : memref<8x128xf32, #tpu.memory_space<vmem>>, vector<8x128xf32>,
    } else {
    }
    %c0_i32_8 = arith.constant 0 : i32
    %24 = arith.cmpi eq, %arg2, %c0_i32_8 : i32
    %25 = arith.extui %24 : i1 to i32
    %c0_i32_9 = arith.constant 0 : i32
    %26 = arith.cmpi ne, %25, %c0_i32_9 : i32
    scf.if %26 {
      %c0_10 = arith.constant 0 : index
      %c0_11 = arith.constant 0 : index
      %27 = vector.load %arg8[%c0_10, %c0_11] : memref<8x128xf32, #tpu.memory_space<vmem>>, vector<8x128xf32>
      %c0_12 = arith.constant 0 : index
      %c0_13 = arith.constant 0 : index
      %28 = vector.load %arg6[%c0_12, %c0_13] : memref<1x128xf32, #tpu.memory_space<vmem>>, vector<1x128xf32>
      %29 = vector.broadcast %28 : vector<1x128xf32> to vector<8x128xf32>
      %30 = arith.mulf %27, %29 : vector<8x128xf32>
      %c0_14 = arith.constant 0 : index
      %c0_15 = arith.constant 0 : index
      %31 = vector.load %arg7[%c0_14, %c0_15] : memref<1x128xf32, #tpu.memory_space<vmem>>, vector<1x128xf32>
      %32 = vector.broadcast %31 : vector<1x128xf32> to vector<8x128xf32>
      %33 = arith.addf %30, %32 : vector<8x128xf32>
      %c0_16 = arith.constant 0 : index
      %c0_17 = arith.constant 0 : index
      %34 = vector.load %arg8[%c0_16, %c0_17] : memref<8x128xf32, #tpu.memory_space<vmem>>, vector<8x128xf32>
      tpu.vector_store %arg8[%c0_16, %c0_17], %33 {strides = array<i32>} : memref<8x128xf32, #tpu.memory_space<vmem>>, vector<8x128xf32>,
    } else {
    }
    return
  }
  func.func @transform_0(%arg0: i32, %arg1: i32, %arg2: i32) -> i32 {
    %c0_i32 = arith.constant 0 : i32
    %c0_i32_0 = arith.constant 0 : i32
    return %c0_i32 : i32
  }
  func.func @transform_1(%arg0: i32, %arg1: i32, %arg2: i32) -> (i32, i32) {
    %c0_i32 = arith.constant 0 : i32
    return %arg0, %arg2 : i32, i32
  }
  func.func @transform_2(%arg0: i32, %arg1: i32, %arg2: i32) -> (i32, i32) {
    %c0_i32 = arith.constant 0 : i32
    return %arg2, %arg1 : i32, i32
  }
  func.func @transform_3(%arg0: i32, %arg1: i32, %arg2: i32) -> (i32, i32) {
    %c0_i32 = arith.constant 0 : i32
    %c0_i32_0 = arith.constant 0 : i32
    return %c0_i32, %arg1 : i32, i32
  }
  func.func @transform_4(%arg0: i32, %arg1: i32, %arg2: i32) -> (i32, i32) {
    %c0_i32 = arith.constant 0 : i32
    %c0_i32_0 = arith.constant 0 : i32
    return %c0_i32, %arg1 : i32, i32
  }
  func.func @transform_5(%arg0: i32, %arg1: i32, %arg2: i32) -> (i32, i32) {
    %c0_i32 = arith.constant 0 : i32
    return %arg0, %arg1 : i32, i32
  }
}

module attributes {stable_mosaic.version = 11 : i64} {
  func.func @_qmm_kernel(%arg0: i32, %arg1: i32, %arg2: i32, %arg3: memref<4xf32, #tpu.memory_space<smem>>, %arg4: memref<256x384xf32, #tpu.memory_space<vmem>>, %arg5: memref<384x128xbf16, #tpu.memory_space<vmem>>, %arg6: memref<1x128xf32, #tpu.memory_space<vmem>>, %arg7: memref<1x128xf32, #tpu.memory_space<vmem>>, %arg8: memref<256x128xf32, #tpu.memory_space<vmem>>) attributes {dimension_semantics = [#tpu.dimension_semantics<parallel>, #tpu.dimension_semantics<parallel>, #tpu.dimension_semantics<arbitrary>], iteration_bounds = array<i64: 2, 1, 1>, scalar_prefetch = 0 : i64, scratch_operands = 0 : i64, tpu.core_type = #tpu.core_type<tc>, window_params = [{transform_indices = @transform_0, window_bounds = array<i64: 4>}, {transform_indices = @transform_1, window_bounds = array<i64: 256, 384>}, {transform_indices = @transform_2, window_bounds = array<i64: 384, 128>}, {transform_indices = @transform_3, window_bounds = array<i64: 1, 128>}, {transform_indices = @transform_4, window_bounds = array<i64: 1, 128>}, {transform_indices = @transform_5, window_bounds = array<i64: 256, 128>}]} {
    %c0 = arith.constant 0 : index
    %0 = memref.load %arg3[%c0] : memref<4xf32, #tpu.memory_space<smem>>
    %c1 = arith.constant 1 : index
    %1 = memref.load %arg3[%c1] : memref<4xf32, #tpu.memory_space<smem>>
    %c2 = arith.constant 2 : index
    %2 = memref.load %arg3[%c2] : memref<4xf32, #tpu.memory_space<smem>>
    %c0_0 = arith.constant 0 : index
    %c0_1 = arith.constant 0 : index
    %3 = vector.load %arg4[%c0_0, %c0_1] : memref<256x384xf32, #tpu.memory_space<vmem>>, vector<256x384xf32>
    %4 = vector.broadcast %0 : f32 to vector<256x384xf32>
    %5 = arith.mulf %3, %4 : vector<256x384xf32>
    %6 = math.roundeven %5 : vector<256x384xf32>
    %7 = vector.broadcast %1 : f32 to vector<256x384xf32>
    %8 = arith.addf %6, %7 : vector<256x384xf32>
    %cst = arith.constant 0.000000e+00 : f32
    %9 = vector.broadcast %cst : f32 to vector<256x384xf32>
    %10 = arith.maximumf %9, %8 : vector<256x384xf32>
    %11 = vector.broadcast %2 : f32 to vector<256x384xf32>
    %12 = arith.minimumf %11, %10 : vector<256x384xf32>
    %13 = vector.broadcast %1 : f32 to vector<256x384xf32>
    %14 = arith.subf %12, %13 : vector<256x384xf32>
    %15 = arith.truncf %14 : vector<256x384xf32> to vector<256x384xbf16>
    %c0_2 = arith.constant 0 : index
    %c0_3 = arith.constant 0 : index
    %16 = vector.load %arg5[%c0_2, %c0_3] : memref<384x128xbf16, #tpu.memory_space<vmem>>, vector<384x128xbf16>
    %cst_4 = arith.constant dense<0.000000e+00> : vector<256x128xf32>
    %17 = tpu.matmul %15, %16, %cst_4 {dimension_numbers = #tpu.dot_dimension_numbers<[1], [0], [0], [1], [0, 0, 1, 1], [], []>} : vector<256x384xbf16>, vector<384x128xbf16>, vector<256x128xf32> -> vector<256x128xf32>
    %c0_i32 = arith.constant 0 : i32
    %18 = arith.cmpi eq, %arg2, %c0_i32 : i32
    %19 = arith.extui %18 : i1 to i32
    %c0_i32_5 = arith.constant 0 : i32
    %20 = arith.cmpi ne, %19, %c0_i32_5 : i32
    scf.if %20 {
      %c0_10 = arith.constant 0 : index
      %c0_11 = arith.constant 0 : index
      %27 = vector.load %arg8[%c0_10, %c0_11] : memref<256x128xf32, #tpu.memory_space<vmem>>, vector<256x128xf32>
      tpu.vector_store %arg8[%c0_10, %c0_11], %17 {strides = array<i32>} : memref<256x128xf32, #tpu.memory_space<vmem>>, vector<256x128xf32>,
    } else {
    }
    %c0_i32_6 = arith.constant 0 : i32
    %21 = arith.cmpi ne, %arg2, %c0_i32_6 : i32
    %22 = arith.extui %21 : i1 to i32
    %c0_i32_7 = arith.constant 0 : i32
    %23 = arith.cmpi ne, %22, %c0_i32_7 : i32
    scf.if %23 {
      %c0_10 = arith.constant 0 : index
      %c0_11 = arith.constant 0 : index
      %27 = vector.load %arg8[%c0_10, %c0_11] : memref<256x128xf32, #tpu.memory_space<vmem>>, vector<256x128xf32>
      %28 = arith.addf %27, %17 : vector<256x128xf32>
      %c0_12 = arith.constant 0 : index
      %c0_13 = arith.constant 0 : index
      %29 = vector.load %arg8[%c0_12, %c0_13] : memref<256x128xf32, #tpu.memory_space<vmem>>, vector<256x128xf32>
      tpu.vector_store %arg8[%c0_12, %c0_13], %28 {strides = array<i32>} : memref<256x128xf32, #tpu.memory_space<vmem>>, vector<256x128xf32>,
    } else {
    }
    %c0_i32_8 = arith.constant 0 : i32
    %24 = arith.cmpi eq, %arg2, %c0_i32_8 : i32
    %25 = arith.extui %24 : i1 to i32
    %c0_i32_9 = arith.constant 0 : i32
    %26 = arith.cmpi ne, %25, %c0_i32_9 : i32
    scf.if %26 {
      %c0_10 = arith.constant 0 : index
      %c0_11 = arith.constant 0 : index
      %27 = vector.load %arg8[%c0_10, %c0_11] : memref<256x128xf32, #tpu.memory_space<vmem>>, vector<256x128xf32>
      %c0_12 = arith.constant 0 : index
      %c0_13 = arith.constant 0 : index
      %28 = vector.load %arg6[%c0_12, %c0_13] : memref<1x128xf32, #tpu.memory_space<vmem>>, vector<1x128xf32>
      %29 = vector.broadcast %28 : vector<1x128xf32> to vector<256x128xf32>
      %30 = arith.mulf %27, %29 : vector<256x128xf32>
      %c0_14 = arith.constant 0 : index
      %c0_15 = arith.constant 0 : index
      %31 = vector.load %arg7[%c0_14, %c0_15] : memref<1x128xf32, #tpu.memory_space<vmem>>, vector<1x128xf32>
      %32 = vector.broadcast %31 : vector<1x128xf32> to vector<256x128xf32>
      %33 = arith.addf %30, %32 : vector<256x128xf32>
      %c0_16 = arith.constant 0 : index
      %c0_17 = arith.constant 0 : index
      %34 = vector.load %arg8[%c0_16, %c0_17] : memref<256x128xf32, #tpu.memory_space<vmem>>, vector<256x128xf32>
      tpu.vector_store %arg8[%c0_16, %c0_17], %33 {strides = array<i32>} : memref<256x128xf32, #tpu.memory_space<vmem>>, vector<256x128xf32>,
    } else {
    }
    return
  }
  func.func @transform_0(%arg0: i32, %arg1: i32, %arg2: i32) -> i32 {
    %c0_i32 = arith.constant 0 : i32
    %c0_i32_0 = arith.constant 0 : i32
    return %c0_i32 : i32
  }
  func.func @transform_1(%arg0: i32, %arg1: i32, %arg2: i32) -> (i32, i32) {
    %c0_i32 = arith.constant 0 : i32
    return %arg0, %arg2 : i32, i32
  }
  func.func @transform_2(%arg0: i32, %arg1: i32, %arg2: i32) -> (i32, i32) {
    %c0_i32 = arith.constant 0 : i32
    return %arg2, %arg1 : i32, i32
  }
  func.func @transform_3(%arg0: i32, %arg1: i32, %arg2: i32) -> (i32, i32) {
    %c0_i32 = arith.constant 0 : i32
    %c0_i32_0 = arith.constant 0 : i32
    return %c0_i32, %arg1 : i32, i32
  }
  func.func @transform_4(%arg0: i32, %arg1: i32, %arg2: i32) -> (i32, i32) {
    %c0_i32 = arith.constant 0 : i32
    %c0_i32_0 = arith.constant 0 : i32
    return %c0_i32, %arg1 : i32, i32
  }
  func.func @transform_5(%arg0: i32, %arg1: i32, %arg2: i32) -> (i32, i32) {
    %c0_i32 = arith.constant 0 : i32
    return %arg0, %arg1 : i32, i32
  }
}

</mosaic_0001>

<bundles_post_ra>
// kernel: quant_model_forward.7
= control target key start
LH: loop header
LB: loop body
LE: loop exit
PB: predicated region body
PF: predicated region fallthrough
CT: control target
= control target key end

     0   :  { %10 = vsyncpa [#allocation3], 0  ;;  %s247_s21 = smov [#allocation2]   ;;  %s323_s0 = inlined_call_operand.vmem [shape: f32[4], index: 0, kind: input, shape index: {}]   ;;  %s324_s1 = inlined_call_operand.vmem [shape: f32[16,128], index: 1, kind: input, shape index: {}]   ;;  %s325_s2 = inlined_call_operand.vmem [shape: bf16[128,128], index: 2, kind: input, shape index: {}]   ;;  %s326_s3 = inlined_call_operand.vmem [shape: f32[1,128], index: 3, kind: input, shape index: {}]   ;;  %s327_s4 = inlined_call_operand.vmem [shape: f32[1,128], index: 4, kind: input, shape index: {}]   ;;  %s328_s5 = inlined_call_operand.vmem [shape: f32[16,128], index: 5, kind: output, shape index: {}]  }
   0x1   :  { %s16_s20 = sshll.u32 %s323_s0, 4  ;;  %s17_s20 = int_to_ptr.vmem [resolvable:$true] %s16_s20 }
   0x2   :  { %19 = dma.vmem_to_smem %s17_s20, 16, %s247_s21, [#allocation3]  }
   0x3   :  { %245 = dma.done.wait [#allocation3], 16  }
   0x4   :  { %246 = vsyncadd [#allocation3], 4294967280 }
   0x5   :  { %32 = sfence }
   0x6   :  { %v213_v0 = vld [vmem:[%s325_s2 + $0x38] sm:$0xff]  ;;  %s33_s24 = sld [smem:[#allocation2]]  ;;  %v212_v1 = vld [vmem:[%s325_s2 + $0x30] sm:$0xff]  ;;  %v36_v2 = vld [vmem:[%s324_s1] sm:$0xff] }
   0x7   :  { %118 = vmatpush.bf16.msra.mxu0 %v213_v0  ;;  %v37_v3 = vld [vmem:[%s324_s1 + $0x8] sm:$0xff]  ;;  %s172_s7 = sld [smem:[#allocation2 + $0x1]]  ;;  %v210_v9 = vld [vmem:[%s325_s2 + $0x20] sm:$0xff]  ;;  %v209_v18 = vld [vmem:[%s325_s2 + $0x18] sm:$0xff] }
   0x8   :  { %v211_v4 = vld [vmem:[%s325_s2 + $0x28] sm:$0xff]  ;;  %s173_s10 = sld [smem:[#allocation2 + $0x2]]  ;;  %v208_v24 = vld [vmem:[%s325_s2 + $0x10] sm:$0xff]  ;;  %v206_v36 = vld [vmem:[%s325_s2] sm:$0xff] }
   0x9   :  { %v207_v31 = vld [vmem:[%s325_s2 + $0x8] sm:$0xff]  ;;  %v231_v38 = vld [vmem:[%s326_s3] ss:$0 sm:$0xff] }
   0xa   :  { %v232_v39 = vld [vmem:[%s327_s4] ss:$0 sm:$0xff] }
   0xb   :  { %119 = vmatpush.bf16.msra.mxu0 %v212_v1 }
   0xc   :  { %v38_v5 = vstv %s33_s24 }
   0xd   :  { %v39_v6 = vmul.f32 %v38_v5, %v36_v2  ;;  %v40_v7 = vmul.f32 %v38_v5, %v37_v3  ;;  %v43_v21 = vstv %s172_s7 }
   0xe   :  { %v48_v28 = vstv %s173_s10 }
   0xf   :  { %v216_v8 = vcvt.f32.s32 %v39_v6  ;;  %120 = vmatpush.bf16.msra.mxu0 %v211_v4  ;;  %v214_v10 = vand.u32 2147483647, %v39_v6  ;;  %v224_v11 = vcvt.f32.s32 %v40_v7  ;;  %v219_v13 = vand.u32 2147483648, %v39_v6 }
  0x10   :  { %v222_v14 = vand.u32 2147483647, %v40_v7  ;;  %v227_v16 = vand.u32 2147483648, %v40_v7 }
  0x11   :  { %v217_v12 = vcvt.s32.f32 %v216_v8  ;;  %v225_v15 = vcvt.s32.f32 %v224_v11  ;;  %vm215_vm0 = vcmp.lt.f32.partialorder %v214_v10, 8388608.0 }
  0x12   :  { %vm223_vm1 = vcmp.lt.f32.partialorder %v222_v14, 8388608.0 }
  0x13   :  { %v218_v17 = vand.u32 2147483647, %v217_v12  ;;  %121 = vmatpush.bf16.msra.mxu0 %v210_v9  ;;  %v226_v19 = vand.u32 2147483647, %v225_v15 }
  0x15   :  { %v220_v20 = vor.u32 %v219_v13, %v218_v17  ;;  %v228_v22 = vor.u32 %v227_v16, %v226_v19 }
  0x17   :  { %v221_v23 = vsel %vm215_vm0, %v220_v20, %v39_v6  ;;  %122 = vmatpush.bf16.msra.mxu0 %v209_v18  ;;  %v229_v25 = vsel %vm223_vm1, %v228_v22, %v40_v7 }
  0x18   :  { %v44_v26 = vadd.f32 %v221_v23, %v43_v21  ;;  %v45_v27 = vadd.f32 %v229_v25, %v43_v21 }
  0x1a   :  { %v46_v29 = vmax.f32 %v44_v26, 0.0  ;;  %v47_v30 = vmax.f32 %v45_v27, 0.0 }
  0x1b   :  { %123 = vmatpush.bf16.msra.mxu0 %v208_v24 }
  0x1c   :  { %v49_v32 = vmin.f32 %v48_v28, %v46_v29  ;;  %v50_v33 = vmin.f32 %v48_v28, %v47_v30 }
  0x1e   :  { %v51_v34 = vsub.f32 %v49_v32, %v43_v21  ;;  %v52_v35 = vsub.f32 %v50_v33, %v43_v21 }
  0x1f   :  { %124 = vmatpush.bf16.msra.mxu0 %v207_v31 }
  0x20   :  { %v53_v37 = vpack.c.bf16 %v52_v35, %v51_v34 }
  0x23   :  { %125 = vmatpush.bf16.msra.mxu0 %v206_v36 }
  0x26   :  { %126 = vmatmul.bf16.vlgmr.msra.gmra.mxu0 %v53_v37 }
  0xa3   :  { %v127_v40 = vpop.f32.mrf.mxu0 }
  0xa4   :  { %v157_v41 = vmul.f32 %v231_v38, %v127_v40 }
  0xa6   :  { %v163_v42 = vadd.f32 %v232_v39, %v157_v41 }
  0xa8   :  { %165 = vst [vmem:[%s328_s5] sm:$0xff] %v163_v42 }
  0xab   :  { %v129_v43 = vpop.f32.mrf.mxu0 }
  0xac   :  { %v158_v44 = vmul.f32 %v231_v38, %v129_v43 }
  0xae   :  { %v164_v45 = vadd.f32 %v232_v39, %v158_v44 }
  0xb0   :  { %166 = vst [vmem:[%s328_s5 + $0x8] sm:$0xff] %v164_v45 }
  0xb1   :  { %171 = vsyncpa [#allocation3], 1 }

// kernel: quant_model_forward.8
= control target key start
LH: loop header
LB: loop body
LE: loop exit
PB: predicated region body
PF: predicated region fallthrough
CT: control target
= control target key end

     0   :  { %10 = vsyncpa [#allocation3], 0  ;;  %s2401_s18 = smov 0   ;;  %s2403_s19 = smov 0   ;;  %s3521_s0 = inlined_call_operand.vmem [shape: f32[4], index: 0, kind: input, shape index: {}]   ;;  %s3522_s1 = inlined_call_operand.vmem [shape: f32[512,128], index: 1, kind: input, shape index: {}]   ;;  %s3523_s2 = inlined_call_operand.vmem [shape: bf16[128,128], index: 2, kind: input, shape index: {}]   ;;  %s3524_s3 = inlined_call_operand.vmem [shape: f32[1,128], index: 3, kind: input, shape index: {}]   ;;  %s3525_s4 = inlined_call_operand.vmem [shape: f32[1,128], index: 4, kind: input, shape index: {}]   ;;  %s3526_s5 = inlined_call_operand.vmem [shape: f32[512,128], index: 5, kind: output, shape index: {}]  }
   0x1   :  { %s2405_s20 = smov 0  }
   0x2 LB: > { %s1790_s21 = sadd.s32 4294967295, %s2368_s20   ;;  %s35_s22 = sadd.s32 1, %s2364_s19  ;;  %s2368_s20 = sphi %s2405_s20, %s16_s20   ;;  %s2364_s19 = sphi %s2403_s19, %s3632_s19   ;;  %s2360_s18 = sphi %s2401_s18, %s3631_s18  }
   0x3   : > { %p37_p0 = scmp.ge.s32.totalorder %s35_s22, 2  ;;  %p1792_p1 = scmp.ge.s32.totalorder %s2368_s20, 1 }
   0x4   : > { %p197_p2 = scmp.lt.s32.totalorder %s2368_s20, 3  ;;  %p2168_p4 = scmp.eq.s32.totalorder %s1790_s21, 0 }
   0x5   : > { %s3634_s22 = smov (%p37_p0, %s35_s22), 0  ;;  %s209_s25 = sshll.u32 %s3521_s0, 4  ;;  %s210_s25 = int_to_ptr.vmem [resolvable:$true] %s209_s25 }
   0x6   : > { %p198_p3 = pnand %p1792_p1, %p197_p2  ;;  %s2370_s26 = smov [#allocation2]  }
   0x8   : > { %p2164_p5 = pneg %p198_p3  ;;  %258 = sbr.rel (%p198_p3) target bundleno = 353 (0x161), region = 40 }
   0xa   : > { %p2165_p6 = pnand %p2168_p4, %p2164_p5 }
   0xc   : > { %2167 = dma.vmem_to_smem (!%p2165_p6), %s210_s25, 16, %s2370_s26, [#allocation3]  }
   0xd   : > { %2355 = dma.done.wait (%p2168_p4), [#allocation3], 16  }
   0xe   : > { %2357 = vsyncadd (%p2168_p4), [#allocation3], 4294967280 }
   0xf   : > { %265 = sfence }
  0x10   : > { %v1879_v0 = vld [vmem:[%s3523_s2 + $0x38] sm:$0xff]  ;;  %s1800_s29 = sshll.u32 %s2360_s18, 5  ;;  %s341_s30 = sld [smem:[#allocation2]]  ;;  %v1878_v1 = vld [vmem:[%s3523_s2 + $0x30] sm:$0xff]  ;;  %v1877_v2 = vld [vmem:[%s3523_s2 + $0x28] sm:$0xff] }
  0x11   : > { %p309_p7 = scmp.lt.s32.totalorder %s1800_s29, 63  ;;  %s1804_s6 = sld [smem:[#allocation2 + $0x1]]  ;;  %651 = vmatpush.bf16.msra.mxu0 %v1879_v0  ;;  %1880 = vmatpush.bf16.msra.mxu1 %v1879_v0  ;;  %v1876_v18 = vld [vmem:[%s3523_s2 + $0x20] sm:$0xff]  ;;  %v1875_v35 = vld [vmem:[%s3523_s2 + $0x18] sm:$0xff]  ;;  %v1874_v52 = vld [vmem:[%s3523_s2 + $0x10] sm:$0xff] }
  0x12   : > { %s1805_s9 = sld [smem:[#allocation2 + $0x2]]  ;;  %1881 = vmatpush.bf16.msra.mxu2 %v1879_v0  ;;  %1882 = vmatpush.bf16.msra.mxu3 %v1879_v0 }
  0x13   : > { %s3636_s29 = smov (!%p309_p7, %s1800_s29), 63 }
  0x14   : > { %s1801_s10 = sshll.u32 %s3636_s29, 3 }
  0x15   : > { %652 = vmatpush.bf16.msra.mxu0 %v1878_v1  ;;  %1883 = vmatpush.bf16.msra.mxu1 %v1878_v1  ;;  %s2443_s15 = scalar_lea.vmem %s3522_s1, %s1801_s10  ;;  %s2911_s12 = scalar_lea.vmem %s3526_s5, %s1801_s10 }
  0x16   : > { %v2445_v3 = vstv %s341_s30  ;;  %1884 = vmatpush.bf16.msra.mxu2 %v1878_v1  ;;  %1885 = vmatpush.bf16.msra.mxu3 %v1878_v1  ;;  %v344_v4 = vld [vmem:[%s2443_s15] sm:$0xff]  ;;  %v345_v5 = vld [vmem:[%s2443_s15 + $0x8] sm:$0xff] }
  0x17   : > { %v352_v6 = vld [vmem:[%s2443_s15 + $0x40] sm:$0xff]  ;;  %v2451_v7 = vmul.f32 %v2445_v3, %v344_v4  ;;  %v2454_v8 = vmul.f32 %v2445_v3, %v345_v5  ;;  %v2456_v9 = vstv %s1804_s6  ;;  %v353_v10 = vld [vmem:[%s2443_s15 + $0x48] sm:$0xff] }
  0x18   : > { %v2460_v11 = vmul.f32 %v2445_v3, %v352_v6  ;;  %v360_v12 = vld [vmem:[%s2443_s15 + $0x80] sm:$0xff]  ;;  %v361_v13 = vld [vmem:[%s2443_s15 + $0x88] sm:$0xff]  ;;  %v2464_v14 = vstv %s1805_s9  ;;  %v2467_v15 = vmul.f32 %v2445_v3, %v353_v10 }
  0x19   : > { %v2470_v16 = vmul.f32 %v2445_v3, %v360_v12  ;;  %v2473_v17 = vmul.f32 %v2445_v3, %v361_v13  ;;  %653 = vmatpush.bf16.msra.mxu0 %v1877_v2  ;;  %1886 = vmatpush.bf16.msra.mxu1 %v1877_v2  ;;  %v1904_v19 = vand.u32 2147483647, %v2451_v7  ;;  %v1906_v20 = vcvt.f32.s32 %v2451_v7  ;;  %v368_v57 = vld [vmem:[%s2443_s15 + $0xc0] sm:$0xff]  ;;  %v369_v62 = vld [vmem:[%s2443_s15 + $0xc8] sm:$0xff] }
  0x1a   : > { %v1909_v21 = vand.u32 2147483648, %v2451_v7  ;;  %v1912_v22 = vand.u32 2147483647, %v2454_v8  ;;  %1887 = vmatpush.bf16.msra.mxu2 %v1877_v2  ;;  %1888 = vmatpush.bf16.msra.mxu3 %v1877_v2  ;;  %v1914_v23 = vcvt.f32.s32 %v2454_v8  ;;  %v1917_v24 = vand.u32 2147483648, %v2454_v8  ;;  %v355_v2 = vld [vmem:[%s2443_s15 + $0x58] sm:$0xff] }
  0x1b   : > { %v1968_v25 = vand.u32 2147483647, %v2460_v11  ;;  %v1970_v26 = vcvt.f32.s32 %v2460_v11  ;;  %vm2486_vm0 = vcmp.lt.f32.partialorder %v1904_v19, 8388608.0  ;;  %v1907_v28 = vcvt.s32.f32 %v1906_v20 }
  0x1c   : > { %vm2490_vm1 = vcmp.lt.f32.partialorder %v1912_v22, 8388608.0  ;;  %v1973_v30 = vand.u32 2147483648, %v2460_v11  ;;  %v1915_v31 = vcvt.s32.f32 %v1914_v23  ;;  %v1976_v34 = vand.u32 2147483647, %v2467_v15 }
  0x1d   : > { %vm2495_vm2 = vcmp.lt.f32.partialorder %v1968_v25, 8388608.0  ;;  %v1971_v33 = vcvt.s32.f32 %v1970_v26  ;;  %654 = vmatpush.bf16.msra.mxu0 %v1876_v18  ;;  %1889 = vmatpush.bf16.msra.mxu1 %v1876_v18  ;;  %v1908_v36 = vand.u32 2147483647, %v1907_v28  ;;  %v1978_v37 = vcvt.f32.s32 %v2467_v15 }
  0x1e   : > { %v1981_v38 = vand.u32 2147483648, %v2467_v15  ;;  %v2032_v39 = vand.u32 2147483647, %v2470_v16  ;;  %1890 = vmatpush.bf16.msra.mxu2 %v1876_v18  ;;  %1891 = vmatpush.bf16.msra.mxu3 %v1876_v18  ;;  %v1916_v40 = vand.u32 2147483647, %v1915_v31  ;;  %vm2506_vm3 = vcmp.lt.f32.partialorder %v1976_v34, 8388608.0 }
  0x1f   : > { %v1972_v41 = vand.u32 2147483647, %v1971_v33  ;;  %v2034_v43 = vcvt.f32.s32 %v2470_v16  ;;  %v1910_v44 = vor.u32 %v1909_v21, %v1908_v36  ;;  %v1979_v45 = vcvt.s32.f32 %v1978_v37  ;;  %v346_v36 = vld [vmem:[%s2443_s15 + $0x10] sm:$0xff] }
  0x20   : > { %vm2511_vm4 = vcmp.lt.f32.partialorder %v2032_v39, 8388608.0  ;;  %v2037_v47 = vand.u32 2147483648, %v2470_v16  ;;  %v1918_v48 = vor.u32 %v1917_v24, %v1916_v40  ;;  %v2040_v51 = vand.u32 2147483647, %v2473_v17 }
  0x21   : > { %v1974_v49 = vor.u32 %v1973_v30, %v1972_v41  ;;  %v2035_v50 = vcvt.s32.f32 %v2034_v43  ;;  %655 = vmatpush.bf16.msra.mxu0 %v1875_v35  ;;  %1892 = vmatpush.bf16.msra.mxu1 %v1875_v35  ;;  %v1911_v53 = vsel %vm2486_vm0, %v1910_v44, %v2451_v7  ;;  %v1980_v54 = vand.u32 2147483647, %v1979_v45  ;;  %v347_v41 = vld [vmem:[%s2443_s15 + $0x18] sm:$0xff] }
  0x22   : > { %v2042_v55 = vcvt.f32.s32 %v2473_v17  ;;  %v2045_v56 = vand.u32 2147483648, %v2473_v17  ;;  %1893 = vmatpush.bf16.msra.mxu2 %v1875_v35  ;;  %1894 = vmatpush.bf16.msra.mxu3 %v1875_v35  ;;  %v1919_v58 = vsel %vm2490_vm1, %v1918_v48, %v2454_v8  ;;  %v442_v59 = vadd.f32 %v1911_v53, %v2456_v9  ;;  %v1873_v8 = vld [vmem:[%s3523_s2 + $0x8] sm:$0xff] }
  0x23   : > { %v1975_v60 = vsel %vm2495_vm2, %v1974_v49, %v2460_v11  ;;  %v2036_v61 = vand.u32 2147483647, %v2035_v50  ;;  %v443_v63 = vadd.f32 %v1919_v58, %v2456_v9  ;;  %v1982_v0 = vor.u32 %v1981_v38, %v1980_v54 }
  0x24   : > { %v450_v1 = vadd.f32 %v1975_v60, %v2456_v9  ;;  %vm2536_vm5 = vcmp.lt.f32.partialorder %v2040_v51, 8388608.0  ;;  %v474_v4 = vmax.f32 %v442_v59, 0.0  ;;  %v2043_v6 = vcvt.s32.f32 %v2042_v55 }
  0x25   : > { %v2038_v5 = vor.u32 %v2037_v47, %v2036_v61  ;;  %v2541_v7 = vmul.f32 %v2445_v3, %v368_v57  ;;  %656 = vmatpush.bf16.msra.mxu0 %v1874_v52  ;;  %1895 = vmatpush.bf16.msra.mxu1 %v1874_v52  ;;  %v475_v10 = vmax.f32 %v443_v63, 0.0  ;;  %v1983_v11 = vsel %vm2506_vm3, %v1982_v0, %v2467_v15  ;;  %v354_v61 = vld [vmem:[%s2443_s15 + $0x50] sm:$0xff] }
  0x26   : > { %v482_v12 = vmax.f32 %v450_v1, 0.0  ;;  %v2550_v13 = vmul.f32 %v2445_v3, %v369_v62  ;;  %1896 = vmatpush.bf16.msra.mxu2 %v1874_v52  ;;  %1897 = vmatpush.bf16.msra.mxu3 %v1874_v52  ;;  %v507_v18 = vmin.f32 %v2464_v14, %v474_v4  ;;  %v451_v19 = vadd.f32 %v1983_v11, %v2456_v9 }
  0x27   : > { %v2039_v20 = vsel %vm2511_vm4, %v2038_v5, %v2470_v16  ;;  %v2044_v21 = vand.u32 2147483647, %v2043_v6  ;;  %v508_v22 = vmin.f32 %v2464_v14, %v475_v10  ;;  %v2096_v24 = vand.u32 2147483647, %v2541_v7  ;;  %v1872_v16 = vld [vmem:[%s3523_s2] sm:$0xff] }
  0x28   : > { %v515_v23 = vmin.f32 %v2464_v14, %v482_v12  ;;  %v458_v15 = vadd.f32 %v2039_v20, %v2456_v9  ;;  %v539_v25 = vsub.f32 %v507_v18, %v2456_v9  ;;  %v483_v26 = vmax.f32 %v451_v19, 0.0  ;;  %v362_v18 = vld [vmem:[%s2443_s15 + $0x90] sm:$0xff] }
  0x29   : > { %v2046_v27 = vor.u32 %v2045_v56, %v2044_v21  ;;  %v2098_v28 = vcvt.f32.s32 %v2541_v7  ;;  %657 = vmatpush.bf16.msra.mxu0 %v1873_v8  ;;  %1898 = vmatpush.bf16.msra.mxu1 %v1873_v8  ;;  %v540_v29 = vsub.f32 %v508_v22, %v2456_v9  ;;  %v2101_v35 = vand.u32 2147483648, %v2541_v7 }
  0x2a   : > { %v547_v30 = vsub.f32 %v515_v23, %v2456_v9  ;;  %v490_v31 = vmax.f32 %v458_v15, 0.0  ;;  %1899 = vmatpush.bf16.msra.mxu2 %v1873_v8  ;;  %1900 = vmatpush.bf16.msra.mxu3 %v1873_v8  ;;  %v516_v32 = vmin.f32 %v2464_v14, %v483_v26  ;;  %vm2576_vm6 = vcmp.lt.f32.partialorder %v2096_v24, 8388608.0 }
  0x2b   : > { %v2047_v33 = vsel %vm2536_vm5, %v2046_v27, %v2473_v17  ;;  %v2099_v34 = vcvt.s32.f32 %v2098_v28  ;;  %v2104_v40 = vand.u32 2147483647, %v2550_v13  ;;  %v571_v42 = vpack.c.bf16 %v540_v29, %v539_v25 }
  0x2c   : > { %v459_v37 = vadd.f32 %v2047_v33, %v2456_v9  ;;  %v523_v38 = vmin.f32 %v2464_v14, %v490_v31  ;;  %v548_v43 = vsub.f32 %v516_v32, %v2456_v9  ;;  %v2106_v17 = vcvt.f32.s32 %v2550_v13  ;;  %v363_v32 = vld [vmem:[%s2443_s15 + $0x98] sm:$0xff] }
  0x2d   : > { %v2100_v44 = vand.u32 2147483647, %v2099_v34  ;;  %658 = vmatpush.bf16.msra.mxu0 %v1872_v16  ;;  %1901 = vmatpush.bf16.msra.mxu1 %v1872_v16  ;;  %v2109_v47 = vand.u32 2147483648, %v2550_v13  ;;  %v379_v48 = vmul.f32 %v2445_v3, %v346_v36  ;;  %v380_v52 = vmul.f32 %v2445_v3, %v347_v41 }
  0x2e   : > { %v491_v45 = vmax.f32 %v459_v37, 0.0  ;;  %v555_v46 = vsub.f32 %v523_v38, %v2456_v9  ;;  %1902 = vmatpush.bf16.msra.mxu2 %v1872_v16  ;;  %1903 = vmatpush.bf16.msra.mxu3 %v1872_v16  ;;  %v575_v49 = vpack.c.bf16 %v548_v43, %v547_v30  ;;  %v2107_v51 = vcvt.s32.f32 %v2106_v17 }
  0x2f   : > { %v2102_v50 = vor.u32 %v2101_v35, %v2100_v44  ;;  %vm2589_vm7 = vcmp.lt.f32.partialorder %v2104_v40, 8388608.0  ;;  %v1920_v55 = vand.u32 2147483647, %v379_v48  ;;  %v1922_v56 = vcvt.f32.s32 %v379_v48  ;;  %v349_v35 = vld [vmem:[%s2443_s15 + $0x28] sm:$0xff] }
  0x30   : > { %v524_v53 = vmin.f32 %v2464_v14, %v491_v45  ;;  %659 = vmatmul.bf16.vlgmr.msra.gmra.mxu0 %v571_v42  ;;  %679 = vmatmul.bf16.vlgmr.msra.gmra.mxu1 %v575_v49  ;;  %v2108_v58 = vand.u32 2147483647, %v2107_v51  ;;  %v1928_v59 = vand.u32 2147483647, %v380_v52  ;;  %v1930_v60 = vcvt.f32.s32 %v380_v52 }
  0x31   : > { %v2103_v57 = vsel %vm2576_vm6, %v2102_v50, %v2541_v7  ;;  %v1923_v0 = vcvt.s32.f32 %v1922_v56  ;;  %v1925_v1 = vand.u32 2147483648, %v379_v48  ;;  %vm2600_vm8 = vcmp.lt.f32.partialorder %v1920_v55, 8388608.0  ;;  %v370_v56 = vld [vmem:[%s2443_s15 + $0xd0] sm:$0xff] }
  0x32   : > { %v556_v62 = vsub.f32 %v524_v53, %v2456_v9  ;;  %v466_v63 = vadd.f32 %v2103_v57, %v2456_v9  ;;  %v2110_v4 = vor.u32 %v2109_v47, %v2108_v58  ;;  %v1931_v6 = vcvt.s32.f32 %v1930_v60 }
  0x33   : > { %v1933_v8 = vand.u32 2147483648, %v380_v52  ;;  %v1924_v11 = vand.u32 2147483647, %v1923_v0  ;;  %v387_v12 = vmul.f32 %v2445_v3, %v354_v61  ;;  %vm2609_vm9 = vcmp.lt.f32.partialorder %v1928_v59, 8388608.0 }
  0x34   : > { %v579_v7 = vpack.c.bf16 %v556_v62, %v555_v46  ;;  %v498_v10 = vmax.f32 %v466_v63, 0.0  ;;  %v2111_v19 = vsel %vm2589_vm7, %v2110_v4, %v2550_v13  ;;  %v1932_v21 = vand.u32 2147483647, %v1931_v6 }
  0x35   : > { %v388_v22 = vmul.f32 %v2445_v3, %v355_v2  ;;  %v467_v23 = vadd.f32 %v2111_v19, %v2456_v9  ;;  %v1926_v24 = vor.u32 %v1925_v1, %v1924_v11  ;;  %v1984_v25 = vand.u32 2147483647, %v387_v12  ;;  %v371_v1 = vld [vmem:[%s2443_s15 + $0xd8] sm:$0xff] }
  0x36   : > { %699 = vmatmul.bf16.vlgmr.msra.gmra.mxu2 %v579_v7  ;;  %v531_v15 = vmin.f32 %v2464_v14, %v498_v10  ;;  %v1934_v26 = vor.u32 %v1933_v8, %v1932_v21  ;;  %v1986_v27 = vcvt.f32.s32 %v387_v12  ;;  %v395_v13 = vmul.f32 %v2445_v3, %v362_v18 }
  0x37   : > { %v1992_v28 = vand.u32 2147483647, %v388_v22  ;;  %v499_v16 = vmax.f32 %v467_v23, 0.0  ;;  %v1927_v30 = vsel %vm2600_vm8, %v1926_v24, %v379_v48  ;;  %v1989_v31 = vand.u32 2147483648, %v387_v12 }
  0x38   : > { %v563_v29 = vsub.f32 %v531_v15, %v2456_v9  ;;  %v1935_v33 = vsel %vm2609_vm9, %v1934_v26, %v380_v52  ;;  %v444_v34 = vadd.f32 %v1927_v30, %v2456_v9  ;;  %vm2624_vm10 = vcmp.lt.f32.partialorder %v1984_v25, 8388608.0 }
  0x39   : > { %v1987_v36 = vcvt.s32.f32 %v1986_v27  ;;  %v532_v37 = vmin.f32 %v2464_v14, %v499_v16  ;;  %v445_v38 = vadd.f32 %v1935_v33, %v2456_v9  ;;  %vm2630_vm11 = vcmp.lt.f32.partialorder %v1992_v28, 8388608.0  ;;  %v365_v28 = vld [vmem:[%s2443_s15 + $0xa8] sm:$0xff] }
  0x3a   : > { %v1994_v40 = vcvt.f32.s32 %v388_v22  ;;  %v476_v41 = vmax.f32 %v444_v34, 0.0  ;;  %v1997_v43 = vand.u32 2147483648, %v388_v22  ;;  %v396_v44 = vmul.f32 %v2445_v3, %v363_v32 }
  0x3b   : > { %v1988_v42 = vand.u32 2147483647, %v1987_v36  ;;  %v564_v17 = vsub.f32 %v532_v37, %v2456_v9  ;;  %v477_v45 = vmax.f32 %v445_v38, 0.0  ;;  %v2050_v47 = vcvt.f32.s32 %v395_v13 }
  0x3c   : > { %v1995_v46 = vcvt.s32.f32 %v1994_v40  ;;  %v509_v48 = vmin.f32 %v2464_v14, %v476_v41  ;;  %v2048_v50 = vand.u32 2147483647, %v395_v13  ;;  %v2053_v51 = vand.u32 2147483648, %v395_v13  ;;  %v356_v40 = vld [vmem:[%s2443_s15 + $0x60] sm:$0xff] }
  0x3d   : > { %v1990_v49 = vor.u32 %v1989_v31, %v1988_v42  ;;  %v583_v52 = vpack.c.bf16 %v564_v17, %v563_v29  ;;  %v510_v53 = vmin.f32 %v2464_v14, %v477_v45  ;;  %v2051_v55 = vcvt.s32.f32 %v2050_v47 }
  0x3e   : > { %v1996_v54 = vand.u32 2147483647, %v1995_v46  ;;  %v541_v57 = vsub.f32 %v509_v48, %v2456_v9  ;;  %v2056_v59 = vand.u32 2147483647, %v396_v44  ;;  %v2058_v60 = vcvt.f32.s32 %v396_v44 }
  0x3f   : > { %v1991_v58 = vsel %vm2624_vm10, %v1990_v49, %v387_v12  ;;  %719 = vmatmul.bf16.vlgmr.msra.gmra.mxu3 %v583_v52  ;;  %v542_v61 = vsub.f32 %v510_v53, %v2456_v9  ;;  %v2052_v0 = vand.u32 2147483647, %v2051_v55  ;;  %vm2645_vm12 = vcmp.lt.f32.partialorder %v2048_v50, 8388608.0 }
  0x40   : > { %v1998_v62 = vor.u32 %v1997_v43, %v1996_v54  ;;  %v452_v63 = vadd.f32 %v1991_v58, %v2456_v9  ;;  %v2059_v4 = vcvt.s32.f32 %v2058_v60  ;;  %v2061_v5 = vand.u32 2147483648, %v396_v44  ;;  %v357_v60 = vld [vmem:[%s2443_s15 + $0x68] sm:$0xff] }
  0x41   : > { %v403_v6 = vmul.f32 %v2445_v3, %v370_v56  ;;  %v572_v8 = vpack.c.bf16 %v542_v61, %v541_v57  ;;  %v2054_v11 = vor.u32 %v2053_v51, %v2052_v0  ;;  %v404_v19 = vmul.f32 %v2445_v3, %v371_v1 }
  0x42   : > { %v1999_v7 = vsel %vm2630_vm11, %v1998_v62, %v388_v22  ;;  %v484_v10 = vmax.f32 %v452_v63, 0.0  ;;  %v2060_v18 = vand.u32 2147483647, %v2059_v4  ;;  %vm2657_vm13 = vcmp.lt.f32.partialorder %v2056_v59, 8388608.0 }
  0x43   : > { %v453_v12 = vadd.f32 %v1999_v7, %v2456_v9  ;;  %v2112_v20 = vand.u32 2147483647, %v403_v6  ;;  %664 = vmatmul.bf16.gmra.mxu0 %v572_v8  ;;  %v2055_v23 = vsel %vm2645_vm12, %v2054_v11, %v395_v13  ;;  %v2114_v22 = vcvt.f32.s32 %v403_v6  ;;  %v348_v13 = vld [vmem:[%s2443_s15 + $0x20] sm:$0xff] }
  0x44   : > { %v517_v21 = vmin.f32 %v2464_v14, %v484_v10  ;;  %v2062_v25 = vor.u32 %v2061_v5, %v2060_v18  ;;  %v460_v26 = vadd.f32 %v2055_v23, %v2456_v9  ;;  %v2117_v27 = vand.u32 2147483648, %v403_v6 }
  0x45   : > { %v485_v24 = vmax.f32 %v453_v12, 0.0  ;;  %vm2662_vm14 = vcmp.lt.f32.partialorder %v2112_v20, 8388608.0  ;;  %v2115_v16 = vcvt.s32.f32 %v2114_v22  ;;  %v2120_v29 = vand.u32 2147483647, %v404_v19  ;;  %v364_v22 = vld [vmem:[%s2443_s15 + $0xa0] sm:$0xff] }
  0x46   : > { %v2122_v30 = vcvt.f32.s32 %v404_v19  ;;  %v549_v32 = vsub.f32 %v517_v21, %v2456_v9  ;;  %v2063_v33 = vsel %vm2657_vm13, %v2062_v25, %v396_v44  ;;  %v492_v34 = vmax.f32 %v460_v26, 0.0 }
  0x47   : > { %v518_v31 = vmin.f32 %v2464_v14, %v485_v24  ;;  %v461_v36 = vadd.f32 %v2063_v33, %v2456_v9  ;;  %v2116_v37 = vand.u32 2147483647, %v2115_v16  ;;  %v2125_v39 = vand.u32 2147483648, %v404_v19 }
  0x48   : > { %v2123_v38 = vcvt.s32.f32 %v2122_v30  ;;  %v525_v42 = vmin.f32 %v2464_v14, %v492_v34  ;;  %vm2676_vm15 = vcmp.lt.f32.partialorder %v2120_v29, 8388608.0  ;;  %v381_v17 = vmul.f32 %v2445_v3, %v348_v13 }
  0x49   : > { %v550_v41 = vsub.f32 %v518_v31, %v2456_v9  ;;  %v493_v45 = vmax.f32 %v461_v36, 0.0  ;;  %v2118_v44 = vor.u32 %v2117_v27, %v2116_v37  ;;  %v382_v47 = vmul.f32 %v2445_v3, %v349_v35 }
  0x4a   : > { %v2124_v46 = vand.u32 2147483647, %v2123_v38  ;;  %v1936_v49 = vand.u32 2147483647, %v381_v17  ;;  %v1938_v50 = vcvt.f32.s32 %v381_v17  ;;  %v2683_v51 = vmul.f32 %v2445_v3, %v356_v40 }
  0x4b   : > { %v576_v48 = vpack.c.bf16 %v550_v41, %v549_v32  ;;  %v526_v52 = vmin.f32 %v2464_v14, %v493_v45  ;;  %v557_v53 = vsub.f32 %v525_v42, %v2456_v9  ;;  %v2119_v54 = vsel %vm2662_vm14, %v2118_v44, %v403_v6 }
  0x4c   : > { %v2126_v55 = vor.u32 %v2125_v39, %v2124_v46  ;;  %v468_v56 = vadd.f32 %v2119_v54, %v2456_v9  ;;  %vm2690_vm0 = vcmp.lt.f32.partialorder %v1936_v49, 8388608.0  ;;  %v1939_v58 = vcvt.s32.f32 %v1938_v50  ;;  %v372_v50 = vld [vmem:[%s2443_s15 + $0xe0] sm:$0xff] }
  0x4d   : > { %684 = vmatmul.bf16.gmra.mxu1 %v576_v48  ;;  %v1941_v59 = vand.u32 2147483648, %v381_v17  ;;  %v558_v61 = vsub.f32 %v526_v52, %v2456_v9  ;;  %v1944_v63 = vand.u32 2147483647, %v382_v47  ;;  %v1946_v0 = vcvt.f32.s32 %v382_v47 }
  0x4e   : > { %v2127_v62 = vsel %vm2676_vm15, %v2126_v55, %v404_v19  ;;  %v500_v2 = vmax.f32 %v468_v56, 0.0  ;;  %v1940_v4 = vand.u32 2147483647, %v1939_v58  ;;  %v1949_v5 = vand.u32 2147483648, %v382_v47  ;;  %v373_v56 = vld [vmem:[%s2443_s15 + $0xe8] sm:$0xff] }
  0x4f   : > { %v469_v1 = vadd.f32 %v2127_v62, %v2456_v9  ;;  %v580_v6 = vpack.c.bf16 %v558_v61, %v557_v53  ;;  %v1947_v8 = vcvt.s32.f32 %v1946_v0  ;;  %v390_v7 = vmul.f32 %v2445_v3, %v357_v60 }
  0x50   : > { %v2000_v10 = vand.u32 2147483647, %v2683_v51  ;;  %v533_v12 = vmin.f32 %v2464_v14, %v500_v2  ;;  %v1942_v18 = vor.u32 %v1941_v59, %v1940_v4  ;;  %v2002_v19 = vcvt.f32.s32 %v2683_v51 }
  0x51   : > { %v501_v11 = vmax.f32 %v469_v1, 0.0  ;;  %704 = vmatmul.bf16.gmra.mxu2 %v580_v6  ;;  %vm2703_vm1 = vcmp.lt.f32.partialorder %v1944_v63, 8388608.0  ;;  %v1948_v21 = vand.u32 2147483647, %v1947_v8  ;;  %v2005_v15 = vand.u32 2147483648, %v2683_v51 }
  0x52   : > { %vm2707_vm2 = vcmp.lt.f32.partialorder %v2000_v10, 8388608.0  ;;  %v565_v25 = vsub.f32 %v533_v12, %v2456_v9  ;;  %v1943_v26 = vsel %vm2690_vm0, %v1942_v18, %v381_v17  ;;  %v2003_v27 = vcvt.s32.f32 %v2002_v19  ;;  %v350_v19 = vld [vmem:[%s2443_s15 + $0x30] sm:$0xff] }
  0x53   : > { %v534_v24 = vmin.f32 %v2464_v14, %v501_v11  ;;  %v1950_v16 = vor.u32 %v1949_v5, %v1948_v21  ;;  %v446_v29 = vadd.f32 %v1943_v26, %v2456_v9  ;;  %v2008_v30 = vand.u32 2147483647, %v390_v7  ;;  %v367_v26 = vld [vmem:[%s2443_s15 + $0xb8] sm:$0xff] }
  0x54   : > { %v2010_v13 = vcvt.f32.s32 %v390_v7  ;;  %v2004_v32 = vand.u32 2147483647, %v2003_v27  ;;  %v2013_v33 = vand.u32 2147483648, %v390_v7  ;;  %v397_v34 = vmul.f32 %v2445_v3, %v364_v22  ;;  %v351_v27 = vld [vmem:[%s2443_s15 + $0x38] sm:$0xff] }
  0x55   : > { %v566_v31 = vsub.f32 %v534_v24, %v2456_v9  ;;  %v1951_v35 = vsel %vm2703_vm1, %v1950_v16, %v382_v47  ;;  %v478_v36 = vmax.f32 %v446_v29, 0.0  ;;  %v398_v38 = vmul.f32 %v2445_v3, %v365_v28 }
  0x56   : > { %v2011_v37 = vcvt.s32.f32 %v2010_v13  ;;  %v447_v40 = vadd.f32 %v1951_v35, %v2456_v9  ;;  %v2006_v41 = vor.u32 %v2005_v15, %v2004_v32  ;;  %v2064_v42 = vand.u32 2147483647, %v397_v34 }
  0x57   : > { %v584_v39 = vpack.c.bf16 %v566_v31, %v565_v25  ;;  %v511_v43 = vmin.f32 %v2464_v14, %v478_v36  ;;  %vm2726_vm3 = vcmp.lt.f32.partialorder %v2008_v30, 8388608.0  ;;  %v2066_v44 = vcvt.f32.s32 %v397_v34 }
  0x58   : > { %v2012_v45 = vand.u32 2147483647, %v2011_v37  ;;  %v479_v46 = vmax.f32 %v447_v40, 0.0  ;;  %v2007_v47 = vsel %vm2707_vm2, %v2006_v41, %v2683_v51  ;;  %vm2733_vm4 = vcmp.lt.f32.partialorder %v2064_v42, 8388608.0 }
  0x59   : > { %724 = vmatmul.bf16.gmra.mxu3 %v584_v39  ;;  %v2069_v49 = vand.u32 2147483648, %v397_v34  ;;  %v454_v53 = vadd.f32 %v2007_v47, %v2456_v9  ;;  %v2067_v54 = vcvt.s32.f32 %v2066_v44  ;;  %v2072_v55 = vand.u32 2147483647, %v398_v38  ;;  %v358_v44 = vld [vmem:[%s2443_s15 + $0x70] sm:$0xff] }
  0x5a   : > { %v2014_v52 = vor.u32 %v2013_v33, %v2012_v45  ;;  %v512_v57 = vmin.f32 %v2464_v14, %v479_v46  ;;  %v543_v58 = vsub.f32 %v511_v43, %v2456_v9  ;;  %v2074_v59 = vcvt.f32.s32 %v398_v38 }
  0x5b   : > { %v2077_v60 = vand.u32 2147483648, %v398_v38  ;;  %v486_v61 = vmax.f32 %v454_v53, 0.0  ;;  %v2068_v62 = vand.u32 2147483647, %v2067_v54  ;;  %v405_v63 = vmul.f32 %v2445_v3, %v372_v50 }
  0x5c   : > { %v2015_v51 = vsel %vm2726_vm3, %v2014_v52, %v390_v7  ;;  %v544_v0 = vsub.f32 %v512_v57, %v2456_v9  ;;  %v2075_v2 = vcvt.s32.f32 %v2074_v59  ;;  %v406_v4 = vmul.f32 %v2445_v3, %v373_v56 }
  0x5d   : > { %v455_v1 = vadd.f32 %v2015_v51, %v2456_v9  ;;  %v519_v5 = vmin.f32 %v2464_v14, %v486_v61  ;;  %v2070_v6 = vor.u32 %v2069_v49, %v2068_v62  ;;  %v2128_v8 = vand.u32 2147483647, %v405_v63 }
  0x5e   : > { %v2130_v10 = vcvt.f32.s32 %v405_v63  ;;  %v573_v11 = vpack.c.bf16 %v544_v0, %v543_v58  ;;  %vm2749_vm5 = vcmp.lt.f32.partialorder %v2072_v55, 8388608.0  ;;  %v2076_v18 = vand.u32 2147483647, %v2075_v2  ;;  %v359_v55 = vld [vmem:[%s2443_s15 + $0x78] sm:$0xff] }
  0x5f   : > { %v487_v7 = vmax.f32 %v455_v1, 0.0  ;;  %v551_v20 = vsub.f32 %v519_v5, %v2456_v9  ;;  %v2071_v21 = vsel %vm2733_vm4, %v2070_v6, %v397_v34  ;;  %v2133_v15 = vand.u32 2147483648, %v405_v63 }
  0x60   : > { %v2131_v23 = vcvt.s32.f32 %v2130_v10  ;;  %669 = vmatmul.bf16.gmra.mxu0 %v573_v11  ;;  %v2078_v24 = vor.u32 %v2077_v60, %v2076_v18  ;;  %v462_v25 = vadd.f32 %v2071_v21, %v2456_v9  ;;  %vm2759_vm6 = vcmp.lt.f32.partialorder %v2128_v8, 8388608.0  ;;  %v366_v18 = vld [vmem:[%s2443_s15 + $0xb0] sm:$0xff] }
  0x61   : > { %v520_v22 = vmin.f32 %v2464_v14, %v487_v7  ;;  %v2136_v16 = vand.u32 2147483647, %v406_v4  ;;  %v2138_v29 = vcvt.f32.s32 %v406_v4  ;;  %v383_v30 = vmul.f32 %v2445_v3, %v350_v19 }
  0x62   : > { %v2132_v28 = vand.u32 2147483647, %v2131_v23  ;;  %v2079_v31 = vsel %vm2749_vm5, %v2078_v24, %v398_v38  ;;  %v494_v32 = vmax.f32 %v462_v25, 0.0  ;;  %v2141_v33 = vand.u32 2147483648, %v406_v4 }
  0x63   : > { %v552_v13 = vsub.f32 %v520_v22, %v2456_v9  ;;  %v463_v34 = vadd.f32 %v2079_v31, %v2456_v9  ;;  %v2139_v36 = vcvt.s32.f32 %v2138_v29  ;;  %v384_v37 = vmul.f32 %v2445_v3, %v351_v27 }
  0x64   : > { %v2134_v35 = vor.u32 %v2133_v15, %v2132_v28  ;;  %v527_v40 = vmin.f32 %v2464_v14, %v494_v32  ;;  %v1952_v41 = vand.u32 2147483647, %v383_v30  ;;  %v1954_v42 = vcvt.f32.s32 %v383_v30 }
  0x65   : > { %v577_v39 = vpack.c.bf16 %v552_v13, %v551_v20  ;;  %v495_v43 = vmax.f32 %v463_v34, 0.0  ;;  %vm2773_vm7 = vcmp.lt.f32.partialorder %v2136_v16, 8388608.0  ;;  %v2140_v45 = vand.u32 2147483647, %v2139_v36 }
  0x66   : > { %v2135_v17 = vsel %vm2759_vm6, %v2134_v35, %v405_v63  ;;  %v559_v46 = vsub.f32 %v527_v40, %v2456_v9  ;;  %v1955_v48 = vcvt.s32.f32 %v1954_v42  ;;  %v1957_v49 = vand.u32 2147483648, %v383_v30  ;;  %v374_v42 = vld [vmem:[%s2443_s15 + $0xf0] sm:$0xff] }
  0x67   : > { %689 = vmatmul.bf16.gmra.mxu1 %v577_v39  ;;  %v470_v47 = vadd.f32 %v2135_v17, %v2456_v9  ;;  %v528_v50 = vmin.f32 %v2464_v14, %v495_v43  ;;  %v2142_v52 = vor.u32 %v2141_v33, %v2140_v45  ;;  %vm2781_vm8 = vcmp.lt.f32.partialorder %v1952_v41, 8388608.0 }
  0x68   : > { %v1962_v54 = vcvt.f32.s32 %v384_v37  ;;  %v1956_v57 = vand.u32 2147483647, %v1955_v48  ;;  %v1960_v58 = vand.u32 2147483647, %v384_v37  ;;  %v391_v59 = vmul.f32 %v2445_v3, %v358_v44 }
  0x69   : > { %v502_v56 = vmax.f32 %v470_v47, 0.0  ;;  %v560_v60 = vsub.f32 %v528_v50, %v2456_v9  ;;  %v2143_v51 = vsel %vm2773_vm7, %v2142_v52, %v406_v4  ;;  %v1965_v62 = vand.u32 2147483648, %v384_v37  ;;  %v375_v52 = vld [vmem:[%s2443_s15 + $0xf8] sm:$0xff] }
  0x6a   : > { %v1963_v61 = vcvt.s32.f32 %v1962_v54  ;;  %v471_v63 = vadd.f32 %v2143_v51, %v2456_v9  ;;  %v1958_v1 = vor.u32 %v1957_v49, %v1956_v57  ;;  %v392_v2 = vmul.f32 %v2445_v3, %v359_v55 }
  0x6b   : > { %v535_v0 = vmin.f32 %v2464_v14, %v502_v56  ;;  %v581_v5 = vpack.c.bf16 %v560_v60, %v559_v46  ;;  %v2016_v8 = vand.u32 2147483647, %v391_v59  ;;  %v2018_v10 = vcvt.f32.s32 %v391_v59 }
  0x6c   : > { %v1964_v6 = vand.u32 2147483647, %v1963_v61  ;;  %v503_v11 = vmax.f32 %v471_v63, 0.0  ;;  %v1959_v4 = vsel %vm2781_vm8, %v1958_v1, %v383_v30  ;;  %vm2796_vm9 = vcmp.lt.f32.partialorder %v1960_v58, 8388608.0 }
  0x6d   : > { %v567_v7 = vsub.f32 %v535_v0, %v2456_v9  ;;  %709 = vmatmul.bf16.gmra.mxu2 %v581_v5  ;;  %v448_v20 = vadd.f32 %v1959_v4, %v2456_v9  ;;  %v2019_v21 = vcvt.s32.f32 %v2018_v10  ;;  %v2021_v23 = vand.u32 2147483648, %v391_v59 }
  0x6e   : > { %v1966_v19 = vor.u32 %v1965_v62, %v1964_v6  ;;  %v536_v15 = vmin.f32 %v2464_v14, %v503_v11  ;;  %vm2803_vm10 = vcmp.lt.f32.partialorder %v2016_v8, 8388608.0  ;;  %v2024_v24 = vand.u32 2147483647, %v392_v2 }
  0x6f   : > { %v2026_v25 = vcvt.f32.s32 %v392_v2  ;;  %v480_v28 = vmax.f32 %v448_v20, 0.0  ;;  %v2020_v16 = vand.u32 2147483647, %v2019_v21  ;;  %v399_v29 = vmul.f32 %v2445_v3, %v366_v18 }
  0x70   : > { %v1967_v27 = vsel %vm2796_vm9, %v1966_v19, %v384_v37  ;;  %v568_v30 = vsub.f32 %v536_v15, %v2456_v9  ;;  %v2029_v32 = vand.u32 2147483648, %v392_v2  ;;  %vm2814_vm11 = vcmp.lt.f32.partialorder %v2024_v24, 8388608.0 }
  0x71   : > { %v449_v13 = vadd.f32 %v1967_v27, %v2456_v9  ;;  %v2027_v31 = vcvt.s32.f32 %v2026_v25  ;;  %v513_v33 = vmin.f32 %v2464_v14, %v480_v28  ;;  %v2022_v34 = vor.u32 %v2021_v23, %v2020_v16 }
  0x72   : > { %v400_v36 = vmul.f32 %v2445_v3, %v367_v26  ;;  %v585_v37 = vpack.c.bf16 %v568_v30, %v567_v7  ;;  %v2082_v41 = vcvt.f32.s32 %v399_v29  ;;  %v2080_v38 = vand.u32 2147483647, %v399_v29 }
  0x73   : > { %v481_v39 = vmax.f32 %v449_v13, 0.0  ;;  %v2028_v40 = vand.u32 2147483647, %v2027_v31  ;;  %v545_v43 = vsub.f32 %v513_v33, %v2456_v9  ;;  %v2023_v17 = vsel %vm2803_vm10, %v2022_v34, %v391_v59 }
  0x74   : > { %v2085_v45 = vand.u32 2147483648, %v399_v29  ;;  %729 = vmatmul.bf16.gmra.mxu3 %v585_v37  ;;  %v456_v47 = vadd.f32 %v2023_v17, %v2456_v9  ;;  %v2083_v48 = vcvt.s32.f32 %v2082_v41  ;;  %v2088_v49 = vand.u32 2147483647, %v400_v36 }
  0x75   : > { %v514_v44 = vmin.f32 %v2464_v14, %v481_v39  ;;  %v2030_v46 = vor.u32 %v2029_v32, %v2028_v40  ;;  %v2090_v50 = vcvt.f32.s32 %v400_v36  ;;  %v407_v53 = vmul.f32 %v2445_v3, %v374_v42 }
  0x76   : > { %v488_v56 = vmax.f32 %v456_v47, 0.0  ;;  %v2084_v57 = vand.u32 2147483647, %v2083_v48  ;;  %vm2831_vm12 = vcmp.lt.f32.partialorder %v2080_v38, 8388608.0  ;;  %v2093_v51 = vand.u32 2147483648, %v400_v36 }
  0x77   : > { %v546_v54 = vsub.f32 %v514_v44, %v2456_v9  ;;  %v2031_v55 = vsel %vm2814_vm11, %v2030_v46, %v392_v2  ;;  %v2091_v60 = vcvt.s32.f32 %v2090_v50  ;;  %v408_v0 = vmul.f32 %v2445_v3, %v375_v52  ;;  %v2863_v44 = vld [vmem:[%s3524_s3] ss:$0 sm:$0xff] }
  0x78   : > { %v457_v58 = vadd.f32 %v2031_v55, %v2456_v9  ;;  %v521_v62 = vmin.f32 %v2464_v14, %v488_v56  ;;  %v2086_v63 = vor.u32 %v2085_v45, %v2084_v57  ;;  %vm2837_vm13 = vcmp.lt.f32.partialorder %v2088_v49, 8388608.0  ;;  %v2868_v46 = vld [vmem:[%s3525_s4] ss:$0 sm:$0xff] }
  0x79   : > { %v574_v61 = vpack.c.bf16 %v546_v54, %v545_v43  ;;  %v2092_v2 = vand.u32 2147483647, %v2091_v60  ;;  %v2146_v6 = vcvt.f32.s32 %v407_v53  ;;  %v2144_v11 = vand.u32 2147483647, %v407_v53 }
  0x7a   : > { %v489_v1 = vmax.f32 %v457_v58, 0.0  ;;  %v553_v8 = vsub.f32 %v521_v62, %v2456_v9  ;;  %v2087_v10 = vsel %vm2831_vm12, %v2086_v63, %v399_v29  ;;  %v2149_v7 = vand.u32 2147483648, %v407_v53 }
  0x7b   : > { %674 = vmatmul.bf16.gmra.mxu0 %v574_v61  ;;  %v2094_v12 = vor.u32 %v2093_v51, %v2092_v2  ;;  %v464_v3 = vadd.f32 %v2087_v10, %v2456_v9  ;;  %v2147_v18 = vcvt.s32.f32 %v2146_v6  ;;  %v2152_v19 = vand.u32 2147483647, %v408_v0 }
  0x7c   : > { %v522_v4 = vmin.f32 %v2464_v14, %v489_v1  ;;  %v2154_v20 = vcvt.f32.s32 %v408_v0  ;;  %vm2145_vm14 = vcmp.lt.f32.partialorder %v2144_v11, 8388608.0  ;;  %v2157_v26 = vand.u32 2147483648, %v408_v0 }
  0x7d   : > { %v2095_v23 = vsel %vm2837_vm13, %v2094_v12, %v400_v36  ;;  %v496_v15 = vmax.f32 %v464_v3, 0.0  ;;  %v2148_v22 = vand.u32 2147483647, %v2147_v18  ;;  %vm2153_vm15 = vcmp.lt.f32.partialorder %v2152_v19, 8388608.0 }
  0x7e   : > { %v554_v21 = vsub.f32 %v522_v4, %v2456_v9  ;;  %v465_v24 = vadd.f32 %v2095_v23, %v2456_v9  ;;  %v2155_v25 = vcvt.s32.f32 %v2154_v20 }
  0x7f   : > { %v529_v28 = vmin.f32 %v2464_v14, %v496_v15  ;;  %v2150_v16 = vor.u32 %v2149_v7, %v2148_v22 }
  0x80   : > { %v578_v27 = vpack.c.bf16 %v554_v21, %v553_v8  ;;  %v497_v29 = vmax.f32 %v465_v24, 0.0  ;;  %v2156_v30 = vand.u32 2147483647, %v2155_v25 }
  0x81   : > { %v2151_v13 = vsel %vm2145_vm14, %v2150_v16, %v407_v53  ;;  %v561_v32 = vsub.f32 %v529_v28, %v2456_v9 }
  0x82   : > { %694 = vmatmul.bf16.gmra.mxu1 %v578_v27  ;;  %v530_v31 = vmin.f32 %v2464_v14, %v497_v29  ;;  %v2158_v33 = vor.u32 %v2157_v26, %v2156_v30  ;;  %v472_v34 = vadd.f32 %v2151_v13, %v2456_v9 }
  0x84   : > { %v562_v35 = vsub.f32 %v530_v31, %v2456_v9  ;;  %v2159_v36 = vsel %vm2153_vm15, %v2158_v33, %v408_v0  ;;  %v504_v37 = vmax.f32 %v472_v34, 0.0 }
  0x85   : > { %v473_v39 = vadd.f32 %v2159_v36, %v2456_v9 }
  0x86   : > { %v582_v40 = vpack.c.bf16 %v562_v35, %v561_v32  ;;  %v537_v41 = vmin.f32 %v2464_v14, %v504_v37 }
  0x87   : > { %v505_v42 = vmax.f32 %v473_v39, 0.0 }
  0x88   : > { %714 = vmatmul.bf16.gmra.mxu2 %v582_v40  ;;  %v569_v17 = vsub.f32 %v537_v41, %v2456_v9 }
  0x89   : > { %v538_v43 = vmin.f32 %v2464_v14, %v505_v42 }
  0x8b   : > { %v570_v38 = vsub.f32 %v538_v43, %v2456_v9 }
  0x8d   : > { %v586_v45 = vpack.c.bf16 %v570_v38, %v569_v17 }
  0x8f   : > { %734 = vmatmul.bf16.gmra.mxu3 %v586_v45 }
  0xad   : > { %v660_v47 = vpop.f32.mrf.mxu0  ;;  %v680_v49 = vpop.f32.mrf.mxu1 }
  0xae   : > { %v915_v48 = vmul.f32 %v2863_v44, %v660_v47  ;;  %v923_v9 = vmul.f32 %v2863_v44, %v680_v49 }
  0xb0   : > { %v2872_v14 = vadd.f32 %v2868_v46, %v915_v48  ;;  %v2877_v52 = vadd.f32 %v2868_v46, %v923_v9 }
  0xb2   : > { %v1838_v50 = vmul.f32 -1.442695, %v2872_v14  ;;  %v1846_v53 = vmul.f32 -1.442695, %v2877_v52 }
  0xb4   : > { %2197 = vpow2.f32 %v1838_v50 }
  0xb5   : > { %2199 = vpow2.f32 %v1846_v53  ;;  %v662_v5 = vpop.f32.mrf.mxu0  ;;  %v682_v2 = vpop.f32.mrf.mxu1 }
  0xb6   : > { %v916_v8 = vmul.f32 %v2863_v44, %v662_v5  ;;  %v924_v10 = vmul.f32 %v2863_v44, %v682_v2 }
  0xb8   : > { %v2893_v20 = vadd.f32 %v2868_v46, %v916_v8  ;;  %v2898_v15 = vadd.f32 %v2868_v46, %v924_v10 }
  0xb9   : > { %v700_v54 = vpop.f32.mrf.mxu2 }
  0xba   : > { %v931_v55 = vmul.f32 %v2863_v44, %v700_v54  ;;  %v2198_v56 = vpop.eup %2197  ;;  %v1839_v25 = vmul.f32 -1.442695, %v2893_v20  ;;  %v1847_v30 = vmul.f32 -1.442695, %v2898_v15 }
  0xbb   : > { %v1079_v57 = vadd.f32 1.0, %v2198_v56  ;;  %v2200_v59 = vpop.eup %2199 }
  0xbc   : > { %v2882_v58 = vadd.f32 %v2868_v46, %v931_v55  ;;  %v1087_v60 = vadd.f32 1.0, %v2200_v59 }
  0xbd   : > { %2201 = vrcp.f32 %v1079_v57  ;;  %v1122_v63 = vand.u32 2147483648, %v1079_v57  ;;  %vm1116_vm0 = vweird.f32 %v1079_v57  ;;  %v1120_v4 = vand.u32 2147483647, %v1079_v57 }
  0xbe   : > { %v1854_v51 = vmul.f32 -1.442695, %v2882_v58  ;;  %2203 = vrcp.f32 %v1087_v60  ;;  %v1242_v24 = vand.u32 2147483648, %v1087_v60  ;;  %vm1236_vm2 = vweird.f32 %v1087_v60 }
  0xbf   : > { %v1123_v3 = vor.u32 1.1754944e-38, %v1122_v63  ;;  %v1240_v28 = vand.u32 2147483647, %v1087_v60  ;;  %vm1121_vm5 = vcmp.eq.f32.partialorder %v1120_v4, 8.507059e+37 }
  0xc0   : > { %2205 = vpow2.f32 %v1854_v51  ;;  %v665_v33 = vpop.f32.mrf.mxu0  ;;  %v1243_v36 = vor.u32 1.1754944e-38, %v1242_v24 }
  0xc1   : > { %v702_v26 = vpop.f32.mrf.mxu2  ;;  %v917_v41 = vmul.f32 %v2863_v44, %v665_v33  ;;  %vm1241_vm7 = vcmp.eq.f32.partialorder %v1240_v28, 8.507059e+37 }
  0xc2   : > { %v720_v61 = vpop.f32.mrf.mxu3  ;;  %v932_v31 = vmul.f32 %v2863_v44, %v702_v26 }
  0xc3   : > { %v2202_v62 = vpop.eup %2201  ;;  %v939_v0 = vmul.f32 %v2863_v44, %v720_v61  ;;  %v2930_v50 = vadd.f32 %v2868_v46, %v917_v41 }
  0xc4   : > { %v1112_v1 = vmul.f32 %v2202_v62, %v1079_v57  ;;  %v2204_v11 = vpop.eup %2203  ;;  %vm1117_vm1 = vweird.f32 %v2202_v62  ;;  %v2916_v39 = vadd.f32 %v2868_v46, %v932_v31 }
  0xc5   : > { %v2887_v6 = vadd.f32 %v2868_v46, %v939_v0  ;;  %v1232_v18 = vmul.f32 %v2204_v11, %v1087_v60  ;;  %vm1118_vm3 = vmor %vm1116_vm0, %vm1117_vm1  ;;  %vm1237_vm4 = vweird.f32 %v2204_v11 }
  0xc6   : > { %v1113_v7 = vsub.f32 1.0, %v1112_v1  ;;  %v2206_v12 = vpop.eup %2205  ;;  %vm1238_vm6 = vmor %vm1236_vm2, %vm1237_vm4  ;;  %v1855_v47 = vmul.f32 -1.442695, %v2916_v39 }
  0xc7   : > { %v1862_v19 = vmul.f32 -1.442695, %v2887_v6  ;;  %v2895_v23 = vadd.f32 1.0, %v2206_v12  ;;  %v1233_v22 = vsub.f32 1.0, %v1232_v18 }
  0xc8   : > { %v1114_v21 = vmul.f32 %v2202_v62, %v1113_v7  ;;  %v667_v33 = vpop.f32.mrf.mxu0 }
  0xc9   : > { %2207 = vpow2.f32 %v1862_v19  ;;  %v1234_v29 = vmul.f32 %v2204_v11, %v1233_v22  ;;  %v1360_v54 = vand.u32 2147483647, %v2895_v23  ;;  %v1362_v55 = vand.u32 2147483648, %v2895_v23 }
  0xca   : > { %v1115_v27 = vadd.f32 %v2202_v62, %v1114_v21  ;;  %2209 = vrcp.f32 %v2895_v23  ;;  %v722_v16 = vpop.f32.mrf.mxu3  ;;  %v685_v53 = vpop.f32.mrf.mxu1  ;;  %vm1356_vm9 = vweird.f32 %v2895_v23 }
  0xcb   : > { %2211 = vpow2.f32 %v1839_v25  ;;  %v940_v32 = vmul.f32 %v2863_v44, %v722_v16  ;;  %v1235_v35 = vadd.f32 %v2204_v11, %v1234_v29  ;;  %v925_v61 = vmul.f32 %v2863_v44, %v685_v53 }
  0xcc   : > { %v1119_v13 = vsel %vm1118_vm3, %v2202_v62, %v1115_v27  ;;  %2213 = vpow2.f32 %v1847_v30  ;;  %vm2947_vm10 = vcmp.eq.f32.partialorder %v1360_v54, 8.507059e+37  ;;  %v1363_v5 = vor.u32 1.1754944e-38, %v1362_v55 }
  0xcd   : > { %v1124_v34 = vsel %vm1121_vm5, %v1123_v3, %v1119_v13  ;;  %v2919_v40 = vadd.f32 %v2868_v46, %v940_v32  ;;  %v1239_v43 = vsel %vm1238_vm6, %v2204_v11, %v1235_v35  ;;  %v2961_v21 = vadd.f32 %v2868_v46, %v925_v61 }
  0xce   : > { %v1591_v37 = vmul.f32 %v1124_v34, %v2872_v14  ;;  %v1244_v38 = vsel %vm1241_vm7, %v1243_v36, %v1239_v43 }
  0xcf   : > { %v2208_v42 = vpop.eup %2207  ;;  %v1863_v48 = vmul.f32 -1.442695, %v2919_v40  ;;  %v1599_v49 = vmul.f32 %v1244_v38, %v2877_v52  ;;  %v1840_v52 = vmul.f32 -1.442695, %v2930_v50 }
  0xd0   : > { %v2210_v17 = vpop.eup %2209  ;;  %1623 = vst [vmem:[%s2911_s12] sm:$0xff] %v1591_v37  ;;  %v2923_v45 = vadd.f32 1.0, %v2208_v42  ;;  %v1848_v37 = vmul.f32 -1.442695, %v2961_v21 }
  0xd1   : > { %v2212_v14 = vpop.eup %2211  ;;  %v1352_v9 = vmul.f32 %v2210_v17, %v2895_v23  ;;  %1631 = vst [vmem:[%s2911_s12 + $0x40] sm:$0xff] %v1599_v49  ;;  %vm1357_vm8 = vweird.f32 %v2210_v17 }
  0xd2   : > { %2215 = vrcp.f32 %v2923_v45  ;;  %v2214_v56 = vpop.eup %2213  ;;  %v2936_v59 = vadd.f32 1.0, %v2212_v14  ;;  %v1482_v60 = vand.u32 2147483648, %v2923_v45  ;;  %v1480_v63 = vand.u32 2147483647, %v2923_v45  ;;  %vm1358_vm11 = vmor %vm1356_vm9, %vm1357_vm8 }
  0xd3   : > { %v1353_v57 = vsub.f32 1.0, %v1352_v9  ;;  %2217 = vpow2.f32 %v1855_v47  ;;  %v2940_v51 = vadd.f32 1.0, %v2214_v56  ;;  %vm1476_vm12 = vweird.f32 %v2923_v45 }
  0xd4   : > { %2219 = vpow2.f32 %v1863_v48  ;;  %v705_v2 = vpop.f32.mrf.mxu2  ;;  %v1483_v10 = vor.u32 1.1754944e-38, %v1482_v60  ;;  %v1135_v11 = vand.u32 2147483647, %v2936_v59  ;;  %v1137_v7 = vand.u32 2147483648, %v2936_v59 }
  0xd5   : > { %v1354_v62 = vmul.f32 %v2210_v17, %v1353_v57  ;;  %2221 = vrcp.f32 %v2936_v59  ;;  %vm2955_vm13 = vcmp.eq.f32.partialorder %v1480_v63, 8.507059e+37  ;;  %v1255_v19 = vand.u32 2147483647, %v2940_v51 }
  0xd6   : > { %2223 = vrcp.f32 %v2940_v51  ;;  %vm1131_vm14 = vweird.f32 %v2936_v59  ;;  %v1257_v24 = vand.u32 2147483648, %v2940_v51  ;;  %v933_v26 = vmul.f32 %v2863_v44, %v705_v2 }
  0xd7   : > { %v1355_v0 = vadd.f32 %v2210_v17, %v1354_v62  ;;  %2225 = vpow2.f32 %v1840_v52  ;;  %vm1251_vm15 = vweird.f32 %v2940_v51  ;;  %vm2975_vm0 = vcmp.eq.f32.partialorder %v1135_v11, 8.507059e+37 }
  0xd8   : > { %v2216_v8 = vpop.eup %2215  ;;  %v1138_v32 = vor.u32 1.1754944e-38, %v1137_v7  ;;  %vm2982_vm2 = vcmp.eq.f32.partialorder %v1255_v19, 8.507059e+37  ;;  %v1258_v42 = vor.u32 1.1754944e-38, %v1257_v24  ;;  %v2989_v43 = vadd.f32 %v2868_v46, %v933_v26 }
  0xd9   : > { %v2218_v4 = vpop.eup %2217  ;;  %v1359_v12 = vsel %vm1358_vm11, %v2210_v17, %v1355_v0  ;;  %v1472_v3 = vmul.f32 %v2216_v8, %v2923_v45  ;;  %vm1477_vm1 = vweird.f32 %v2216_v8  ;;  %v918_v47 = vmul.f32 %v2863_v44, %v667_v33 }
  0xda   : > { %v2220_v23 = vpop.eup %2219  ;;  %v1364_v22 = vsel %vm2947_vm10, %v1363_v5, %v1359_v12  ;;  %v2967_v25 = vadd.f32 1.0, %v2218_v4  ;;  %vm1478_vm4 = vmor %vm1476_vm12, %vm1477_vm1 }
  0xdb   : > { %v2222_v27 = vpop.eup %2221  ;;  %v1607_v28 = vmul.f32 %v1364_v22, %v2882_v58  ;;  %v1473_v16 = vsub.f32 1.0, %v1472_v3  ;;  %v2972_v29 = vadd.f32 1.0, %v2220_v23 }
  0xdc   : > { %v2224_v30 = vpop.eup %2223  ;;  %v1127_v13 = vmul.f32 %v2222_v27, %v2936_v59  ;;  %2227 = vrcp.f32 %v2967_v25  ;;  %vm1132_vm3 = vweird.f32 %v2222_v27  ;;  %v1375_v14 = vand.u32 2147483647, %v2967_v25  ;;  %v725_v52 = vpop.f32.mrf.mxu3 }
  0xdd   : > { %v2226_v34 = vpop.eup %2225  ;;  %1639 = vst [vmem:[%s2911_s12 + $0x80] sm:$0xff] %v1607_v28  ;;  %v1474_v35 = vmul.f32 %v2216_v8, %v1473_v16  ;;  %v1247_v58 = vmul.f32 %v2224_v30, %v2940_v51  ;;  %2229 = vrcp.f32 %v2972_v29  ;;  %v1377_v49 = vand.u32 2147483648, %v2967_v25  ;;  %vm1133_vm7 = vmor %vm1131_vm14, %vm1132_vm3 }
  0xde   : > { %v1128_v41 = vsub.f32 1.0, %v1127_v13  ;;  %v2996_v9 = vadd.f32 1.0, %v2226_v34  ;;  %vm1252_vm5 = vweird.f32 %v2224_v30  ;;  %vm1371_vm6 = vweird.f32 %v2967_v25  ;;  %v687_v13 = vpop.f32.mrf.mxu1  ;;  %v707_v34 = vpop.f32.mrf.mxu2 }
  0xdf   : > { %v1475_v17 = vadd.f32 %v2216_v8, %v1474_v35  ;;  %v1248_v38 = vsub.f32 1.0, %v1247_v58  ;;  %2231 = vpow2.f32 %v1848_v37  ;;  %v1495_v57 = vand.u32 2147483647, %v2972_v29  ;;  %vm1253_vm9 = vmor %vm1251_vm15, %vm1252_vm5 }
  0xe0   : > { %v1129_v48 = vmul.f32 %v2222_v27, %v1128_v41  ;;  %2233 = vrcp.f32 %v2996_v9  ;;  %vm1491_vm8 = vweird.f32 %v2972_v29  ;;  %vm3012_vm10 = vcmp.eq.f32.partialorder %v1375_v14, 8.507059e+37 }
  0xe1   : > { %v1479_v53 = vsel %vm1478_vm4, %v2216_v8, %v1475_v17  ;;  %v1249_v54 = vmul.f32 %v2224_v30, %v1248_v38  ;;  %v1497_v5 = vand.u32 2147483648, %v2972_v29  ;;  %vm3024_vm12 = vcmp.eq.f32.partialorder %v1495_v57, 8.507059e+37  ;;  %v670_v38 = vpop.f32.mrf.mxu0 }
  0xe2   : > { %v2228_v55 = vpop.eup %2227  ;;  %v1484_v56 = vsel %vm2955_vm13, %v1483_v10, %v1479_v53  ;;  %v1130_v45 = vadd.f32 %v2222_v27, %v1129_v48  ;;  %v1152_v19 = vand.u32 2147483648, %v2996_v9  ;;  %v941_v24 = vmul.f32 %v2863_v44, %v725_v52 }
  0xe3   : > { %v1615_v60 = vmul.f32 %v1484_v56, %v2887_v6  ;;  %v1250_v61 = vadd.f32 %v2224_v30, %v1249_v54  ;;  %v1367_v62 = vmul.f32 %v2228_v55, %v2967_v25  ;;  %v2230_v63 = vpop.eup %2229  ;;  %v1378_v6 = vor.u32 1.1754944e-38, %v1377_v49 }
  0xe4   : > { %v1134_v0 = vsel %vm1133_vm7, %v2222_v27, %v1130_v45  ;;  %v1487_v10 = vmul.f32 %v2230_v63, %v2972_v29  ;;  %vm1372_vm11 = vweird.f32 %v2228_v55  ;;  %vm1492_vm13 = vweird.f32 %v2230_v63  ;;  %v727_v36 = vpop.f32.mrf.mxu3 }
  0xe5   : > { %1647 = vst [vmem:[%s2911_s12 + $0xc0] sm:$0xff] %v1615_v60  ;;  %v1139_v59 = vsel %vm2975_vm0, %v1138_v32, %v1134_v0  ;;  %v1254_v2 = vsel %vm1253_vm9, %v2224_v30, %v1250_v61  ;;  %v1368_v8 = vsub.f32 1.0, %v1367_v62  ;;  %v2232_v4 = vpop.eup %2231  ;;  %vm1373_vm14 = vmor %vm1371_vm6, %vm1372_vm11  ;;  %v1498_v16 = vor.u32 1.1754944e-38, %v1497_v5 }
  0xe6   : > { %v1592_v51 = vmul.f32 %v1139_v59, %v2893_v20  ;;  %v1259_v11 = vsel %vm2982_vm2, %v1258_v42, %v1254_v2  ;;  %v1488_v18 = vsub.f32 1.0, %v1487_v10  ;;  %v2234_v23 = vpop.eup %2233  ;;  %v3031_v22 = vadd.f32 1.0, %v2232_v4  ;;  %vm1493_vm0 = vmor %vm1491_vm8, %vm1492_vm13  ;;  %v690_v2 = vpop.f32.mrf.mxu1 }
  0xe7   : > { %v1600_v12 = vmul.f32 %v1259_v11, %v2898_v15  ;;  %v1369_v3 = vmul.f32 %v2228_v55, %v1368_v8  ;;  %v1856_v20 = vmul.f32 -1.442695, %v2989_v43  ;;  %v1142_v28 = vmul.f32 %v2234_v23, %v2996_v9 }
  0xe8   : > { %1624 = vst [vmem:[%s2911_s12 + $0x8] sm:$0xff] %v1592_v51  ;;  %v1489_v27 = vmul.f32 %v2230_v63, %v1488_v18  ;;  %v3038_v15 = vadd.f32 %v2868_v46, %v918_v47  ;;  %vm1146_vm15 = vweird.f32 %v2996_v9  ;;  %v1150_v30 = vand.u32 2147483647, %v2996_v9 }
  0xe9   : > { %1632 = vst [vmem:[%s2911_s12 + $0x48] sm:$0xff] %v1600_v12  ;;  %v1370_v26 = vadd.f32 %v2228_v55, %v1369_v3  ;;  %2235 = vrcp.f32 %v3031_v22  ;;  %v1143_v33 = vsub.f32 1.0, %v1142_v28  ;;  %vm1147_vm1 = vweird.f32 %v2234_v23 }
  0xea   : > { %v1490_v32 = vadd.f32 %v2230_v63, %v1489_v27  ;;  %2237 = vpow2.f32 %v1856_v20  ;;  %v1153_v25 = vor.u32 1.1754944e-38, %v1152_v19  ;;  %v3052_v58 = vadd.f32 %v2868_v46, %v941_v24  ;;  %vm1148_vm2 = vmor %vm1146_vm15, %vm1147_vm1 }
  0xeb   : > { %v1374_v31 = vsel %vm1373_vm14, %v2228_v55, %v1370_v26  ;;  %v1144_v42 = vmul.f32 %v2234_v23, %v1143_v33  ;;  %v1841_v17 = vmul.f32 -1.442695, %v3038_v15  ;;  %v926_v48 = vmul.f32 %v2863_v44, %v687_v13 }
  0xec   : > { %v1379_v35 = vsel %vm3012_vm10, %v1378_v6, %v1374_v31  ;;  %v1494_v41 = vsel %vm1493_vm0, %v2230_v63, %v1490_v32  ;;  %v1864_v29 = vmul.f32 -1.442695, %v3052_v58  ;;  %v934_v14 = vmul.f32 %v2863_v44, %v707_v34 }
  0xed   : > { %v1608_v37 = vmul.f32 %v1379_v35, %v2916_v39  ;;  %v1499_v47 = vsel %vm3024_vm12, %v1498_v16, %v1494_v41  ;;  %v1145_v53 = vadd.f32 %v2234_v23, %v1144_v42  ;;  %2239 = vpow2.f32 %v1841_v17 }
  0xee   : > { %v1616_v49 = vmul.f32 %v1499_v47, %v2919_v40  ;;  %v942_v39 = vmul.f32 %v2863_v44, %v727_v36  ;;  %2241 = vpow2.f32 %v1864_v29  ;;  %v3068_v55 = vadd.f32 %v2868_v46, %v926_v48 }
  0xef   : > { %1640 = vst [vmem:[%s2911_s12 + $0x88] sm:$0xff] %v1608_v37  ;;  %v2236_v54 = vpop.eup %2235  ;;  %v3071_v56 = vadd.f32 %v2868_v46, %v934_v14  ;;  %v919_v45 = vmul.f32 %v2863_v44, %v670_v38  ;;  %v1149_v40 = vsel %vm1148_vm2, %v2234_v23, %v1145_v53  ;;  %vm1151_vm3 = vcmp.eq.f32.partialorder %v1150_v30, 8.507059e+37 }
  0xf0   : > { %v2238_v57 = vpop.eup %2237  ;;  %1648 = vst [vmem:[%s2911_s12 + $0xc8] sm:$0xff] %v1616_v49  ;;  %v1262_v52 = vmul.f32 %v2236_v54, %v3031_v22  ;;  %v3077_v60 = vadd.f32 %v2868_v46, %v942_v39  ;;  %v1154_v9 = vsel %vm1151_vm3, %v1153_v25, %v1149_v40  ;;  %v1849_v62 = vmul.f32 -1.442695, %v3068_v55  ;;  %v710_v41 = vpop.f32.mrf.mxu2 }
  0xf1   : > { %v3079_v61 = vadd.f32 1.0, %v2238_v57  ;;  %v1857_v63 = vmul.f32 -1.442695, %v3071_v56  ;;  %v1593_v0 = vmul.f32 %v1154_v9, %v2930_v50  ;;  %vm1266_vm4 = vweird.f32 %v3031_v22  ;;  %v692_v49 = vpop.f32.mrf.mxu1 }
  0xf2   : > { %v1263_v1 = vsub.f32 1.0, %v1262_v52  ;;  %v1865_v6 = vmul.f32 -1.442695, %v3077_v60  ;;  %v1272_v5 = vand.u32 2147483648, %v3031_v22  ;;  %v3089_v59 = vadd.f32 %v2868_v46, %v919_v45 }
  0xf3   : > { %2243 = vrcp.f32 %v3079_v61  ;;  %v2240_v8 = vpop.eup %2239  ;;  %1625 = vst [vmem:[%s2911_s12 + $0x10] sm:$0xff] %v1593_v0  ;;  %vm1267_vm5 = vweird.f32 %v2236_v54  ;;  %v1270_v51 = vand.u32 2147483647, %v3031_v22  ;;  %v927_v12 = vmul.f32 %v2863_v44, %v690_v2 }
  0xf4   : > { %v1264_v10 = vmul.f32 %v2236_v54, %v1263_v1  ;;  %2245 = vpow2.f32 %v1849_v62  ;;  %v2242_v50 = vpop.eup %2241  ;;  %v3093_v11 = vadd.f32 1.0, %v2240_v8  ;;  %vm1268_vm6 = vmor %vm1266_vm4, %vm1267_vm5  ;;  %v1273_v3 = vor.u32 1.1754944e-38, %v1272_v5 }
  0xf5   : > { %2247 = vpow2.f32 %v1857_v63  ;;  %v3095_v4 = vadd.f32 1.0, %v2242_v50  ;;  %v1390_v18 = vand.u32 2147483647, %v3079_v61  ;;  %v1842_v19 = vmul.f32 -1.442695, %v3089_v59 }
  0xf6   : > { %v1265_v7 = vadd.f32 %v2236_v54, %v1264_v10  ;;  %2249 = vpow2.f32 %v1865_v6  ;;  %vm1271_vm7 = vcmp.eq.f32.partialorder %v1270_v51, 8.507059e+37  ;;  %v1392_v20 = vand.u32 2147483648, %v3079_v61 }
  0xf7   : > { %2251 = vrcp.f32 %v3093_v11  ;;  %vm1386_vm8 = vweird.f32 %v3079_v61  ;;  %v1512_v22 = vand.u32 2147483648, %v3095_v4  ;;  %v1167_v27 = vand.u32 2147483648, %v3093_v11  ;;  %v730_v42 = vpop.f32.mrf.mxu3 }
  0xf8   : > { %v1269_v23 = vsel %vm1268_vm6, %v2236_v54, %v1265_v7  ;;  %2253 = vrcp.f32 %v3095_v4  ;;  %v1165_v13 = vand.u32 2147483647, %v3093_v11  ;;  %v3112_v31 = vadd.f32 %v2868_v46, %v927_v12 }
  0xf9   : > { %v2244_v24 = vpop.eup %2243  ;;  %v1274_v26 = vsel %vm1271_vm7, %v1273_v3, %v1269_v23  ;;  %vm3114_vm9 = vcmp.eq.f32.partialorder %v1390_v18, 8.507059e+37  ;;  %v1510_v34 = vand.u32 2147483647, %v3095_v4  ;;  %2255 = vpow2.f32 %v1842_v19 }
  0xfa   : > { %v2246_v28 = vpop.eup %2245  ;;  %v1601_v16 = vmul.f32 %v1274_v26, %v2961_v21  ;;  %v1382_v30 = vmul.f32 %v2244_v24, %v3079_v61  ;;  %v1393_v36 = vor.u32 1.1754944e-38, %v1392_v20  ;;  %vm1161_vm10 = vweird.f32 %v3093_v11 }
  0xfb   : > { %v2248_v32 = vpop.eup %2247  ;;  %v3119_v35 = vadd.f32 1.0, %v2246_v28  ;;  %vm1387_vm11 = vweird.f32 %v2244_v24  ;;  %vm1506_vm12 = vweird.f32 %v3095_v4  ;;  %v1513_v38 = vor.u32 1.1754944e-38, %v1512_v22 }
  0xfc   : > { %v2250_v25 = vpop.eup %2249  ;;  %1633 = vst [vmem:[%s2911_s12 + $0x50] sm:$0xff] %v1601_v16  ;;  %v1383_v21 = vsub.f32 1.0, %v1382_v30  ;;  %v3123_v37 = vadd.f32 1.0, %v2248_v32  ;;  %v1168_v47 = vor.u32 1.1754944e-38, %v1167_v27  ;;  %vm3128_vm13 = vcmp.eq.f32.partialorder %v1165_v13, 8.507059e+37  ;;  %vm1388_vm0 = vmor %vm1386_vm8, %vm1387_vm11 }
  0xfd   : > { %v2252_v17 = vpop.eup %2251  ;;  %2257 = vrcp.f32 %v3119_v35  ;;  %v1850_v53 = vmul.f32 -1.442695, %v3112_v31  ;;  %vm3135_vm14 = vcmp.eq.f32.partialorder %v1510_v34, 8.507059e+37  ;;  %v1285_v45 = vand.u32 2147483647, %v3119_v35 }
  0xfe   : > { %v2254_v29 = vpop.eup %2253  ;;  %v1384_v48 = vmul.f32 %v2244_v24, %v1383_v21  ;;  %v1157_v14 = vmul.f32 %v2252_v17, %v3093_v11  ;;  %2259 = vrcp.f32 %v3123_v37  ;;  %v3141_v57 = vmul.f32 %v2863_v44, %v710_v41 }
  0xff   : > { %v1502_v39 = vmul.f32 %v2254_v29, %v3095_v4  ;;  %v3144_v40 = vmul.f32 %v2863_v44, %v730_v42  ;;  %vm1162_vm15 = vweird.f32 %v2252_v17  ;;  %v1287_v62 = vand.u32 2147483648, %v3119_v35  ;;  %v2256_v63 = vpop.eup %2255 }
 0x100   : > { %v1385_v52 = vadd.f32 %v2244_v24, %v1384_v48  ;;  %v1158_v9 = vsub.f32 1.0, %v1157_v14  ;;  %vm1507_vm1 = vweird.f32 %v2254_v29  ;;  %v1405_v1 = vand.u32 2147483647, %v3123_v37  ;;  %vm1163_vm4 = vmor %vm1161_vm10, %vm1162_vm15 }
 0x101   : > { %v1503_v0 = vsub.f32 1.0, %v1502_v39  ;;  %v3151_v6 = vadd.f32 1.0, %v2250_v25  ;;  %vm1281_vm2 = vweird.f32 %v3119_v35  ;;  %v1407_v8 = vand.u32 2147483648, %v3123_v37  ;;  %vm1508_vm7 = vmor %vm1506_vm12, %vm1507_vm1 }
 0x102   : > { %v1389_v5 = vsel %vm1388_vm0, %v2244_v24, %v1385_v52  ;;  %v1159_v2 = vmul.f32 %v2252_v17, %v1158_v9  ;;  %2261 = vpow2.f32 %v1850_v53  ;;  %v3158_v50 = vadd.f32 1.0, %v2256_v63 }
 0x103   : > { %v2258_v10 = vpop.eup %2257  ;;  %v1394_v51 = vsel %vm3114_vm9, %v1393_v36, %v1389_v5  ;;  %v1504_v61 = vmul.f32 %v2254_v29, %v1503_v0  ;;  %2263 = vrcp.f32 %v3151_v6  ;;  %vm3162_vm3 = vcmp.eq.f32.partialorder %v1285_v45, 8.507059e+37 }
 0x104   : > { %v2260_v7 = vpop.eup %2259  ;;  %v1609_v12 = vmul.f32 %v1394_v51, %v2989_v43  ;;  %v1160_v3 = vadd.f32 %v2252_v17, %v1159_v2  ;;  %v1277_v18 = vmul.f32 %v2258_v10, %v3119_v35  ;;  %v1288_v23 = vor.u32 1.1754944e-38, %v1287_v62 }
 0x105   : > { %v1505_v20 = vadd.f32 %v2254_v29, %v1504_v61  ;;  %v1397_v24 = vmul.f32 %v2260_v7, %v3123_v37  ;;  %vm1401_vm5 = vweird.f32 %v3123_v37  ;;  %vm3171_vm6 = vcmp.eq.f32.partialorder %v1405_v1, 8.507059e+37  ;;  %v712_v61 = vpop.f32.mrf.mxu2 }
 0x106   : > { %1641 = vst [vmem:[%s2911_s12 + $0x90] sm:$0xff] %v1609_v12  ;;  %v1164_v43 = vsel %vm1163_vm4, %v2252_v17, %v1160_v3  ;;  %v1278_v22 = vsub.f32 1.0, %v1277_v18  ;;  %v1408_v27 = vor.u32 1.1754944e-38, %v1407_v8  ;;  %v1525_v11 = vand.u32 2147483647, %v3151_v6 }
 0x107   : > { %v1509_v28 = vsel %vm1508_vm7, %v2254_v29, %v1505_v20  ;;  %v1169_v16 = vsel %vm3128_vm13, %v1168_v47, %v1164_v43  ;;  %v1398_v30 = vsub.f32 1.0, %v1397_v24  ;;  %2265 = vrcp.f32 %v3158_v50  ;;  %v672_v47 = vpop.f32.mrf.mxu0 }
 0x108   : > { %v2262_v13 = vpop.eup %2261  ;;  %v1514_v32 = vsel %vm3135_vm14, %v1513_v38, %v1509_v28  ;;  %v1594_v4 = vmul.f32 %v1169_v16, %v3038_v15  ;;  %v1279_v33 = vmul.f32 %v2258_v10, %v1278_v22  ;;  %vm1282_vm8 = vweird.f32 %v2258_v10 }
 0x109   : > { %v2264_v34 = vpop.eup %2263  ;;  %v1617_v25 = vmul.f32 %v1514_v32, %v3052_v58  ;;  %v1399_v21 = vmul.f32 %v2260_v7, %v1398_v30  ;;  %vm1402_vm9 = vweird.f32 %v2260_v7  ;;  %vm1521_vm10 = vweird.f32 %v3151_v6  ;;  %vm1283_vm12 = vmor %vm1281_vm2, %vm1282_vm8  ;;  %v695_v30 = vpop.f32.mrf.mxu1 }
 0x10a   : > { %1626 = vst [vmem:[%s2911_s12 + $0x18] sm:$0xff] %v1594_v4  ;;  %v1280_v36 = vadd.f32 %v2258_v10, %v1279_v33  ;;  %v1517_v41 = vmul.f32 %v2264_v34, %v3151_v6  ;;  %vm3190_vm11 = vcmp.eq.f32.partialorder %v1525_v11, 8.507059e+37  ;;  %v1527_v17 = vand.u32 2147483648, %v3151_v6  ;;  %vm1403_vm14 = vmor %vm1401_vm5, %vm1402_vm9 }
 0x10b   : > { %1649 = vst [vmem:[%s2911_s12 + $0xd0] sm:$0xff] %v1617_v25  ;;  %v1400_v15 = vadd.f32 %v2260_v7, %v1399_v21  ;;  %vm1522_vm13 = vweird.f32 %v2264_v34  ;;  %v1180_v58 = vand.u32 2147483647, %v3158_v50  ;;  %v3199_v38 = vadd.f32 1.0, %v2262_v13 }
 0x10c   : > { %v1284_v29 = vsel %vm1283_vm12, %v2258_v10, %v1280_v36  ;;  %v1518_v48 = vsub.f32 1.0, %v1517_v41  ;;  %v1182_v14 = vand.u32 2147483648, %v3158_v50  ;;  %v3207_v35 = vadd.f32 %v2868_v46, %v3141_v57  ;;  %vm1523_vm1 = vmor %vm1521_vm10, %vm1522_vm13 }
 0x10d   : > { %v2266_v53 = vpop.eup %2265  ;;  %v1289_v39 = vsel %vm3162_vm3, %v1288_v23, %v1284_v29  ;;  %v1404_v54 = vsel %vm1403_vm14, %v2260_v7, %v1400_v15  ;;  %2267 = vrcp.f32 %v3199_v38  ;;  %v3214_v37 = vadd.f32 %v2868_v46, %v3144_v40  ;;  %v732_v7 = vpop.f32.mrf.mxu3 }
 0x10e   : > { %v1602_v45 = vmul.f32 %v1289_v39, %v3068_v55  ;;  %v1409_v52 = vsel %vm3171_vm6, %v1408_v27, %v1404_v54  ;;  %v1519_v57 = vmul.f32 %v2264_v34, %v1518_v48  ;;  %v1172_v9 = vmul.f32 %v2266_v53, %v3158_v50 }
 0x10f   : > { %v1610_v62 = vmul.f32 %v1409_v52, %v3071_v56  ;;  %v1528_v63 = vor.u32 1.1754944e-38, %v1527_v17  ;;  %vm1176_vm15 = vweird.f32 %v3158_v50  ;;  %vm3222_vm0 = vcmp.eq.f32.partialorder %v1180_v58, 8.507059e+37  ;;  %v675_v11 = vpop.f32.mrf.mxu0 }
 0x110   : > { %1634 = vst [vmem:[%s2911_s12 + $0x58] sm:$0xff] %v1602_v45  ;;  %v1520_v40 = vadd.f32 %v2264_v34, %v1519_v57  ;;  %v1173_v1 = vsub.f32 1.0, %v1172_v9  ;;  %v1183_v5 = vor.u32 1.1754944e-38, %v1182_v14  ;;  %v1858_v55 = vmul.f32 -1.442695, %v3207_v35 }
 0x111   : > { %1642 = vst [vmem:[%s2911_s12 + $0x98] sm:$0xff] %v1610_v62  ;;  %vm1177_vm2 = vweird.f32 %v2266_v53  ;;  %v1866_v56 = vmul.f32 -1.442695, %v3214_v37  ;;  %v920_v2 = vmul.f32 %v2863_v44, %v672_v47  ;;  %v928_v8 = vmul.f32 %v2863_v44, %v692_v49 }
 0x112   : > { %v1524_v10 = vsel %vm1523_vm1, %v2264_v34, %v1520_v40  ;;  %v1174_v51 = vmul.f32 %v2266_v53, %v1173_v1  ;;  %vm1296_vm3 = vweird.f32 %v3199_v38  ;;  %2269 = vpow2.f32 %v1858_v55  ;;  %vm1178_vm4 = vmor %vm1176_vm15, %vm1177_vm2 }
 0x113   : > { %v2268_v12 = vpop.eup %2267  ;;  %v1529_v6 = vsel %vm3190_vm11, %v1528_v63, %v1524_v10  ;;  %2271 = vpow2.f32 %v1866_v56  ;;  %v3239_v3 = vadd.f32 %v2868_v46, %v920_v2  ;;  %v3242_v18 = vadd.f32 %v2868_v46, %v928_v8 }
 0x114   : > { %v1618_v19 = vmul.f32 %v1529_v6, %v3077_v60  ;;  %v1175_v23 = vadd.f32 %v2266_v53, %v1174_v51  ;;  %v1292_v20 = vmul.f32 %v2268_v12, %v3199_v38  ;;  %v1300_v24 = vand.u32 2147483647, %v3199_v38 }
 0x115   : > { %v1843_v26 = vmul.f32 -1.442695, %v3239_v3  ;;  %v1851_v43 = vmul.f32 -1.442695, %v3242_v18  ;;  %v936_v22 = vmul.f32 %v2863_v44, %v712_v61  ;;  %v944_v27 = vmul.f32 %v2863_v44, %v732_v7 }
 0x116   : > { %1650 = vst [vmem:[%s2911_s12 + $0xd8] sm:$0xff] %v1618_v19  ;;  %v1179_v60 = vsel %vm1178_vm4, %v2266_v53, %v1175_v23  ;;  %v1293_v28 = vsub.f32 1.0, %v1292_v20  ;;  %vm1297_vm5 = vweird.f32 %v2268_v12  ;;  %v1302_v16 = vand.u32 2147483648, %v3199_v38  ;;  %v715_v53 = vpop.f32.mrf.mxu2 }
 0x117   : > { %v1184_v50 = vsel %vm3222_vm0, %v1183_v5, %v1179_v60  ;;  %2273 = vpow2.f32 %v1843_v26  ;;  %v3259_v13 = vadd.f32 %v2868_v46, %v936_v22  ;;  %v3262_v32 = vadd.f32 %v2868_v46, %v944_v27  ;;  %vm1298_vm6 = vmor %vm1296_vm3, %vm1297_vm5  ;;  %v3325_v22 = vld [vmem:[%s3525_s4] ss:$0 sm:$0xff]  ;;  %v677_v60 = vpop.f32.mrf.mxu0 }
 0x118   : > { %v2270_v4 = vpop.eup %2269  ;;  %v1595_v33 = vmul.f32 %v1184_v50, %v3089_v59  ;;  %v1294_v34 = vmul.f32 %v2268_v12, %v1293_v28  ;;  %2275 = vpow2.f32 %v1851_v43  ;;  %v921_v25 = vmul.f32 %v2863_v44, %v675_v11  ;;  %v735_v11 = vpop.f32.mrf.mxu3 }
 0x119   : > { %v2272_v21 = vpop.eup %2271  ;;  %v3266_v36 = vadd.f32 1.0, %v2270_v4  ;;  %v929_v41 = vmul.f32 %v2863_v44, %v695_v30  ;;  %v1859_v15 = vmul.f32 -1.442695, %v3259_v13  ;;  %v1303_v59 = vor.u32 1.1754944e-38, %v1302_v16 }
 0x11a   : > { %1627 = vst [vmem:[%s2911_s12 + $0x20] sm:$0xff] %v1595_v33  ;;  %v1295_v42 = vadd.f32 %v2268_v12, %v1294_v34  ;;  %v3270_v17 = vadd.f32 1.0, %v2272_v21  ;;  %v1867_v58 = vmul.f32 -1.442695, %v3262_v32  ;;  %vm1301_vm7 = vcmp.eq.f32.partialorder %v1300_v24, 8.507059e+37 }
 0x11b   : > { %2277 = vrcp.f32 %v3266_v36  ;;  %v3280_v29 = vadd.f32 %v2868_v46, %v921_v25  ;;  %v1420_v49 = vand.u32 2147483647, %v3266_v36  ;;  %v3284_v38 = vadd.f32 %v2868_v46, %v929_v41 }
 0x11c   : > { %v1299_v47 = vsel %vm1298_vm6, %v2268_v12, %v1295_v42  ;;  %2279 = vrcp.f32 %v3270_v17  ;;  %v1422_v45 = vand.u32 2147483648, %v3266_v36  ;;  %v1540_v57 = vand.u32 2147483647, %v3270_v17  ;;  %v3347_v42 = vld [vmem:[%s3524_s3] ss:$0 sm:$0xff] }
 0x11d   : > { %v2274_v48 = vpop.eup %2273  ;;  %v1304_v14 = vsel %vm1301_vm7, %v1303_v59, %v1299_v47  ;;  %2281 = vpow2.f32 %v1859_v15  ;;  %v1542_v9 = vand.u32 2147483648, %v3270_v17  ;;  %v1844_v46 = vmul.f32 -1.442695, %v3280_v29 }
 0x11e   : > { %v2276_v39 = vpop.eup %2275  ;;  %v1603_v54 = vmul.f32 %v1304_v14, %v3112_v31  ;;  %v3288_v52 = vadd.f32 1.0, %v2274_v48  ;;  %2283 = vpow2.f32 %v1867_v58  ;;  %v937_v63 = vmul.f32 %v2863_v44, %v715_v53 }
 0x11f   : > { %v3292_v62 = vadd.f32 1.0, %v2276_v39  ;;  %vm1416_vm8 = vweird.f32 %v3266_v36  ;;  %vm1536_vm9 = vweird.f32 %v3270_v17  ;;  %vm3303_vm10 = vcmp.eq.f32.partialorder %v1420_v49, 8.507059e+37 }
 0x120   : > { %1635 = vst [vmem:[%s2911_s12 + $0x60] sm:$0xff] %v1603_v54  ;;  %2285 = vrcp.f32 %v3288_v52  ;;  %v1197_v0 = vand.u32 2147483648, %v3288_v52  ;;  %v1423_v55 = vor.u32 1.1754944e-38, %v1422_v45  ;;  %v1852_v56 = vmul.f32 -1.442695, %v3284_v38 }
 0x121   : > { %v2278_v31 = vpop.eup %2277  ;;  %2287 = vrcp.f32 %v3292_v62  ;;  %vm3309_vm11 = vcmp.eq.f32.partialorder %v1540_v57, 8.507059e+37  ;;  %v1543_v8 = vor.u32 1.1754944e-38, %v1542_v9  ;;  %v1195_v10 = vand.u32 2147483647, %v3288_v52 }
 0x122   : > { %v2280_v40 = vpop.eup %2279  ;;  %v1412_v1 = vmul.f32 %v2278_v31, %v3266_v36  ;;  %vm1417_vm12 = vweird.f32 %v2278_v31  ;;  %v1315_v7 = vand.u32 2147483647, %v3292_v62  ;;  %v1317_v12 = vand.u32 2147483648, %v3292_v62 }
 0x123   : > { %v1532_v44 = vmul.f32 %v2280_v40, %v3270_v17  ;;  %v2282_v51 = vpop.eup %2281  ;;  %vm1191_vm13 = vweird.f32 %v3288_v52  ;;  %v1198_v23 = vor.u32 1.1754944e-38, %v1197_v0  ;;  %2289 = vpow2.f32 %v1844_v46  ;;  %vm1418_vm2 = vmor %vm1416_vm8, %vm1417_vm12 }
 0x124   : > { %v1413_v61 = vsub.f32 1.0, %v1412_v1  ;;  %v2284_v6 = vpop.eup %2283  ;;  %v3317_v20 = vadd.f32 1.0, %v2282_v51  ;;  %vm1311_vm14 = vweird.f32 %v3292_v62  ;;  %2291 = vpow2.f32 %v1852_v56 }
 0x125   : > { %v1533_v19 = vsub.f32 1.0, %v1532_v44  ;;  %v3320_v43 = vadd.f32 1.0, %v2284_v6  ;;  %v3328_v27 = vadd.f32 %v3325_v22, %v937_v63  ;;  %vm1537_vm15 = vweird.f32 %v2280_v40 }
 0x126   : > { %v2286_v24 = vpop.eup %2285  ;;  %v1414_v26 = vmul.f32 %v2278_v31, %v1413_v61  ;;  %vm3331_vm0 = vcmp.eq.f32.partialorder %v1195_v10, 8.507059e+37  ;;  %2293 = vrcp.f32 %v3317_v20  ;;  %vm3337_vm1 = vcmp.eq.f32.partialorder %v1315_v7, 8.507059e+37  ;;  %vm1538_vm3 = vmor %vm1536_vm9, %vm1537_vm15 }
 0x127   : > { %v2288_v28 = vpop.eup %2287  ;;  %v1534_v16 = vmul.f32 %v2280_v40, %v1533_v19  ;;  %v1187_v30 = vmul.f32 %v2286_v24, %v3288_v52  ;;  %v1318_v25 = vor.u32 1.1754944e-38, %v1317_v12  ;;  %v945_v15 = vmul.f32 %v3347_v42, %v735_v11  ;;  %v697_v11 = vpop.f32.mrf.mxu1 }
 0x128   : > { %v1415_v4 = vadd.f32 %v2278_v31, %v1414_v26  ;;  %v1307_v33 = vmul.f32 %v2288_v28, %v3292_v62  ;;  %v3351_v59 = vmul.f32 %v3347_v42, %v677_v60  ;;  %2295 = vrcp.f32 %v3320_v43 }
 0x129   : > { %v1535_v21 = vadd.f32 %v2280_v40, %v1534_v16  ;;  %v1188_v41 = vsub.f32 1.0, %v1187_v30  ;;  %v1860_v36 = vmul.f32 -1.442695, %v3328_v27  ;;  %v2290_v48 = vpop.eup %2289  ;;  %vm1192_vm4 = vweird.f32 %v2286_v24 }
 0x12a   : > { %v1419_v58 = vsel %vm1418_vm2, %v2278_v31, %v1415_v4  ;;  %v1308_v47 = vsub.f32 1.0, %v1307_v33  ;;  %v2292_v39 = vpop.eup %2291  ;;  %vm1312_vm5 = vweird.f32 %v2288_v28  ;;  %v1435_v63 = vand.u32 2147483647, %v3317_v20  ;;  %vm1193_vm6 = vmor %vm1191_vm13, %vm1192_vm4  ;;  %v717_v4 = vpop.f32.mrf.mxu2 }
 0x12b   : > { %v1424_v14 = vsel %vm3303_vm10, %v1423_v55, %v1419_v58  ;;  %v1539_v49 = vsel %vm1538_vm3, %v2280_v40, %v1535_v21  ;;  %v1189_v53 = vmul.f32 %v2286_v24, %v1188_v41  ;;  %v3366_v31 = vadd.f32 %v3325_v22, %v945_v15  ;;  %vm1313_vm7 = vmor %vm1311_vm14, %vm1312_vm5 }
 0x12c   : > { %v1611_v54 = vmul.f32 %v1424_v14, %v3207_v35  ;;  %v1544_v17 = vsel %vm3309_vm11, %v1543_v8, %v1539_v49  ;;  %v1309_v45 = vmul.f32 %v2288_v28, %v1308_v47  ;;  %v2294_v57 = vpop.eup %2293  ;;  %v1437_v40 = vand.u32 2147483648, %v3317_v20 }
 0x12d   : > { %v1619_v9 = vmul.f32 %v1544_v17, %v3214_v37  ;;  %v1190_v46 = vadd.f32 %v2286_v24, %v1189_v53  ;;  %v1427_v35 = vmul.f32 %v2294_v57, %v3317_v20  ;;  %v3373_v1 = vadd.f32 1.0, %v2290_v48 }
 0x12e   : > { %1643 = vst [vmem:[%s2911_s12 + $0xa0] sm:$0xff] %v1611_v54  ;;  %v1310_v0 = vadd.f32 %v2288_v28, %v1309_v45  ;;  %v1555_v37 = vand.u32 2147483647, %v3320_v43  ;;  %v1557_v55 = vand.u32 2147483648, %v3320_v43  ;;  %v3380_v56 = vadd.f32 1.0, %v2292_v39  ;;  %v2296_v52 = vpop.eup %2295 }
 0x12f   : > { %1651 = vst [vmem:[%s2911_s12 + $0xe0] sm:$0xff] %v1619_v9  ;;  %v1194_v5 = vsel %vm1193_vm6, %v2286_v24, %v1190_v46  ;;  %v1428_v8 = vsub.f32 1.0, %v1427_v35  ;;  %2297 = vrcp.f32 %v3373_v1  ;;  %vm1431_vm8 = vweird.f32 %v3317_v20 }
 0x130   : > { %v1199_v44 = vsel %vm3331_vm0, %v1198_v23, %v1194_v5  ;;  %v1314_v2 = vsel %vm1313_vm7, %v2288_v28, %v1310_v0  ;;  %v1547_v51 = vmul.f32 %v2296_v52, %v3320_v43  ;;  %vm1432_vm9 = vweird.f32 %v2294_v57 }
 0x131   : > { %v1596_v10 = vmul.f32 %v1199_v44, %v3239_v3  ;;  %v1319_v62 = vsel %vm3337_vm1, %v1318_v25, %v1314_v2  ;;  %v1429_v7 = vmul.f32 %v2294_v57, %v1428_v8  ;;  %vm1551_vm10 = vweird.f32 %v3320_v43  ;;  %vm1433_vm14 = vmor %vm1431_vm8, %vm1432_vm9  ;;  %v737_v25 = vpop.f32.mrf.mxu3 }
 0x132   : > { %v1604_v61 = vmul.f32 %v1319_v62, %v3242_v18  ;;  %vm3393_vm11 = vcmp.eq.f32.partialorder %v1435_v63, 8.507059e+37  ;;  %v1438_v6 = vor.u32 1.1754944e-38, %v1437_v40  ;;  %v1548_v3 = vsub.f32 1.0, %v1547_v51 }
 0x133   : > { %1628 = vst [vmem:[%s2911_s12 + $0x28] sm:$0xff] %v1596_v10  ;;  %2299 = vrcp.f32 %v3380_v56  ;;  %v1430_v19 = vadd.f32 %v2294_v57, %v1429_v7  ;;  %vm1552_vm12 = vweird.f32 %v2296_v52  ;;  %vm3399_vm13 = vcmp.eq.f32.partialorder %v1555_v37, 8.507059e+37 }
 0x134   : > { %1636 = vst [vmem:[%s2911_s12 + $0x68] sm:$0xff] %v1604_v61  ;;  %v1558_v18 = vor.u32 1.1754944e-38, %v1557_v55  ;;  %v1549_v24 = vmul.f32 %v2296_v52, %v1548_v3  ;;  %vm1206_vm15 = vweird.f32 %v3373_v1  ;;  %2301 = vpow2.f32 %v1860_v36  ;;  %vm1553_vm1 = vmor %vm1551_vm10, %vm1552_vm12 }
 0x135   : > { %v1868_v26 = vmul.f32 -1.442695, %v3366_v31  ;;  %v2298_v60 = vpop.eup %2297  ;;  %v1434_v28 = vsel %vm1433_vm14, %v2294_v57, %v1430_v19  ;;  %v1210_v16 = vand.u32 2147483647, %v3373_v1  ;;  %v1212_v30 = vand.u32 2147483648, %v3373_v1 }
 0x136   : > { %v3411_v50 = vadd.f32 %v3325_v22, %v3351_v59  ;;  %v1439_v20 = vsel %vm3393_vm11, %v1438_v6, %v1434_v28  ;;  %v1550_v33 = vadd.f32 %v2296_v52, %v1549_v24  ;;  %v1202_v34 = vmul.f32 %v2298_v60, %v3373_v1 }
 0x137   : > { %vm1326_vm0 = vweird.f32 %v3380_v56  ;;  %v1612_v21 = vmul.f32 %v1439_v20, %v3259_v13  ;;  %2303 = vpow2.f32 %v1868_v26  ;;  %v930_v15 = vmul.f32 %v3347_v42, %v697_v11 }
 0x138   : > { %v1845_v41 = vmul.f32 -1.442695, %v3411_v50  ;;  %v1554_v58 = vsel %vm1553_vm1, %v2296_v52, %v1550_v33  ;;  %v1203_v47 = vsub.f32 1.0, %v1202_v34  ;;  %vm1207_vm2 = vweird.f32 %v2298_v60 }
 0x139   : > { %v2300_v59 = vpop.eup %2299  ;;  %v938_v36 = vmul.f32 %v3347_v42, %v717_v4  ;;  %1644 = vst [vmem:[%s2911_s12 + $0xa8] sm:$0xff] %v1612_v21  ;;  %v1559_v13 = vsel %vm3399_vm13, %v1558_v18, %v1554_v58  ;;  %v946_v43 = vmul.f32 %v3347_v42, %v737_v25  ;;  %v3431_v39 = vadd.f32 %v3325_v22, %v930_v15  ;;  %vm1208_vm4 = vmor %vm1206_vm15, %vm1207_vm2 }
 0x13a   : > { %v1322_v48 = vmul.f32 %v2300_v59, %v3380_v56  ;;  %2305 = vpow2.f32 %v1845_v41  ;;  %v2302_v14 = vpop.eup %2301  ;;  %v1620_v49 = vmul.f32 %v1559_v13, %v3262_v32  ;;  %v1204_v53 = vmul.f32 %v2298_v60, %v1203_v47 }
 0x13b   : > { %v3434_v54 = vadd.f32 %v3325_v22, %v938_v36  ;;  %vm3436_vm3 = vcmp.eq.f32.partialorder %v1210_v16, 8.507059e+37  ;;  %v1330_v57 = vand.u32 2147483647, %v3380_v56  ;;  %v1101_v9 = vadd.f32 1.0, %v2302_v14 }
 0x13c   : > { %v1323_v45 = vsub.f32 1.0, %v1322_v48  ;;  %1652 = vst [vmem:[%s2911_s12 + $0xe8] sm:$0xff] %v1620_v49  ;;  %v1205_v42 = vadd.f32 %v2298_v60, %v1204_v53  ;;  %v1332_v46 = vand.u32 2147483648, %v3380_v56  ;;  %v1853_v32 = vmul.f32 -1.442695, %v3431_v39 }
 0x13d   : > { %v1861_v63 = vmul.f32 -1.442695, %v3434_v54  ;;  %v2304_v0 = vpop.eup %2303  ;;  %v1213_v35 = vor.u32 1.1754944e-38, %v1212_v30  ;;  %vm1327_vm5 = vweird.f32 %v2300_v59  ;;  %2307 = vrcp.f32 %v1101_v9 }
 0x13e   : > { %v1324_v40 = vmul.f32 %v2300_v59, %v1323_v45  ;;  %v1209_v5 = vsel %vm1208_vm4, %v2298_v60, %v1205_v42  ;;  %v1109_v37 = vadd.f32 1.0, %v2304_v0  ;;  %2309 = vpow2.f32 %v1853_v32  ;;  %vm1328_vm6 = vmor %vm1326_vm0, %vm1327_vm5 }
 0x13f   : > { %v3449_v55 = vadd.f32 %v3325_v22, %v946_v43  ;;  %v1214_v44 = vsel %vm3436_vm3, %v1213_v35, %v1209_v5  ;;  %2311 = vpow2.f32 %v1861_v63  ;;  %v1333_v8 = vor.u32 1.1754944e-38, %v1332_v46 }
 0x140   : > { %v2306_v52 = vpop.eup %2305  ;;  %v1325_v2 = vadd.f32 %v2300_v59, %v1324_v40  ;;  %v1597_v1 = vmul.f32 %v1214_v44, %v3280_v29  ;;  %2313 = vrcp.f32 %v1109_v37  ;;  %vm1331_vm7 = vcmp.eq.f32.partialorder %v1330_v57, 8.507059e+37 }
 0x141   : > { %v3456_v62 = vadd.f32 1.0, %v2306_v52  ;;  %v1869_v51 = vmul.f32 -1.442695, %v3449_v55  ;;  %v1450_v23 = vand.u32 2147483647, %v1101_v9  ;;  %v1452_v18 = vand.u32 2147483648, %v1101_v9 }
 0x142   : > { %v1329_v10 = vsel %vm1328_vm6, %v2300_v59, %v1325_v2  ;;  %1629 = vst [vmem:[%s2911_s12 + $0x30] sm:$0xff] %v1597_v1  ;;  %vm1446_vm9 = vweird.f32 %v1101_v9  ;;  %v1572_v16 = vand.u32 2147483648, %v1109_v37  ;;  %vm1566_vm12 = vweird.f32 %v1109_v37 }
 0x143   : > { %v1334_v22 = vsel %vm1331_vm7, %v1333_v8, %v1329_v10  ;;  %v2308_v61 = vpop.eup %2307  ;;  %2315 = vrcp.f32 %v3456_v62  ;;  %vm1451_vm10 = vcmp.eq.f32.partialorder %v1450_v23, 8.507059e+37  ;;  %v1453_v4 = vor.u32 1.1754944e-38, %v1452_v18 }
 0x144   : > { %v1605_v7 = vmul.f32 %v1334_v22, %v3284_v38  ;;  %v2310_v29 = vpop.eup %2309  ;;  %v1442_v12 = vmul.f32 %v2308_v61, %v1101_v9  ;;  %2317 = vpow2.f32 %v1869_v51  ;;  %vm1447_vm8 = vweird.f32 %v2308_v61 }
 0x145   : > { %v2312_v56 = vpop.eup %2311  ;;  %v3463_v6 = vadd.f32 1.0, %v2310_v29  ;;  %v1570_v38 = vand.u32 2147483647, %v1109_v37  ;;  %vm1448_vm11 = vmor %vm1446_vm9, %vm1447_vm8  ;;  %v1225_v25 = vand.u32 2147483647, %v3456_v62  ;;  %v1573_v13 = vor.u32 1.1754944e-38, %v1572_v16 }
 0x146   : > { %1637 = vst [vmem:[%s2911_s12 + $0x70] sm:$0xff] %v1605_v7  ;;  %v2314_v3 = vpop.eup %2313  ;;  %v1443_v19 = vsub.f32 1.0, %v1442_v12  ;;  %v3465_v24 = vadd.f32 1.0, %v2312_v56  ;;  %v1227_v48 = vand.u32 2147483648, %v3456_v62  ;;  %vm1221_vm1 = vweird.f32 %v3456_v62 }
 0x147   : > { %v1562_v26 = vmul.f32 %v2314_v3, %v1109_v37  ;;  %2319 = vrcp.f32 %v3463_v6  ;;  %vm1567_vm13 = vweird.f32 %v2314_v3  ;;  %vm3471_vm14 = vcmp.eq.f32.partialorder %v1570_v38, 8.507059e+37 }
 0x148   : > { %v1444_v11 = vmul.f32 %v2308_v61, %v1443_v19  ;;  %2321 = vrcp.f32 %v3465_v24  ;;  %vm1568_vm15 = vmor %vm1566_vm12, %vm1567_vm13  ;;  %vm3481_vm2 = vcmp.eq.f32.partialorder %v1225_v25, 8.507059e+37  ;;  %v1228_v32 = vor.u32 1.1754944e-38, %v1227_v48 }
 0x149   : > { %v2316_v60 = vpop.eup %2315  ;;  %v1563_v28 = vsub.f32 1.0, %v1562_v26  ;;  %v1345_v63 = vand.u32 2147483647, %v3463_v6  ;;  %v1347_v0 = vand.u32 2147483648, %v3463_v6  ;;  %vm1341_vm5 = vweird.f32 %v3463_v6 }
 0x14a   : > { %v1445_v30 = vadd.f32 %v2308_v61, %v1444_v11  ;;  %v1217_v20 = vmul.f32 %v2316_v60, %v3456_v62  ;;  %v2318_v33 = vpop.eup %2317  ;;  %vm1222_vm0 = vweird.f32 %v2316_v60  ;;  %v1465_v52 = vand.u32 2147483647, %v3465_v24 }
 0x14b   : > { %v1564_v34 = vmul.f32 %v2314_v3, %v1563_v28  ;;  %v3475_v59 = vadd.f32 1.0, %v2318_v33  ;;  %vm1223_vm3 = vmor %vm1221_vm1, %vm1222_vm0  ;;  %v1348_v10 = vor.u32 1.1754944e-38, %v1347_v0  ;;  %vm1461_vm8 = vweird.f32 %v3465_v24 }
 0x14c   : > { %v1449_v21 = vsel %vm1448_vm11, %v2308_v61, %v1445_v30  ;;  %v1218_v15 = vsub.f32 1.0, %v1217_v20  ;;  %vm1346_vm9 = vcmp.eq.f32.partialorder %v1345_v63, 8.507059e+37  ;;  %vm1466_vm11 = vcmp.eq.f32.partialorder %v1465_v52, 8.507059e+37 }
 0x14d   : > { %v2320_v58 = vpop.eup %2319  ;;  %v1454_v47 = vsel %vm1451_vm10, %v1453_v4, %v1449_v21  ;;  %v1565_v36 = vadd.f32 %v2314_v3, %v1564_v34  ;;  %2323 = vrcp.f32 %v3475_v59  ;;  %v1585_v23 = vand.u32 2147483647, %v3475_v59 }
 0x14e   : > { %v1613_v43 = vmul.f32 %v1454_v47, %v3328_v27  ;;  %v1219_v14 = vmul.f32 %v2316_v60, %v1218_v15  ;;  %v1337_v49 = vmul.f32 %v2320_v58, %v3463_v6  ;;  %v2322_v53 = vpop.eup %2321  ;;  %vm1342_vm4 = vweird.f32 %v2320_v58 }
 0x14f   : > { %v1569_v17 = vsel %vm1568_vm15, %v2314_v3, %v1565_v36  ;;  %v1457_v42 = vmul.f32 %v2322_v53, %v3465_v24  ;;  %vm1462_vm6 = vweird.f32 %v2322_v53  ;;  %vm1343_vm7 = vmor %vm1341_vm5, %vm1342_vm4  ;;  %v1587_v6 = vand.u32 2147483648, %v3475_v59 }
 0x150   : > { %1645 = vst [vmem:[%s2911_s12 + $0xb0] sm:$0xff] %v1613_v43  ;;  %v1574_v27 = vsel %vm3471_vm14, %v1573_v13, %v1569_v17  ;;  %v1220_v57 = vadd.f32 %v2316_v60, %v1219_v14  ;;  %v1338_v9 = vsub.f32 1.0, %v1337_v49  ;;  %vm1463_vm10 = vmor %vm1461_vm8, %vm1462_vm6  ;;  %vm1581_vm13 = vweird.f32 %v3475_v59 }
 0x151   : > { %v1621_v46 = vmul.f32 %v1574_v27, %v3366_v31  ;;  %v1458_v5 = vsub.f32 1.0, %v1457_v42  ;;  %v1467_v31 = vand.u32 2147483648, %v3465_v24  ;;  %vm1586_vm15 = vcmp.eq.f32.partialorder %v1585_v23, 8.507059e+37 }
 0x152   : > { %v1224_v35 = vsel %vm1223_vm3, %v2316_v60, %v1220_v57  ;;  %v1339_v40 = vmul.f32 %v2320_v58, %v1338_v9 }
 0x153   : > { %1653 = vst [vmem:[%s2911_s12 + $0xf0] sm:$0xff] %v1621_v46  ;;  %v1229_v37 = vsel %vm3481_vm2, %v1228_v32, %v1224_v35  ;;  %v1459_v1 = vmul.f32 %v2322_v53, %v1458_v5  ;;  %v2324_v8 = vpop.eup %2323  ;;  %v1468_v7 = vor.u32 1.1754944e-38, %v1467_v31 }
 0x154   : > { %v1598_v44 = vmul.f32 %v1229_v37, %v3411_v50  ;;  %v1340_v2 = vadd.f32 %v2320_v58, %v1339_v40  ;;  %v1577_v51 = vmul.f32 %v2324_v8, %v3475_v59  ;;  %vm1582_vm12 = vweird.f32 %v2324_v8 }
 0x155   : > { %v1460_v22 = vadd.f32 %v2322_v53, %v1459_v1  ;;  %vm1583_vm14 = vmor %vm1581_vm13, %vm1582_vm12 }
 0x156   : > { %1630 = vst [vmem:[%s2911_s12 + $0x38] sm:$0xff] %v1598_v44  ;;  %v1344_v62 = vsel %vm1343_vm7, %v2320_v58, %v1340_v2  ;;  %v1578_v12 = vsub.f32 1.0, %v1577_v51 }
 0x157   : > { %v1349_v61 = vsel %vm1346_vm9, %v1348_v10, %v1344_v62  ;;  %v1464_v29 = vsel %vm1463_vm10, %v2322_v53, %v1460_v22 }
 0x158   : > { %v1606_v50 = vmul.f32 %v1349_v61, %v3431_v39  ;;  %v1469_v56 = vsel %vm1466_vm11, %v1468_v7, %v1464_v29  ;;  %v1579_v19 = vmul.f32 %v2324_v8, %v1578_v12  ;;  %v1588_v39 = vor.u32 1.1754944e-38, %v1587_v6 }
 0x159   : > { %v1614_v3 = vmul.f32 %v1469_v56, %v3434_v54 }
 0x15a   : > { %1638 = vst [vmem:[%s2911_s12 + $0x78] sm:$0xff] %v1606_v50  ;;  %v1580_v18 = vadd.f32 %v2324_v8, %v1579_v19 }
 0x15b   : > { %1646 = vst [vmem:[%s2911_s12 + $0xb8] sm:$0xff] %v1614_v3 }
 0x15c   : > { %v1584_v24 = vsel %vm1583_vm14, %v2324_v8, %v1580_v18 }
 0x15d   : > { %v1589_v26 = vsel %vm1586_vm15, %v1588_v39, %v1584_v24 }
 0x15e   : > { %v1622_v11 = vmul.f32 %v1589_v26, %v3449_v55 }
 0x160   : > { %1654 = vst [vmem:[%s2911_s12 + $0xf8] sm:$0xff] %v1622_v11 }
 0x161 PF: > { %s16_s20 = sadd.s32 1, %s2368_s20   ;;  %s3631_s18 = smov %s2364_s19 }
 0x162   : > { %p13_p8 = scmp.ge.s32.totalorder %s16_s20, 4   ;;  %s3632_s19 = smov %s3634_s22 }
 0x164   :  { %15 = sbr.rel (!%p13_p8) target bundleno = 2 (0x2), region = 96 }
 0x169   :  { %1683 = vsyncpa [#allocation3], 1 }
 0x16a   :  { %1685 = vsyncpa [#allocation3 + $0x1], 1 }

// kernel: quant_model_forward.5
= control target key start
LH: loop header
LB: loop body
LE: loop exit
PB: predicated region body
PF: predicated region fallthrough
CT: control target
= control target key end

     0   :  { %10 = vsyncpa [#allocation3], 0  ;;  %s248_s21 = smov [#allocation2]   ;;  %s318_s0 = inlined_call_operand.vmem [shape: f32[4], index: 0, kind: input, shape index: {}]   ;;  %s319_s1 = inlined_call_operand.vmem [shape: f32[8,128], index: 1, kind: input, shape index: {}]   ;;  %s320_s2 = inlined_call_operand.vmem [shape: bf16[128,128], index: 2, kind: input, shape index: {}]   ;;  %s321_s3 = inlined_call_operand.vmem [shape: f32[1,128], index: 3, kind: input, shape index: {}]   ;;  %s322_s4 = inlined_call_operand.vmem [shape: f32[1,128], index: 4, kind: input, shape index: {}]   ;;  %s323_s5 = inlined_call_operand.vmem [shape: f32[8,128], index: 5, kind: output, shape index: {}]  }
   0x1   :  { %s16_s20 = sshll.u32 %s318_s0, 4  ;;  %s17_s20 = int_to_ptr.vmem [resolvable:$true] %s16_s20 }
   0x2   :  { %19 = dma.vmem_to_smem %s17_s20, 16, %s248_s21, [#allocation3]  }
   0x3   :  { %246 = dma.done.wait [#allocation3], 16  }
   0x4   :  { %247 = vsyncadd [#allocation3], 4294967280 }
   0x5   :  { %32 = sfence }
   0x6   :  { %v218_v0 = vld [vmem:[%s320_s2 + $0x38] sm:$0xff]  ;;  %s33_s24 = sld [smem:[#allocation2]]  ;;  %v217_v1 = vld [vmem:[%s320_s2 + $0x30] sm:$0xff]  ;;  %v36_v2 = vld [vmem:[%s319_s1] sm:$0xff] }
   0x7   :  { %111 = vmatpush.bf16.msra.mxu0 %v218_v0  ;;  %v216_v3 = vld [vmem:[%s320_s2 + $0x28] sm:$0xff]  ;;  %s176_s30 = sld [smem:[#allocation2 + $0x1]]  ;;  %v215_v7 = vld [vmem:[%s320_s2 + $0x20] sm:$0xff]  ;;  %v214_v12 = vld [vmem:[%s320_s2 + $0x18] sm:$0xff] }
   0x8   :  { %s177_s8 = sld [smem:[#allocation2 + $0x2]]  ;;  %v213_v16 = vld [vmem:[%s320_s2 + $0x10] sm:$0xff]  ;;  %v212_v20 = vld [vmem:[%s320_s2 + $0x8] sm:$0xff]  ;;  %v211_v23 = vld [vmem:[%s320_s2] sm:$0xff] }
   0x9   :  { %v228_v25 = vld [vmem:[%s321_s3] ss:$0 sm:$0xff] }
   0xa   :  { %v229_v26 = vld [vmem:[%s322_s4] ss:$0 sm:$0xff] }
   0xb   :  { %112 = vmatpush.bf16.msra.mxu0 %v217_v1 }
   0xc   :  { %v37_v4 = vstv %s33_s24 }
   0xd   :  { %v38_v5 = vmul.f32 %v37_v4, %v36_v2  ;;  %v40_v14 = vstv %s176_s30 }
   0xe   :  { %v43_v18 = vstv %s177_s8 }
   0xf   :  { %v221_v6 = vcvt.f32.s32 %v38_v5  ;;  %113 = vmatpush.bf16.msra.mxu0 %v216_v3  ;;  %v219_v8 = vand.u32 2147483647, %v38_v5  ;;  %v224_v10 = vand.u32 2147483648, %v38_v5 }
  0x11   :  { %v222_v9 = vcvt.s32.f32 %v221_v6  ;;  %vm220_vm0 = vcmp.lt.f32.partialorder %v219_v8, 8388608.0 }
  0x13   :  { %v223_v11 = vand.u32 2147483647, %v222_v9  ;;  %114 = vmatpush.bf16.msra.mxu0 %v215_v7 }
  0x15   :  { %v225_v13 = vor.u32 %v224_v10, %v223_v11 }
  0x17   :  { %v226_v15 = vsel %vm220_vm0, %v225_v13, %v38_v5  ;;  %115 = vmatpush.bf16.msra.mxu0 %v214_v12 }
  0x18   :  { %v41_v17 = vadd.f32 %v226_v15, %v40_v14 }
  0x1a   :  { %v42_v19 = vmax.f32 %v41_v17, 0.0 }
  0x1b   :  { %116 = vmatpush.bf16.msra.mxu0 %v213_v16 }
  0x1c   :  { %v44_v21 = vmin.f32 %v43_v18, %v42_v19 }
  0x1e   :  { %v45_v22 = vsub.f32 %v44_v21, %v40_v14 }
  0x1f   :  { %117 = vmatpush.bf16.msra.mxu0 %v212_v20 }
  0x20   :  { %v46_v24 = vpack.c.bf16 %v45_v22, %v45_v22 }
  0x23   :  { %118 = vmatpush.bf16.msra.mxu0 %v211_v23 }
  0x26   :  { %119 = vmatmul.bf16.vlgmr.msra.gmra.mxu0 %v46_v24 }
  0xa3   :  { %v120_v27 = vpop.f32.mrf.mxu0 }
  0xa4   :  { %v144_v28 = vmul.f32 %v228_v25, %v120_v27 }
  0xa6   :  { %v149_v29 = vadd.f32 %v229_v26, %v144_v28 }
  0xa8   :  { %v210_v30 = vmul.f32 -1.442695, %v149_v29 }
  0xaa   :  { %230 = vpow2.f32 %v210_v30 }
  0xab   :  { %v122_v31 = vpop.f32.mrf.mxu0 }
  0xb0   :  { %v231_v32 = vpop.eup %230 }
  0xb1   :  { %v153_v33 = vadd.f32 1.0, %v231_v32 }
  0xb3   :  { %232 = vrcp.f32 %v153_v33  ;;  %v165_v37 = vand.u32 2147483648, %v153_v33  ;;  %v163_v39 = vand.u32 2147483647, %v153_v33  ;;  %vm159_vm2 = vweird.f32 %v153_v33 }
  0xb5   :  { %v166_v41 = vor.u32 1.1754944e-38, %v165_v37  ;;  %vm164_vm4 = vcmp.eq.f32.partialorder %v163_v39, 8.507059e+37 }
  0xb9   :  { %v233_v34 = vpop.eup %232 }
  0xba   :  { %v155_v35 = vmul.f32 %v233_v34, %v153_v33  ;;  %vm160_vm1 = vweird.f32 %v233_v34 }
  0xbb   :  { %vm161_vm3 = vmor %vm159_vm2, %vm160_vm1 }
  0xbc   :  { %v156_v36 = vsub.f32 1.0, %v155_v35 }
  0xbe   :  { %v157_v38 = vmul.f32 %v233_v34, %v156_v36 }
  0xc0   :  { %v158_v40 = vadd.f32 %v233_v34, %v157_v38 }
  0xc2   :  { %v162_v42 = vsel %vm161_vm3, %v233_v34, %v158_v40 }
  0xc3   :  { %v167_v43 = vsel %vm164_vm4, %v166_v41, %v162_v42 }
  0xc4   :  { %v169_v44 = vmul.f32 %v167_v43, %v149_v29 }
  0xc6   :  { %170 = vst [vmem:[%s323_s5] sm:$0xff] %v169_v44 }
  0xc7   :  { %175 = vsyncpa [#allocation3], 1 }

// kernel: quant_model_forward.6
= control target key start
LH: loop header
LB: loop body
LE: loop exit
PB: predicated region body
PF: predicated region fallthrough
CT: control target
= control target key end

     0   :  { %10 = vsyncpa [#allocation3], 0  ;;  %s223_s21 = smov [#allocation2]   ;;  %s293_s0 = inlined_call_operand.vmem [shape: f32[4], index: 0, kind: input, shape index: {}]   ;;  %s294_s1 = inlined_call_operand.vmem [shape: f32[8,128], index: 1, kind: input, shape index: {}]   ;;  %s295_s2 = inlined_call_operand.vmem [shape: bf16[128,128], index: 2, kind: input, shape index: {}]   ;;  %s296_s3 = inlined_call_operand.vmem [shape: f32[1,128], index: 3, kind: input, shape index: {}]   ;;  %s297_s4 = inlined_call_operand.vmem [shape: f32[1,128], index: 4, kind: input, shape index: {}]   ;;  %s298_s5 = inlined_call_operand.vmem [shape: f32[8,128], index: 5, kind: output, shape index: {}]  }
   0x1   :  { %s16_s20 = sshll.u32 %s293_s0, 4  ;;  %s17_s20 = int_to_ptr.vmem [resolvable:$true] %s16_s20 }
   0x2   :  { %19 = dma.vmem_to_smem %s17_s20, 16, %s223_s21, [#allocation3]  }
   0x3   :  { %221 = dma.done.wait [#allocation3], 16  }
   0x4   :  { %222 = vsyncadd [#allocation3], 4294967280 }
   0x5   :  { %32 = sfence }
   0x6   :  { %v197_v0 = vld [vmem:[%s295_s2 + $0x38] sm:$0xff]  ;;  %s33_s24 = sld [smem:[#allocation2]]  ;;  %v196_v1 = vld [vmem:[%s295_s2 + $0x30] sm:$0xff]  ;;  %v36_v2 = vld [vmem:[%s294_s1] sm:$0xff] }
   0x7   :  { %111 = vmatpush.bf16.msra.mxu0 %v197_v0  ;;  %v195_v3 = vld [vmem:[%s295_s2 + $0x28] sm:$0xff]  ;;  %s156_s30 = sld [smem:[#allocation2 + $0x1]]  ;;  %v194_v7 = vld [vmem:[%s295_s2 + $0x20] sm:$0xff]  ;;  %v193_v12 = vld [vmem:[%s295_s2 + $0x18] sm:$0xff] }
   0x8   :  { %s157_s8 = sld [smem:[#allocation2 + $0x2]]  ;;  %v192_v16 = vld [vmem:[%s295_s2 + $0x10] sm:$0xff]  ;;  %v191_v20 = vld [vmem:[%s295_s2 + $0x8] sm:$0xff]  ;;  %v190_v23 = vld [vmem:[%s295_s2] sm:$0xff] }
   0x9   :  { %v207_v25 = vld [vmem:[%s296_s3] ss:$0 sm:$0xff] }
   0xa   :  { %v208_v26 = vld [vmem:[%s297_s4] ss:$0 sm:$0xff] }
   0xb   :  { %112 = vmatpush.bf16.msra.mxu0 %v196_v1 }
   0xc   :  { %v37_v4 = vstv %s33_s24 }
   0xd   :  { %v38_v5 = vmul.f32 %v37_v4, %v36_v2  ;;  %v40_v14 = vstv %s156_s30 }
   0xe   :  { %v43_v18 = vstv %s157_s8 }
   0xf   :  { %v200_v6 = vcvt.f32.s32 %v38_v5  ;;  %113 = vmatpush.bf16.msra.mxu0 %v195_v3  ;;  %v198_v8 = vand.u32 2147483647, %v38_v5  ;;  %v203_v10 = vand.u32 2147483648, %v38_v5 }
  0x11   :  { %v201_v9 = vcvt.s32.f32 %v200_v6  ;;  %vm199_vm0 = vcmp.lt.f32.partialorder %v198_v8, 8388608.0 }
  0x13   :  { %v202_v11 = vand.u32 2147483647, %v201_v9  ;;  %114 = vmatpush.bf16.msra.mxu0 %v194_v7 }
  0x15   :  { %v204_v13 = vor.u32 %v203_v10, %v202_v11 }
  0x17   :  { %v205_v15 = vsel %vm199_vm0, %v204_v13, %v38_v5  ;;  %115 = vmatpush.bf16.msra.mxu0 %v193_v12 }
  0x18   :  { %v41_v17 = vadd.f32 %v205_v15, %v40_v14 }
  0x1a   :  { %v42_v19 = vmax.f32 %v41_v17, 0.0 }
  0x1b   :  { %116 = vmatpush.bf16.msra.mxu0 %v192_v16 }
  0x1c   :  { %v44_v21 = vmin.f32 %v43_v18, %v42_v19 }
  0x1e   :  { %v45_v22 = vsub.f32 %v44_v21, %v40_v14 }
  0x1f   :  { %117 = vmatpush.bf16.msra.mxu0 %v191_v20 }
  0x20   :  { %v46_v24 = vpack.c.bf16 %v45_v22, %v45_v22 }
  0x23   :  { %118 = vmatpush.bf16.msra.mxu0 %v190_v23 }
  0x26   :  { %119 = vmatmul.bf16.vlgmr.msra.gmra.mxu0 %v46_v24 }
  0xa3   :  { %v120_v27 = vpop.f32.mrf.mxu0 }
  0xa4   :  { %v144_v28 = vmul.f32 %v207_v25, %v120_v27 }
  0xa6   :  { %v149_v29 = vadd.f32 %v208_v26, %v144_v28 }
  0xa8   :  { %150 = vst [vmem:[%s298_s5] sm:$0xff] %v149_v29 }
  0xab   :  { %v122_v30 = vpop.f32.mrf.mxu0 }
  0xac   :  { %155 = vsyncpa [#allocation3], 1 }

// kernel: quant_model_forward.9
= control target key start
LH: loop header
LB: loop body
LE: loop exit
PB: predicated region body
PF: predicated region fallthrough
CT: control target
= control target key end

     0   :  { %10 = vsyncpa [#allocation3], 0  ;;  %s2991_s18 = smov 0   ;;  %s2993_s19 = smov 0   ;;  %s4560_s0 = inlined_call_operand.vmem [shape: f32[4], index: 0, kind: input, shape index: {}]   ;;  %s4561_s1 = inlined_call_operand.vmem [shape: f32[512,384], index: 1, kind: input, shape index: {}]   ;;  %s4562_s2 = inlined_call_operand.vmem [shape: bf16[384,128], index: 2, kind: input, shape index: {}]   ;;  %s4563_s3 = inlined_call_operand.vmem [shape: f32[1,128], index: 3, kind: input, shape index: {}]   ;;  %s4564_s4 = inlined_call_operand.vmem [shape: f32[1,128], index: 4, kind: input, shape index: {}]   ;;  %s4565_s5 = inlined_call_operand.vmem [shape: f32[512,128], index: 5, kind: output, shape index: {}]  }
   0x1   :  { %s2995_s20 = smov 0  }
   0x2 LB: > { %s1947_s21 = sadd.s32 4294967295, %s2958_s20   ;;  %s35_s22 = sadd.s32 1, %s2954_s19  ;;  %s2958_s20 = sphi %s2995_s20, %s16_s20   ;;  %s2954_s19 = sphi %s2993_s19, %s4757_s19   ;;  %s2950_s18 = sphi %s2991_s18, %s4756_s18  }
   0x3   : > { %p37_p0 = scmp.ge.s32.totalorder %s35_s22, 2  ;;  %p1949_p1 = scmp.ge.s32.totalorder %s2958_s20, 1 }
   0x4   : > { %p197_p2 = scmp.lt.s32.totalorder %s2958_s20, 3  ;;  %p2886_p4 = scmp.eq.s32.totalorder %s1947_s21, 0 }
   0x5   : > { %s4759_s22 = smov (%p37_p0, %s35_s22), 0  ;;  %s209_s25 = sshll.u32 %s4560_s0, 4  ;;  %s210_s25 = int_to_ptr.vmem [resolvable:$true] %s209_s25 }
   0x6   : > { %p198_p3 = pnand %p1949_p1, %p197_p2  ;;  %s2960_s26 = smov [#allocation2]  }
   0x8   : > { %p2882_p5 = pneg %p198_p3  ;;  %261 = sbr.rel (%p198_p3) target bundleno = 513 (0x201), region = 40 }
   0xa   : > { %p2883_p6 = pnand %p2886_p4, %p2882_p5 }
   0xc   : > { %2885 = dma.vmem_to_smem (!%p2883_p6), %s210_s25, 16, %s2960_s26, [#allocation3]  }
   0xd   : > { %2945 = dma.done.wait (%p2886_p4), [#allocation3], 16  }
   0xe   : > { %2947 = vsyncadd (%p2886_p4), [#allocation3], 4294967280 }
   0xf   : > { %268 = sfence }
  0x10   : > { %v2068_v0 = vld [vmem:[%s4562_s2 + $0x38] sm:$0xff]  ;;  %s1957_s8 = sshll.u32 %s2950_s18, 5  ;;  %s349_s9 = sld [smem:[#allocation2]]  ;;  %v2067_v3 = vld [vmem:[%s4562_s2 + $0x30] sm:$0xff]  ;;  %v2066_v6 = vld [vmem:[%s4562_s2 + $0x28] sm:$0xff] }
  0x11   : > { %v3021_v1 = vld [vmem:[%s4562_s2 + $0x78] sm:$0xff]  ;;  %p315_p7 = scmp.lt.s32.totalorder %s1957_s8, 63  ;;  %s1961_s10 = sld [smem:[#allocation2 + $0x1]]  ;;  %1267 = vmatpush.bf16.msra.mxu0 %v2068_v0  ;;  %2085 = vmatpush.bf16.msra.mxu3 %v2068_v0  ;;  %v3039_v4 = vld [vmem:[%s4562_s2 + $0x70] sm:$0xff]  ;;  %v3059_v8 = vld [vmem:[%s4562_s2 + $0x68] sm:$0xff] }
  0x12   : > { %v3026_v2 = vld [vmem:[%s4562_s2 + $0xb8] sm:$0xff]  ;;  %s3032_s13 = sld [smem:[#allocation2 + $0x2]]  ;;  %1356 = vmatpush.bf16.msra.mxu1 %v3021_v1  ;;  %v3044_v5 = vld [vmem:[%s4562_s2 + $0xb0] sm:$0xff]  ;;  %v3064_v9 = vld [vmem:[%s4562_s2 + $0xa8] sm:$0xff] }
  0x13   : > { %1445 = vmatpush.bf16.msra.mxu2 %v3026_v2  ;;  %s4761_s8 = smov (!%p315_p7, %s1957_s8), 63  ;;  %v2065_v20 = vld [vmem:[%s4562_s2 + $0x20] sm:$0xff]  ;;  %v2064_v35 = vld [vmem:[%s4562_s2 + $0x18] sm:$0xff]  ;;  %v2063_v58 = vld [vmem:[%s4562_s2 + $0x10] sm:$0xff] }
  0x14   : > { %s2109_s18 = smul.u32 24, %s4761_s8  ;;  %v3094_v21 = vld [vmem:[%s4562_s2 + $0x60] sm:$0xff]  ;;  %v3138_v40 = vld [vmem:[%s4562_s2 + $0x58] sm:$0xff]  ;;  %v3174_v63 = vld [vmem:[%s4562_s2 + $0x50] sm:$0xff]  ;;  %s1960_s21 = sshll.u32 %s4761_s8, 3 }
  0x15   : > { %1268 = vmatpush.bf16.msra.mxu0 %v2067_v3  ;;  %2086 = vmatpush.bf16.msra.mxu3 %v2067_v3  ;;  %v3113_v26 = vld [vmem:[%s4562_s2 + $0xa0] sm:$0xff]  ;;  %v3150_v45 = vld [vmem:[%s4562_s2 + $0x98] sm:$0xff]  ;;  %v3179_v0 = vld [vmem:[%s4562_s2 + $0x90] sm:$0xff]  ;;  %s4069_s26 = scalar_lea.vmem %s4565_s5, %s1960_s21 }
  0x16   : > { %v3052_v7 = vstv %s349_s9  ;;  %1357 = vmatpush.bf16.msra.mxu1 %v3039_v4  ;;  %s3069_s30 = scalar_lea.vmem %s4561_s1, %s2109_s18 }
  0x17   : > { %1446 = vmatpush.bf16.msra.mxu2 %v3044_v5  ;;  %v352_v10 = vld [vmem:[%s3069_s30] sm:$0xff]  ;;  %v355_v11 = vld [vmem:[%s3069_s30 + $0x18] sm:$0xff]  ;;  %v3080_v15 = vstv %s1961_s10  ;;  %v353_v18 = vld [vmem:[%s3069_s30 + $0x8] sm:$0xff] }
  0x18   : > { %v424_v12 = vld [vmem:[%s3069_s30 + $0x240] sm:$0xff]  ;;  %v3075_v13 = vmul.f32 %v3052_v7, %v352_v10  ;;  %v3078_v14 = vmul.f32 %v3052_v7, %v355_v11  ;;  %v427_v16 = vld [vmem:[%s3069_s30 + $0x258] sm:$0xff]  ;;  %v3097_v22 = vstv %s3032_s13  ;;  %v3103_v24 = vmul.f32 %v3052_v7, %v353_v18 }
  0x19   : > { %v3084_v17 = vmul.f32 %v3052_v7, %v424_v12  ;;  %v356_v19 = vld [vmem:[%s3069_s30 + $0x20] sm:$0xff]  ;;  %1269 = vmatpush.bf16.msra.mxu0 %v2066_v6  ;;  %2087 = vmatpush.bf16.msra.mxu3 %v2066_v6  ;;  %v3100_v23 = vmul.f32 %v3052_v7, %v427_v16  ;;  %v354_v12 = vld [vmem:[%s3069_s30 + $0x10] sm:$0xff] }
  0x1a   : > { %v3106_v25 = vmul.f32 %v3052_v7, %v356_v19  ;;  %1358 = vmatpush.bf16.msra.mxu1 %v3059_v8  ;;  %v2110_v27 = vand.u32 2147483647, %v3075_v13  ;;  %v2112_v28 = vcvt.f32.s32 %v3075_v13  ;;  %v2115_v29 = vand.u32 2147483648, %v3075_v13 }
  0x1b   : > { %1447 = vmatpush.bf16.msra.mxu2 %v3064_v9  ;;  %v2134_v30 = vand.u32 2147483647, %v3078_v14  ;;  %v2136_v31 = vcvt.f32.s32 %v3078_v14  ;;  %v2139_v32 = vand.u32 2147483648, %v3078_v14  ;;  %v2686_v33 = vand.u32 2147483647, %v3084_v17 }
  0x1c   : > { %v2688_v34 = vcvt.f32.s32 %v3084_v17  ;;  %vm3126_vm0 = vcmp.lt.f32.partialorder %v2110_v27, 8388608.0  ;;  %v2113_v37 = vcvt.s32.f32 %v2112_v28  ;;  %v2691_v39 = vand.u32 2147483648, %v3084_v17  ;;  %v357_v27 = vld [vmem:[%s3069_s30 + $0x28] sm:$0xff] }
  0x1d   : > { %vm3130_vm1 = vcmp.lt.f32.partialorder %v2134_v30, 8388608.0  ;;  %1270 = vmatpush.bf16.msra.mxu0 %v2065_v20  ;;  %2088 = vmatpush.bf16.msra.mxu3 %v2065_v20  ;;  %v2137_v41 = vcvt.s32.f32 %v2136_v31  ;;  %vm3140_vm2 = vcmp.lt.f32.partialorder %v2686_v33, 8388608.0  ;;  %v2710_v44 = vand.u32 2147483647, %v3100_v23 }
  0x1e   : > { %v2689_v43 = vcvt.s32.f32 %v2688_v34  ;;  %1359 = vmatpush.bf16.msra.mxu1 %v3094_v21  ;;  %v2114_v46 = vand.u32 2147483647, %v2113_v37  ;;  %v2712_v47 = vcvt.f32.s32 %v3100_v23  ;;  %v2715_v48 = vand.u32 2147483648, %v3100_v23  ;;  %v3212_v34 = vld [vmem:[%s4562_s2 + $0x48] sm:$0xff] }
  0x1f   : > { %1448 = vmatpush.bf16.msra.mxu2 %v3113_v26  ;;  %v2118_v49 = vand.u32 2147483647, %v3103_v24  ;;  %v2138_v50 = vand.u32 2147483647, %v2137_v41  ;;  %vm3155_vm3 = vcmp.lt.f32.partialorder %v2710_v44, 8388608.0  ;;  %v2120_v53 = vcvt.f32.s32 %v3103_v24 }
  0x20   : > { %v2690_v51 = vand.u32 2147483647, %v2689_v43  ;;  %v2116_v54 = vor.u32 %v2115_v29, %v2114_v46  ;;  %v2713_v55 = vcvt.s32.f32 %v2712_v47  ;;  %v2123_v57 = vand.u32 2147483648, %v3103_v24 }
  0x21   : > { %vm3160_vm4 = vcmp.lt.f32.partialorder %v2118_v49, 8388608.0  ;;  %1271 = vmatpush.bf16.msra.mxu0 %v2064_v35  ;;  %2089 = vmatpush.bf16.msra.mxu3 %v2064_v35  ;;  %v2140_v59 = vor.u32 %v2139_v32, %v2138_v50  ;;  %v2121_v61 = vcvt.s32.f32 %v2120_v53  ;;  %v2142_v62 = vand.u32 2147483647, %v3106_v25  ;;  %v3217_v35 = vld [vmem:[%s4562_s2 + $0x88] sm:$0xff]  ;;  %v2061_v49 = vld [vmem:[%s4562_s2] sm:$0xff] }
  0x22   : > { %v2692_v60 = vor.u32 %v2691_v39, %v2690_v51  ;;  %1360 = vmatpush.bf16.msra.mxu1 %v3138_v40  ;;  %v2117_v3 = vsel %vm3126_vm0, %v2116_v54, %v3075_v13  ;;  %v2714_v6 = vand.u32 2147483647, %v2713_v55  ;;  %v2144_v10 = vcvt.f32.s32 %v3106_v25  ;;  %v3244_v53 = vld [vmem:[%s4562_s2 + $0x40] sm:$0xff] }
  0x23   : > { %1449 = vmatpush.bf16.msra.mxu2 %v3150_v45  ;;  %v2147_v11 = vand.u32 2147483648, %v3106_v25  ;;  %v2141_v16 = vsel %vm3130_vm1, %v2140_v59, %v3078_v14  ;;  %v642_v18 = vadd.f32 %v2117_v3, %v3080_v15  ;;  %v2122_v20 = vand.u32 2147483647, %v2121_v61  ;;  %v2062_v14 = vld [vmem:[%s4562_s2 + $0x8] sm:$0xff]  ;;  %v3249_v54 = vld [vmem:[%s4562_s2 + $0x80] sm:$0xff]  ;;  %v358_v3 = vld [vmem:[%s3069_s30 + $0x30] sm:$0xff] }
  0x24   : > { %v2693_v19 = vsel %vm3140_vm2, %v2692_v60, %v3084_v17  ;;  %v645_v13 = vadd.f32 %v2141_v16, %v3080_v15  ;;  %v2716_v28 = vor.u32 %v2715_v48, %v2714_v6  ;;  %vm3197_vm5 = vcmp.lt.f32.partialorder %v2142_v62, 8388608.0  ;;  %v361_v16 = vld [vmem:[%s3069_s30 + $0x48] sm:$0xff] }
  0x25   : > { %v714_v29 = vadd.f32 %v2693_v19, %v3080_v15  ;;  %1272 = vmatpush.bf16.msra.mxu0 %v2063_v58  ;;  %2090 = vmatpush.bf16.msra.mxu3 %v2063_v58  ;;  %v738_v31 = vmax.f32 %v642_v18, 0.0  ;;  %v2124_v32 = vor.u32 %v2123_v57, %v2122_v20  ;;  %v2145_v17 = vcvt.s32.f32 %v2144_v10 }
  0x26   : > { %v3205_v33 = vmul.f32 %v3052_v7, %v354_v12  ;;  %1361 = vmatpush.bf16.msra.mxu1 %v3174_v63  ;;  %v741_v36 = vmax.f32 %v645_v13, 0.0  ;;  %v2717_v37 = vsel %vm3155_vm3, %v2716_v28, %v3100_v23  ;;  %v3223_v39 = vmul.f32 %v3052_v7, %v357_v27 }
  0x27   : > { %1450 = vmatpush.bf16.msra.mxu2 %v3179_v0  ;;  %v810_v38 = vmax.f32 %v714_v29, 0.0  ;;  %v835_v41 = vmin.f32 %v3097_v22, %v738_v31  ;;  %v717_v42 = vadd.f32 %v2717_v37, %v3080_v15  ;;  %v2125_v43 = vsel %vm3160_vm4, %v2124_v32, %v3103_v24 }
  0x28   : > { %v2146_v44 = vand.u32 2147483647, %v2145_v17  ;;  %v838_v46 = vmin.f32 %v3097_v22, %v741_v36  ;;  %v643_v48 = vadd.f32 %v2125_v43, %v3080_v15  ;;  %v2126_v23 = vand.u32 2147483647, %v3205_v33 }
  0x29   : > { %v907_v47 = vmin.f32 %v3097_v22, %v810_v38  ;;  %1273 = vmatpush.bf16.msra.mxu0 %v2062_v14  ;;  %2091 = vmatpush.bf16.msra.mxu3 %v2062_v14  ;;  %v931_v50 = vsub.f32 %v835_v41, %v3080_v15  ;;  %v813_v51 = vmax.f32 %v717_v42, 0.0  ;;  %v2128_v52 = vcvt.f32.s32 %v3205_v33 }
  0x2a   : > { %v2148_v24 = vor.u32 %v2147_v11, %v2146_v44  ;;  %1362 = vmatpush.bf16.msra.mxu1 %v3212_v34  ;;  %v934_v55 = vsub.f32 %v838_v46, %v3080_v15  ;;  %v739_v57 = vmax.f32 %v643_v48, 0.0  ;;  %vm3253_vm6 = vcmp.lt.f32.partialorder %v2126_v23, 8388608.0  ;;  %v430_v44 = vld [vmem:[%s3069_s30 + $0x270] sm:$0xff] }
  0x2b   : > { %1451 = vmatpush.bf16.msra.mxu2 %v3217_v35  ;;  %v1003_v56 = vsub.f32 %v907_v47, %v3080_v15  ;;  %v910_v59 = vmin.f32 %v3097_v22, %v813_v51  ;;  %v2129_v61 = vcvt.s32.f32 %v2128_v52  ;;  %v2131_v62 = vand.u32 2147483648, %v3205_v33 }
  0x2c   : > { %v2149_v60 = vsel %vm3197_vm5, %v2148_v24, %v3106_v25  ;;  %v1027_v6 = vpack.c.bf16 %v934_v55, %v931_v50  ;;  %v836_v11 = vmin.f32 %v3097_v22, %v739_v57  ;;  %v2150_v12 = vand.u32 2147483647, %v3223_v39  ;;  %v359_v50 = vld [vmem:[%s3069_s30 + $0x38] sm:$0xff] }
  0x2d   : > { %v646_v10 = vadd.f32 %v2149_v60, %v3080_v15  ;;  %1274 = vmatpush.bf16.msra.mxu0 %v2061_v49  ;;  %2092 = vmatpush.bf16.msra.mxu3 %v2061_v49  ;;  %v1006_v18 = vsub.f32 %v910_v59, %v3080_v15  ;;  %v2130_v19 = vand.u32 2147483647, %v2129_v61  ;;  %v2152_v20 = vcvt.f32.s32 %v3223_v39  ;;  %v433_v49 = vld [vmem:[%s3069_s30 + $0x288] sm:$0xff] }
  0x2e   : > { %v2155_v25 = vand.u32 2147483648, %v3223_v39  ;;  %1363 = vmatpush.bf16.msra.mxu1 %v3244_v53  ;;  %v932_v13 = vsub.f32 %v836_v11, %v3080_v15  ;;  %vm3273_vm7 = vcmp.lt.f32.partialorder %v2150_v12, 8388608.0  ;;  %v455_v29 = vmul.f32 %v3052_v7, %v358_v3 }
  0x2f   : > { %1452 = vmatpush.bf16.msra.mxu2 %v3249_v54  ;;  %v742_v27 = vmax.f32 %v646_v10, 0.0  ;;  %v1063_v30 = vpack.c.bf16 %v1006_v18, %v1003_v56  ;;  %v2132_v14 = vor.u32 %v2131_v62, %v2130_v19  ;;  %v2153_v31 = vcvt.s32.f32 %v2152_v20 }
  0x30   : > { %v458_v32 = vmul.f32 %v3052_v7, %v361_v16  ;;  %1275 = vmatmul.bf16.vlgmr.msra.gmra.mxu0 %v1027_v6  ;;  %v2158_v36 = vand.u32 2147483647, %v455_v29  ;;  %v2160_v37 = vcvt.f32.s32 %v455_v29  ;;  %v2163_v38 = vand.u32 2147483648, %v455_v29 }
  0x31   : > { %2093 = vmatpush.bf16.msrb.mxu3 %v3021_v1  ;;  %v839_v17 = vmin.f32 %v3097_v22, %v742_v27  ;;  %v2133_v41 = vsel %vm3253_vm6, %v2132_v14, %v3205_v33  ;;  %v2154_v42 = vand.u32 2147483647, %v2153_v31  ;;  %v527_v58 = vmul.f32 %v3052_v7, %v430_v44  ;;  %v362_v27 = vld [vmem:[%s3069_s30 + $0x50] sm:$0xff] }
  0x32   : > { %1335 = vmatmul.bf16.vlgmr.msra.gmra.mxu3 %v1063_v30  ;;  %v2182_v43 = vand.u32 2147483647, %v458_v32  ;;  %v2184_v1 = vcvt.f32.s32 %v458_v32  ;;  %v644_v47 = vadd.f32 %v2133_v41, %v3080_v15  ;;  %vm3287_vm8 = vcmp.lt.f32.partialorder %v2158_v36, 8388608.0 }
  0x33   : > { %v935_v46 = vsub.f32 %v839_v17, %v3080_v15  ;;  %v2161_v23 = vcvt.s32.f32 %v2160_v37  ;;  %v2156_v51 = vor.u32 %v2155_v25, %v2154_v42  ;;  %v2187_v52 = vand.u32 2147483648, %v458_v32 }
  0x34   : > { %vm3294_vm9 = vcmp.lt.f32.partialorder %v2182_v43, 8388608.0  ;;  %v2185_v24 = vcvt.s32.f32 %v2184_v1  ;;  %v740_v56 = vmax.f32 %v644_v47, 0.0  ;;  %v3303_v61 = vmul.f32 %v3052_v7, %v433_v49 }
  0x35   : > { %2094 = vmatpush.bf16.msrb.mxu3 %v3039_v4  ;;  %v1028_v55 = vpack.c.bf16 %v935_v46, %v932_v13  ;;  %v2162_v57 = vand.u32 2147483647, %v2161_v23  ;;  %v2157_v59 = vsel %vm3273_vm7, %v2156_v51, %v3223_v39  ;;  %v3306_v4 = vmul.f32 %v3052_v7, %v359_v50  ;;  %v360_v51 = vld [vmem:[%s3069_s30 + $0x40] sm:$0xff] }
  0x36   : > { %v2186_v60 = vand.u32 2147483647, %v2185_v24  ;;  %v647_v62 = vadd.f32 %v2157_v59, %v3080_v15  ;;  %v837_v3 = vmin.f32 %v3097_v22, %v740_v56  ;;  %v2734_v10 = vand.u32 2147483647, %v527_v58 }
  0x37   : > { %1364 = vmatmul.bf16.vlgmr.msra.gmra.mxu1 %v1028_v55  ;;  %v2164_v6 = vor.u32 %v2163_v38, %v2162_v57  ;;  %v2736_v12 = vcvt.f32.s32 %v527_v58  ;;  %v2739_v16 = vand.u32 2147483648, %v527_v58  ;;  %v2758_v39 = vand.u32 2147483647, %v3303_v61 }
  0x38   : > { %v2188_v11 = vor.u32 %v2187_v52, %v2186_v60  ;;  %v743_v18 = vmax.f32 %v647_v62, 0.0  ;;  %v933_v19 = vsub.f32 %v837_v3, %v3080_v15  ;;  %vm3315_vm10 = vcmp.lt.f32.partialorder %v2734_v10, 8388608.0  ;;  %v363_v62 = vld [vmem:[%s3069_s30 + $0x58] sm:$0xff] }
  0x39   : > { %2095 = vmatpush.bf16.msrb.mxu3 %v3059_v8  ;;  %v2165_v20 = vsel %vm3287_vm8, %v2164_v6, %v455_v29  ;;  %v2737_v30 = vcvt.s32.f32 %v2736_v12  ;;  %vm3323_vm11 = vcmp.lt.f32.partialorder %v2758_v39, 8388608.0  ;;  %v2760_v29 = vcvt.f32.s32 %v3303_v61 }
  0x3a   : > { %v2189_v13 = vsel %vm3294_vm9, %v2188_v11, %v458_v32  ;;  %v648_v28 = vadd.f32 %v2165_v20, %v3080_v15  ;;  %v840_v8 = vmin.f32 %v3097_v22, %v743_v18  ;;  %v2763_v17 = vand.u32 2147483648, %v3303_v61 }
  0x3b   : > { %v651_v31 = vadd.f32 %v2189_v13, %v3080_v15  ;;  %v2738_v37 = vand.u32 2147483647, %v2737_v30  ;;  %v459_v32 = vmul.f32 %v3052_v7, %v362_v27  ;;  %v2166_v38 = vand.u32 2147483647, %v3306_v4 }
  0x3c   : > { %v744_v36 = vmax.f32 %v648_v28, 0.0  ;;  %v936_v41 = vsub.f32 %v840_v8, %v3080_v15  ;;  %v2761_v43 = vcvt.s32.f32 %v2760_v29  ;;  %v2168_v1 = vcvt.f32.s32 %v3306_v4 }
  0x3d   : > { %2096 = vmatpush.bf16.msrb.mxu3 %v3094_v21  ;;  %v747_v42 = vmax.f32 %v651_v31, 0.0  ;;  %v2740_v46 = vor.u32 %v2739_v16, %v2738_v37  ;;  %vm3337_vm12 = vcmp.lt.f32.partialorder %v2166_v38, 8388608.0  ;;  %v2171_v48 = vand.u32 2147483648, %v3306_v4  ;;  %v367_v37 = vld [vmem:[%s3069_s30 + $0x78] sm:$0xff] }
  0x3e   : > { %v841_v44 = vmin.f32 %v3097_v22, %v744_v36  ;;  %v1029_v23 = vpack.c.bf16 %v936_v41, %v933_v19  ;;  %v2762_v21 = vand.u32 2147483647, %v2761_v43  ;;  %v2169_v50 = vcvt.s32.f32 %v2168_v1  ;;  %v364_v36 = vld [vmem:[%s3069_s30 + $0x60] sm:$0xff] }
  0x3f   : > { %v844_v49 = vmin.f32 %v3097_v22, %v747_v42  ;;  %v2741_v24 = vsel %vm3315_vm10, %v2740_v46, %v527_v58  ;;  %v2190_v52 = vand.u32 2147483647, %v459_v32  ;;  %v2192_v55 = vcvt.f32.s32 %v459_v32  ;;  %v436_v43 = vld [vmem:[%s3069_s30 + $0x2a0] sm:$0xff] }
  0x40   : > { %v937_v33 = vsub.f32 %v841_v44, %v3080_v15  ;;  %1453 = vmatmul.bf16.vlgmr.msra.gmra.mxu2 %v1029_v23  ;;  %v2764_v57 = vor.u32 %v2763_v17, %v2762_v21  ;;  %v720_v59 = vadd.f32 %v2741_v24, %v3080_v15  ;;  %v2170_v60 = vand.u32 2147483647, %v2169_v50 }
  0x41   : > { %2097 = vmatpush.bf16.msrb.mxu3 %v3138_v40  ;;  %v940_v56 = vsub.f32 %v844_v49, %v3080_v15  ;;  %vm3351_vm13 = vcmp.lt.f32.partialorder %v2190_v52, 8388608.0  ;;  %v2193_v6 = vcvt.s32.f32 %v2192_v55  ;;  %v2195_v10 = vand.u32 2147483648, %v459_v32 }
  0x42   : > { %v457_v58 = vmul.f32 %v3052_v7, %v360_v51  ;;  %v2765_v40 = vsel %vm3323_vm11, %v2764_v57, %v3303_v61  ;;  %v816_v12 = vmax.f32 %v720_v59, 0.0  ;;  %v2172_v16 = vor.u32 %v2171_v48, %v2170_v60 }
  0x43   : > { %v1030_v11 = vpack.c.bf16 %v940_v56, %v937_v33  ;;  %v723_v39 = vadd.f32 %v2765_v40, %v3080_v15  ;;  %v2194_v18 = vand.u32 2147483647, %v2193_v6  ;;  %v460_v19 = vmul.f32 %v3052_v7, %v363_v62 }
  0x44   : > { %v2174_v20 = vand.u32 2147483647, %v457_v58  ;;  %v913_v25 = vmin.f32 %v3097_v22, %v816_v12  ;;  %v2173_v27 = vsel %vm3337_vm12, %v2172_v16, %v3306_v4  ;;  %v2176_v61 = vcvt.f32.s32 %v457_v58 }
  0x45   : > { %2098 = vmatpush.bf16.msrb.mxu3 %v3174_v63  ;;  %1280 = vmatmul.bf16.gmra.mxu0 %v1030_v11  ;;  %v2179_v13 = vand.u32 2147483648, %v457_v58  ;;  %v819_v28 = vmax.f32 %v723_v39, 0.0  ;;  %v2196_v30 = vor.u32 %v2195_v10, %v2194_v18  ;;  %v649_v14 = vadd.f32 %v2173_v27, %v3080_v15 }
  0x46   : > { %vm3367_vm14 = vcmp.lt.f32.partialorder %v2174_v20, 8388608.0  ;;  %v1009_v63 = vsub.f32 %v913_v25, %v3080_v15  ;;  %v2177_v31 = vcvt.s32.f32 %v2176_v61  ;;  %v2198_v29 = vand.u32 2147483647, %v460_v19 }
  0x47   : > { %v2200_v17 = vcvt.f32.s32 %v460_v19  ;;  %v916_v4 = vmin.f32 %v3097_v22, %v819_v28  ;;  %v2197_v38 = vsel %vm3351_vm13, %v2196_v30, %v459_v32  ;;  %v745_v41 = vmax.f32 %v649_v14, 0.0  ;;  %v365_v14 = vld [vmem:[%s3069_s30 + $0x68] sm:$0xff] }
  0x48   : > { %v2203_v42 = vand.u32 2147483648, %v460_v19  ;;  %v652_v1 = vadd.f32 %v2197_v38, %v3080_v15  ;;  %v2178_v44 = vand.u32 2147483647, %v2177_v31  ;;  %vm3380_vm15 = vcmp.lt.f32.partialorder %v2198_v29, 8388608.0 }
  0x49   : > { %2099 = vmatpush.bf16.msrb.mxu3 %v3212_v34  ;;  %v2201_v47 = vcvt.s32.f32 %v2200_v17  ;;  %v1012_v48 = vsub.f32 %v916_v4, %v3080_v15  ;;  %v842_v23 = vmin.f32 %v3097_v22, %v745_v41  ;;  %v461_v49 = vmul.f32 %v3052_v7, %v364_v36  ;;  %v368_v4 = vld [vmem:[%s3069_s30 + $0x80] sm:$0xff] }
  0x4a   : > { %v3388_v32 = vmul.f32 %v3052_v7, %v367_v37  ;;  %v748_v21 = vmax.f32 %v652_v1, 0.0  ;;  %v2180_v50 = vor.u32 %v2179_v13, %v2178_v44  ;;  %v3391_v51 = vmul.f32 %v3052_v7, %v436_v43 }
  0x4b   : > { %v2202_v34 = vand.u32 2147483647, %v2201_v47  ;;  %v1066_v33 = vpack.c.bf16 %v1012_v48, %v1009_v63  ;;  %v938_v24 = vsub.f32 %v842_v23, %v3080_v15  ;;  %v2206_v52 = vand.u32 2147483647, %v461_v49 }
  0x4c   : > { %v2208_v55 = vcvt.f32.s32 %v461_v49  ;;  %v845_v56 = vmin.f32 %v3097_v22, %v748_v21  ;;  %v2181_v57 = vsel %vm3367_vm14, %v2180_v50, %v457_v58  ;;  %v2211_v60 = vand.u32 2147483648, %v461_v49 }
  0x4d   : > { %2100 = vmatpush.bf16.msrb.mxu3 %v3244_v53  ;;  %v2204_v59 = vor.u32 %v2203_v42, %v2202_v34  ;;  %v650_v62 = vadd.f32 %v2181_v57, %v3080_v15  ;;  %vm3400_vm0 = vcmp.lt.f32.partialorder %v2206_v52, 8388608.0  ;;  %v2230_v10 = vand.u32 2147483647, %v3388_v32  ;;  %v439_v53 = vld [vmem:[%s3069_s30 + $0x2b8] sm:$0xff] }
  0x4e   : > { %1340 = vmatmul.bf16.gmra.mxu3 %v1066_v33  ;;  %v2209_v6 = vcvt.s32.f32 %v2208_v55  ;;  %v941_v11 = vsub.f32 %v845_v56, %v3080_v15  ;;  %v2232_v40 = vcvt.f32.s32 %v3388_v32  ;;  %v536_v27 = vmul.f32 %v3052_v7, %v439_v53 }
  0x4f   : > { %v2205_v58 = vsel %vm3380_vm15, %v2204_v59, %v460_v19  ;;  %v746_v16 = vmax.f32 %v650_v62, 0.0  ;;  %vm3412_vm1 = vcmp.lt.f32.partialorder %v2230_v10, 8388608.0  ;;  %v2782_v61 = vand.u32 2147483647, %v3391_v51  ;;  %v366_v62 = vld [vmem:[%s3069_s30 + $0x70] sm:$0xff] }
  0x50   : > { %v653_v12 = vadd.f32 %v2205_v58, %v3080_v15  ;;  %v2210_v39 = vand.u32 2147483647, %v2209_v6  ;;  %v1031_v20 = vpack.c.bf16 %v941_v11, %v938_v24  ;;  %v2233_v25 = vcvt.s32.f32 %v2232_v40 }
  0x51   : > { %2101 = vmatpush.bf16.msra.mxu3 %v3026_v2  ;;  %v2235_v2 = vand.u32 2147483648, %v3388_v32  ;;  %v843_v13 = vmin.f32 %v3097_v22, %v746_v16  ;;  %v2784_v30 = vcvt.f32.s32 %v3391_v51  ;;  %vm3422_vm2 = vcmp.lt.f32.partialorder %v2782_v61, 8388608.0 }
  0x52   : > { %v749_v19 = vmax.f32 %v653_v12, 0.0  ;;  %v2212_v28 = vor.u32 %v2211_v60, %v2210_v39  ;;  %1369 = vmatmul.bf16.gmra.mxu1 %v1031_v20  ;;  %v2234_v8 = vand.u32 2147483647, %v2233_v25  ;;  %v2787_v31 = vand.u32 2147483648, %v3391_v51 }
  0x53   : > { %v2806_v29 = vand.u32 2147483647, %v536_v27  ;;  %v2785_v37 = vcvt.s32.f32 %v2784_v30  ;;  %v2808_v43 = vcvt.f32.s32 %v536_v27  ;;  %v2811_v46 = vand.u32 2147483648, %v536_v27 }
  0x54   : > { %v846_v17 = vmin.f32 %v3097_v22, %v749_v19  ;;  %v2213_v36 = vsel %vm3400_vm0, %v2212_v28, %v461_v49  ;;  %v2236_v38 = vor.u32 %v2235_v2, %v2234_v8  ;;  %v462_v47 = vmul.f32 %v3052_v7, %v365_v14 }
  0x55   : > { %2102 = vmatpush.bf16.msra.mxu3 %v3044_v5  ;;  %v939_v5 = vsub.f32 %v843_v13, %v3080_v15  ;;  %v654_v41 = vadd.f32 %v2213_v36, %v3080_v15  ;;  %vm3433_vm3 = vcmp.lt.f32.partialorder %v2806_v29, 8388608.0  ;;  %v2786_v44 = vand.u32 2147483647, %v2785_v37 }
  0x56   : > { %v942_v1 = vsub.f32 %v846_v17, %v3080_v15  ;;  %v2237_v48 = vsel %vm3412_vm1, %v2236_v38, %v3388_v32  ;;  %v2809_v49 = vcvt.s32.f32 %v2808_v43  ;;  %v3444_v21 = vmul.f32 %v3052_v7, %v368_v4 }
  0x57   : > { %v750_v23 = vmax.f32 %v654_v41, 0.0  ;;  %v657_v34 = vadd.f32 %v2237_v48, %v3080_v15  ;;  %v2214_v33 = vand.u32 2147483647, %v462_v47  ;;  %v2216_v55 = vcvt.f32.s32 %v462_v47  ;;  %v373_v41 = vld [vmem:[%s3069_s30 + $0xa8] sm:$0xff] }
  0x58   : > { %v1032_v50 = vpack.c.bf16 %v942_v1, %v939_v5  ;;  %v2810_v52 = vand.u32 2147483647, %v2809_v49  ;;  %v2219_v56 = vand.u32 2147483648, %v462_v47  ;;  %v2238_v60 = vand.u32 2147483647, %v3444_v21 }
  0x59   : > { %2103 = vmatpush.bf16.msra.mxu3 %v3064_v9  ;;  %v2788_v9 = vor.u32 %v2787_v31, %v2786_v44  ;;  %v847_v24 = vmin.f32 %v3097_v22, %v750_v23  ;;  %v753_v32 = vmax.f32 %v657_v34, 0.0  ;;  %vm3452_vm4 = vcmp.lt.f32.partialorder %v2214_v33, 8388608.0  ;;  %v370_v31 = vld [vmem:[%s3069_s30 + $0x90] sm:$0xff] }
  0x5a   : > { %1458 = vmatmul.bf16.gmra.mxu2 %v1032_v50  ;;  %v2812_v6 = vor.u32 %v2811_v46, %v2810_v52  ;;  %v2217_v53 = vcvt.s32.f32 %v2216_v55  ;;  %vm3462_vm5 = vcmp.lt.f32.partialorder %v2238_v60, 8388608.0  ;;  %v2243_v40 = vand.u32 2147483648, %v3444_v21 }
  0x5b   : > { %v2789_v57 = vsel %vm3422_vm2, %v2788_v9, %v3391_v51  ;;  %v943_v3 = vsub.f32 %v847_v24, %v3080_v15  ;;  %v850_v11 = vmin.f32 %v3097_v22, %v753_v32  ;;  %v2240_v51 = vcvt.f32.s32 %v3444_v21 }
  0x5c   : > { %v726_v10 = vadd.f32 %v2789_v57, %v3080_v15  ;;  %v2813_v2 = vsel %vm3433_vm3, %v2812_v6, %v536_v27  ;;  %v2218_v16 = vand.u32 2147483647, %v2217_v53  ;;  %v463_v39 = vmul.f32 %v3052_v7, %v366_v62  ;;  %v442_v57 = vld [vmem:[%s3069_s30 + $0x2d0] sm:$0xff] }
  0x5d   : > { %2104 = vmatpush.bf16.msra.mxu3 %v3113_v26  ;;  %v369_v26 = vld [vmem:[%s3069_s30 + $0x88] sm:$0xff]  ;;  %v946_v18 = vsub.f32 %v850_v11, %v3080_v15  ;;  %v729_v20 = vadd.f32 %v2813_v2, %v3080_v15  ;;  %v2241_v25 = vcvt.s32.f32 %v2240_v51  ;;  %v467_v44 = vmul.f32 %v3052_v7, %v370_v31 }
  0x5e   : > { %v822_v12 = vmax.f32 %v726_v10, 0.0  ;;  %v3475_v61 = vmul.f32 %v3052_v7, %v369_v26  ;;  %v2220_v13 = vor.u32 %v2219_v56, %v2218_v16  ;;  %v2222_v28 = vand.u32 2147483647, %v463_v39  ;;  %v445_v26 = vld [vmem:[%s3069_s30 + $0x2e8] sm:$0xff] }
  0x5f   : > { %v2224_v27 = vcvt.f32.s32 %v463_v39  ;;  %v1033_v30 = vpack.c.bf16 %v946_v18, %v943_v3  ;;  %v825_v14 = vmax.f32 %v729_v20, 0.0  ;;  %v2242_v8 = vand.u32 2147483647, %v2241_v25 }
  0x60   : > { %v919_v19 = vmin.f32 %v3097_v22, %v822_v12  ;;  %v2227_v63 = vand.u32 2147483648, %v463_v39  ;;  %v2221_v29 = vsel %vm3452_vm4, %v2220_v13, %v462_v47  ;;  %vm3482_vm6 = vcmp.lt.f32.partialorder %v2222_v28, 8388608.0 }
  0x61   : > { %2105 = vmatpush.bf16.msra.mxu3 %v3150_v45  ;;  %v2225_v5 = vcvt.s32.f32 %v2224_v27  ;;  %1285 = vmatmul.bf16.gmra.mxu0 %v1033_v30  ;;  %v922_v36 = vmin.f32 %v3097_v22, %v825_v14  ;;  %v2244_v37 = vor.u32 %v2243_v40, %v2242_v8  ;;  %v655_v4 = vadd.f32 %v2221_v29, %v3080_v15 }
  0x62   : > { %v1015_v45 = vsub.f32 %v919_v19, %v3080_v15  ;;  %v2246_v38 = vand.u32 2147483647, %v3475_v61  ;;  %v2248_v43 = vcvt.f32.s32 %v3475_v61  ;;  %v2251_v1 = vand.u32 2147483648, %v3475_v61 }
  0x63   : > { %v2226_v42 = vand.u32 2147483647, %v2225_v5  ;;  %v1018_v46 = vsub.f32 %v922_v36, %v3080_v15  ;;  %v751_v47 = vmax.f32 %v655_v4, 0.0  ;;  %v470_v34 = vmul.f32 %v3052_v7, %v373_v41 }
  0x64   : > { %vm3498_vm7 = vcmp.lt.f32.partialorder %v2246_v38, 8388608.0  ;;  %v2249_v50 = vcvt.s32.f32 %v2248_v43  ;;  %v2254_v24 = vand.u32 2147483647, %v467_v44  ;;  %v2259_v32 = vand.u32 2147483648, %v467_v44  ;;  %v374_v38 = vld [vmem:[%s3069_s30 + $0xb0] sm:$0xff] }
  0x65   : > { %2106 = vmatpush.bf16.msra.mxu3 %v3179_v0  ;;  %v2245_v0 = vsel %vm3462_vm5, %v2244_v37, %v3444_v21  ;;  %v2228_v49 = vor.u32 %v2227_v63, %v2226_v42  ;;  %v1069_v9 = vpack.c.bf16 %v1018_v46, %v1015_v45  ;;  %v848_v33 = vmin.f32 %v3097_v22, %v751_v47  ;;  %v371_v63 = vld [vmem:[%s3069_s30 + $0x98] sm:$0xff] }
  0x66   : > { %v658_v23 = vadd.f32 %v2245_v0, %v3080_v15  ;;  %v2256_v21 = vcvt.f32.s32 %v467_v44  ;;  %v2250_v56 = vand.u32 2147483647, %v2249_v50  ;;  %vm3511_vm8 = vcmp.lt.f32.partialorder %v2254_v24, 8388608.0 }
  0x67   : > { %v2229_v55 = vsel %vm3482_vm6, %v2228_v49, %v463_v39  ;;  %1345 = vmatmul.bf16.gmra.mxu3 %v1069_v9  ;;  %v944_v59 = vsub.f32 %v848_v33, %v3080_v15  ;;  %v2278_v10 = vand.u32 2147483647, %v470_v34  ;;  %v2280_v53 = vcvt.f32.s32 %v470_v34 }
  0x68   : > { %v754_v52 = vmax.f32 %v658_v23, 0.0  ;;  %v656_v60 = vadd.f32 %v2229_v55, %v3080_v15  ;;  %v2257_v62 = vcvt.s32.f32 %v2256_v21  ;;  %v2252_v6 = vor.u32 %v2251_v1, %v2250_v56  ;;  %v372_v21 = vld [vmem:[%s3069_s30 + $0xa0] sm:$0xff] }
  0x69   : > { %2107 = vmatpush.bf16.msra.mxu3 %v3217_v35  ;;  %v2283_v51 = vand.u32 2147483648, %v470_v34  ;;  %v539_v40 = vmul.f32 %v3052_v7, %v442_v57  ;;  %vm3523_vm9 = vcmp.lt.f32.partialorder %v2278_v10, 8388608.0  ;;  %v2281_v39 = vcvt.s32.f32 %v2280_v53 }
  0x6a   : > { %v851_v3 = vmin.f32 %v3097_v22, %v754_v52  ;;  %v752_v11 = vmax.f32 %v656_v60, 0.0  ;;  %v2258_v58 = vand.u32 2147483647, %v2257_v62  ;;  %v2253_v12 = vsel %vm3498_vm7, %v2252_v6, %v3475_v61  ;;  %v375_v62 = vld [vmem:[%s3069_s30 + $0xb8] sm:$0xff] }
  0x6b   : > { %v659_v18 = vadd.f32 %v2253_v12, %v3080_v15  ;;  %v542_v25 = vmul.f32 %v3052_v7, %v445_v26  ;;  %v2282_v13 = vand.u32 2147483647, %v2281_v39  ;;  %v2830_v28 = vand.u32 2147483647, %v539_v40 }
  0x6c   : > { %v947_v2 = vsub.f32 %v851_v3, %v3080_v15  ;;  %v2260_v20 = vor.u32 %v2259_v32, %v2258_v58  ;;  %v2832_v27 = vcvt.f32.s32 %v539_v40  ;;  %v2835_v8 = vand.u32 2147483648, %v539_v40 }
  0x6d   : > { %2108 = vmatpush.bf16.msra.mxu3 %v3249_v54  ;;  %v849_v54 = vmin.f32 %v3097_v22, %v752_v11  ;;  %v755_v30 = vmax.f32 %v659_v18, 0.0  ;;  %v2284_v31 = vor.u32 %v2283_v51, %v2282_v13  ;;  %vm3535_vm10 = vcmp.lt.f32.partialorder %v2830_v28, 8388608.0 }
  0x6e   : > { %v1034_v19 = vpack.c.bf16 %v947_v2, %v944_v59  ;;  %v2261_v14 = vsel %vm3511_vm8, %v2260_v20, %v467_v44  ;;  %v2833_v17 = vcvt.s32.f32 %v2832_v27  ;;  %v2854_v36 = vand.u32 2147483647, %v542_v25  ;;  %v376_v27 = vld [vmem:[%s3069_s30 + $0xc0] sm:$0xff] }
  0x6f   : > { %v945_v61 = vsub.f32 %v849_v54, %v3080_v15  ;;  %v660_v45 = vadd.f32 %v2261_v14, %v3080_v15  ;;  %v852_v5 = vmin.f32 %v3097_v22, %v755_v30  ;;  %v2856_v37 = vcvt.f32.s32 %v542_v25 }
  0x70   : > { %1374 = vmatmul.bf16.gmra.mxu1 %v1034_v19  ;;  %v2859_v4 = vand.u32 2147483648, %v542_v25  ;;  %v2285_v41 = vsel %vm3523_vm9, %v2284_v31, %v470_v34  ;;  %v2834_v43 = vand.u32 2147483647, %v2833_v17  ;;  %v468_v1 = vmul.f32 %v3052_v7, %v371_v63  ;;  %v379_v17 = vld [vmem:[%s3069_s30 + $0xd8] sm:$0xff] }
  0x71   : > { %v756_v42 = vmax.f32 %v660_v45, 0.0  ;;  %v948_v44 = vsub.f32 %v852_v5, %v3080_v15  ;;  %v663_v46 = vadd.f32 %v2285_v41, %v3080_v15  ;;  %vm3546_vm11 = vcmp.lt.f32.partialorder %v2854_v36, 8388608.0 }
  0x72   : > { %v2857_v47 = vcvt.s32.f32 %v2856_v37  ;;  %v2836_v23 = vor.u32 %v2835_v8, %v2834_v43  ;;  %v471_v49 = vmul.f32 %v3052_v7, %v374_v38  ;;  %v2262_v50 = vand.u32 2147483647, %v468_v1 }
  0x73   : > { %v853_v48 = vmin.f32 %v3097_v22, %v756_v42  ;;  %v1035_v34 = vpack.c.bf16 %v948_v44, %v945_v61  ;;  %v759_v9 = vmax.f32 %v663_v46, 0.0  ;;  %v2264_v24 = vcvt.f32.s32 %v468_v1 }
  0x74   : > { %v2858_v33 = vand.u32 2147483647, %v2857_v47  ;;  %v2837_v55 = vsel %vm3535_vm10, %v2836_v23, %v539_v40  ;;  %vm3556_vm12 = vcmp.lt.f32.partialorder %v2262_v50, 8388608.0  ;;  %v2267_v32 = vand.u32 2147483648, %v468_v1 }
  0x75   : > { %v949_v52 = vsub.f32 %v853_v48, %v3080_v15  ;;  %1463 = vmatmul.bf16.gmra.mxu2 %v1035_v34  ;;  %v856_v57 = vmin.f32 %v3097_v22, %v759_v9  ;;  %v732_v60 = vadd.f32 %v2837_v55, %v3080_v15  ;;  %v2265_v35 = vcvt.s32.f32 %v2264_v24  ;;  %v377_v24 = vld [vmem:[%s3069_s30 + $0xc8] sm:$0xff] }
  0x76   : > { %v2860_v59 = vor.u32 %v2859_v4, %v2858_v33  ;;  %v2286_v3 = vand.u32 2147483647, %v471_v49  ;;  %v2288_v6 = vcvt.f32.s32 %v471_v49  ;;  %v2291_v10 = vand.u32 2147483648, %v471_v49 }
  0x77   : > { %v469_v53 = vmul.f32 %v3052_v7, %v372_v21  ;;  %v952_v26 = vsub.f32 %v856_v57, %v3080_v15  ;;  %v828_v58 = vmax.f32 %v732_v60, 0.0  ;;  %v2266_v51 = vand.u32 2147483647, %v2265_v35  ;;  %v380_v35 = vld [vmem:[%s3069_s30 + $0xe0] sm:$0xff] }
  0x78   : > { %v2861_v11 = vsel %vm3546_vm11, %v2860_v59, %v542_v25  ;;  %vm3568_vm13 = vcmp.lt.f32.partialorder %v2286_v3, 8388608.0  ;;  %v2289_v12 = vcvt.s32.f32 %v2288_v6  ;;  %v472_v16 = vmul.f32 %v3052_v7, %v375_v62 }
  0x79   : > { %v735_v40 = vadd.f32 %v2861_v11, %v3080_v15  ;;  %v1036_v39 = vpack.c.bf16 %v952_v26, %v949_v52  ;;  %v925_v18 = vmin.f32 %v3097_v22, %v828_v58  ;;  %v2268_v54 = vor.u32 %v2267_v32, %v2266_v51 }
  0x7a   : > { %v2270_v20 = vand.u32 2147483647, %v469_v53  ;;  %v2290_v13 = vand.u32 2147483647, %v2289_v12  ;;  %v2272_v25 = vcvt.f32.s32 %v469_v53  ;;  %v2275_v28 = vand.u32 2147483648, %v469_v53 }
  0x7b   : > { %v831_v19 = vmax.f32 %v735_v40, 0.0  ;;  %1290 = vmatmul.bf16.gmra.mxu0 %v1036_v39  ;;  %v1021_v30 = vsub.f32 %v925_v18, %v3080_v15  ;;  %v2269_v61 = vsel %vm3556_vm12, %v2268_v54, %v468_v1  ;;  %v2294_v8 = vand.u32 2147483647, %v472_v16 }
  0x7c   : > { %vm3578_vm14 = vcmp.lt.f32.partialorder %v2270_v20, 8388608.0  ;;  %v2292_v31 = vor.u32 %v2291_v10, %v2290_v13  ;;  %v661_v45 = vadd.f32 %v2269_v61, %v3080_v15  ;;  %v2273_v29 = vcvt.s32.f32 %v2272_v25 }
  0x7d   : > { %v928_v63 = vmin.f32 %v3097_v22, %v831_v19  ;;  %vm3585_vm15 = vcmp.lt.f32.partialorder %v2294_v8, 8388608.0  ;;  %v2296_v36 = vcvt.f32.s32 %v472_v16  ;;  %v2299_v37 = vand.u32 2147483648, %v472_v16 }
  0x7e   : > { %v473_v4 = vmul.f32 %v3052_v7, %v376_v27  ;;  %v2293_v41 = vsel %vm3568_vm13, %v2292_v31, %v471_v49  ;;  %v757_v42 = vmax.f32 %v661_v45, 0.0  ;;  %v2274_v43 = vand.u32 2147483647, %v2273_v29  ;;  %v428_v29 = vld [vmem:[%s3069_s30 + $0x260] sm:$0xff] }
  0x7f   : > { %v1024_v38 = vsub.f32 %v928_v63, %v3080_v15  ;;  %v664_v1 = vadd.f32 %v2293_v41, %v3080_v15  ;;  %v2297_v44 = vcvt.s32.f32 %v2296_v36  ;;  %v476_v46 = vmul.f32 %v3052_v7, %v379_v17 }
  0x80   : > { %v2302_v0 = vand.u32 2147483647, %v473_v4  ;;  %v854_v48 = vmin.f32 %v3097_v22, %v757_v42  ;;  %v2276_v23 = vor.u32 %v2275_v28, %v2274_v43  ;;  %v2304_v50 = vcvt.f32.s32 %v473_v4  ;;  %v425_v28 = vld [vmem:[%s3069_s30 + $0x248] sm:$0xff] }
  0x81   : > { %v1072_v47 = vpack.c.bf16 %v1024_v38, %v1021_v30  ;;  %v760_v34 = vmax.f32 %v664_v1, 0.0  ;;  %v2298_v9 = vand.u32 2147483647, %v2297_v44  ;;  %v2307_v49 = vand.u32 2147483648, %v473_v4 }
  0x82   : > { %vm3596_vm0 = vcmp.lt.f32.partialorder %v2302_v0, 8388608.0  ;;  %v950_v21 = vsub.f32 %v854_v48, %v3080_v15  ;;  %v2277_v52 = vsel %vm3578_vm14, %v2276_v23, %v469_v53  ;;  %v2305_v55 = vcvt.s32.f32 %v2304_v50  ;;  %v378_v50 = vld [vmem:[%s3069_s30 + $0xd0] sm:$0xff] }
  0x83   : > { %1350 = vmatmul.bf16.gmra.mxu3 %v1072_v47  ;;  %v2326_v56 = vand.u32 2147483647, %v476_v46  ;;  %v857_v32 = vmin.f32 %v3097_v22, %v760_v34  ;;  %v2300_v57 = vor.u32 %v2299_v37, %v2298_v9  ;;  %v662_v59 = vadd.f32 %v2277_v52, %v3080_v15 }
  0x84   : > { %v2328_v60 = vcvt.f32.s32 %v476_v46  ;;  %v2306_v62 = vand.u32 2147483647, %v2305_v55  ;;  %v2331_v6 = vand.u32 2147483648, %v476_v46  ;;  %v474_v10 = vmul.f32 %v3052_v7, %v377_v24 }
  0x85   : > { %vm3607_vm1 = vcmp.lt.f32.partialorder %v2326_v56, 8388608.0  ;;  %v953_v26 = vsub.f32 %v857_v32, %v3080_v15  ;;  %v2301_v53 = vsel %vm3585_vm15, %v2300_v57, %v472_v16  ;;  %v758_v11 = vmax.f32 %v662_v59, 0.0  ;;  %v381_v56 = vld [vmem:[%s3069_s30 + $0xe8] sm:$0xff] }
  0x86   : > { %v2329_v58 = vcvt.s32.f32 %v2328_v60  ;;  %v665_v51 = vadd.f32 %v2301_v53, %v3080_v15  ;;  %v2308_v40 = vor.u32 %v2307_v49, %v2306_v62  ;;  %v477_v2 = vmul.f32 %v3052_v7, %v380_v35 }
  0x87   : > { %v2310_v12 = vand.u32 2147483647, %v474_v10  ;;  %v1037_v39 = vpack.c.bf16 %v953_v26, %v950_v21  ;;  %v855_v18 = vmin.f32 %v3097_v22, %v758_v11  ;;  %v2312_v20 = vcvt.f32.s32 %v474_v10 }
  0x88   : > { %v2330_v54 = vand.u32 2147483647, %v2329_v58  ;;  %v761_v19 = vmax.f32 %v665_v51, 0.0  ;;  %v2309_v13 = vsel %vm3596_vm0, %v2308_v40, %v473_v4  ;;  %v2315_v25 = vand.u32 2147483648, %v474_v10 }
  0x89   : > { %vm3620_vm2 = vcmp.lt.f32.partialorder %v2310_v12, 8388608.0  ;;  %1379 = vmatmul.bf16.gmra.mxu1 %v1037_v39  ;;  %v951_v27 = vsub.f32 %v855_v18, %v3080_v15  ;;  %v666_v61 = vadd.f32 %v2309_v13, %v3080_v15  ;;  %v2313_v14 = vcvt.s32.f32 %v2312_v20  ;;  %v382_v20 = vld [vmem:[%s3069_s30 + $0xf0] sm:$0xff] }
  0x8a   : > { %v2332_v30 = vor.u32 %v2331_v6, %v2330_v54  ;;  %v858_v8 = vmin.f32 %v3097_v22, %v761_v19  ;;  %v2334_v63 = vand.u32 2147483647, %v477_v2  ;;  %v2336_v31 = vcvt.f32.s32 %v477_v2 }
  0x8b   : > { %v2339_v45 = vand.u32 2147483648, %v477_v2  ;;  %v762_v5 = vmax.f32 %v666_v61, 0.0  ;;  %v2314_v36 = vand.u32 2147483647, %v2313_v14  ;;  %v522_v37 = vmul.f32 %v3052_v7, %v425_v28  ;;  %v385_v14 = vld [vmem:[%s3069_s30 + $0x108] sm:$0xff] }
  0x8c   : > { %v2333_v17 = vsel %vm3607_vm1, %v2332_v30, %v476_v46  ;;  %v954_v4 = vsub.f32 %v858_v8, %v3080_v15  ;;  %vm3634_vm3 = vcmp.lt.f32.partialorder %v2334_v63, 8388608.0  ;;  %v2337_v42 = vcvt.s32.f32 %v2336_v31 }
  0x8d   : > { %v669_v38 = vadd.f32 %v2333_v17, %v3080_v15  ;;  %v859_v43 = vmin.f32 %v3097_v22, %v762_v5  ;;  %v2316_v1 = vor.u32 %v2315_v25, %v2314_v36  ;;  %v525_v44 = vmul.f32 %v3052_v7, %v428_v29 }
  0x8e   : > { %v2694_v46 = vand.u32 2147483647, %v522_v37  ;;  %v1038_v0 = vpack.c.bf16 %v954_v4, %v951_v27  ;;  %v2338_v48 = vand.u32 2147483647, %v2337_v42  ;;  %v2696_v23 = vcvt.f32.s32 %v522_v37 }
  0x8f   : > { %v765_v47 = vmax.f32 %v669_v38, 0.0  ;;  %v955_v34 = vsub.f32 %v859_v43, %v3080_v15  ;;  %v2317_v9 = vsel %vm3620_vm2, %v2316_v1, %v474_v10  ;;  %v2699_v49 = vand.u32 2147483648, %v522_v37 }
  0x90   : > { %vm3644_vm4 = vcmp.lt.f32.partialorder %v2694_v46, 8388608.0  ;;  %1468 = vmatmul.bf16.gmra.mxu2 %v1038_v0  ;;  %v2340_v21 = vor.u32 %v2339_v45, %v2338_v48  ;;  %v667_v52 = vadd.f32 %v2317_v9, %v3080_v15  ;;  %v2697_v55 = vcvt.s32.f32 %v2696_v23  ;;  %v383_v23 = vld [vmem:[%s3069_s30 + $0xf8] sm:$0xff] }
  0x91   : > { %v862_v24 = vmin.f32 %v3097_v22, %v765_v47  ;;  %v2718_v32 = vand.u32 2147483647, %v525_v44  ;;  %v2720_v57 = vcvt.f32.s32 %v525_v44  ;;  %v2723_v59 = vand.u32 2147483648, %v525_v44 }
  0x92   : > { %v475_v60 = vmul.f32 %v3052_v7, %v378_v50  ;;  %v2341_v62 = vsel %vm3634_vm3, %v2340_v21, %v477_v2  ;;  %v763_v3 = vmax.f32 %v667_v52, 0.0  ;;  %v2698_v6 = vand.u32 2147483647, %v2697_v55  ;;  %v386_v55 = vld [vmem:[%s3069_s30 + $0x110] sm:$0xff] }
  0x93   : > { %v958_v35 = vsub.f32 %v862_v24, %v3080_v15  ;;  %v670_v10 = vadd.f32 %v2341_v62, %v3080_v15  ;;  %vm3656_vm5 = vcmp.lt.f32.partialorder %v2718_v32, 8388608.0  ;;  %v2721_v53 = vcvt.s32.f32 %v2720_v57 }
  0x94   : > { %v478_v11 = vmul.f32 %v3052_v7, %v381_v56  ;;  %v860_v51 = vmin.f32 %v3097_v22, %v763_v3  ;;  %v2700_v40 = vor.u32 %v2699_v49, %v2698_v6  ;;  %v2318_v12 = vand.u32 2147483647, %v475_v60 }
  0x95   : > { %v1039_v58 = vpack.c.bf16 %v958_v35, %v955_v34  ;;  %v766_v39 = vmax.f32 %v670_v10, 0.0  ;;  %v2722_v18 = vand.u32 2147483647, %v2721_v53  ;;  %v2320_v2 = vcvt.f32.s32 %v475_v60 }
  0x96   : > { %v2323_v54 = vand.u32 2147483648, %v475_v60  ;;  %v956_v19 = vsub.f32 %v860_v51, %v3080_v15  ;;  %v2701_v13 = vsel %vm3644_vm4, %v2700_v40, %v522_v37  ;;  %vm3666_vm6 = vcmp.lt.f32.partialorder %v2318_v12, 8388608.0 }
  0x97   : > { %1295 = vmatmul.bf16.gmra.mxu0 %v1039_v58  ;;  %v2342_v25 = vand.u32 2147483647, %v478_v11  ;;  %v863_v28 = vmin.f32 %v3097_v22, %v766_v39  ;;  %v2724_v27 = vor.u32 %v2723_v59, %v2722_v18  ;;  %v715_v30 = vadd.f32 %v2701_v13, %v3080_v15 }
  0x98   : > { %v2321_v61 = vcvt.s32.f32 %v2320_v2  ;;  %v2344_v63 = vcvt.f32.s32 %v478_v11  ;;  %v2347_v31 = vand.u32 2147483648, %v478_v11  ;;  %v479_v45 = vmul.f32 %v3052_v7, %v382_v20 }
  0x99   : > { %vm3673_vm7 = vcmp.lt.f32.partialorder %v2342_v25, 8388608.0  ;;  %v959_v29 = vsub.f32 %v863_v28, %v3080_v15  ;;  %v2725_v17 = vsel %vm3656_vm5, %v2724_v27, %v525_v44  ;;  %v811_v5 = vmax.f32 %v715_v30, 0.0 }
  0x9a   : > { %v2322_v36 = vand.u32 2147483647, %v2321_v61  ;;  %v718_v37 = vadd.f32 %v2725_v17, %v3080_v15  ;;  %v2345_v4 = vcvt.s32.f32 %v2344_v63  ;;  %v482_v38 = vmul.f32 %v3052_v7, %v385_v14  ;;  %v434_v61 = vld [vmem:[%s3069_s30 + $0x290] sm:$0xff] }
  0x9b   : > { %v2350_v41 = vand.u32 2147483647, %v479_v45  ;;  %v1040_v42 = vpack.c.bf16 %v959_v29, %v956_v19  ;;  %v908_v43 = vmin.f32 %v3097_v22, %v811_v5  ;;  %v2352_v46 = vcvt.f32.s32 %v479_v45 }
  0x9c   : > { %v2324_v1 = vor.u32 %v2323_v54, %v2322_v36  ;;  %v814_v0 = vmax.f32 %v718_v37, 0.0  ;;  %v2346_v47 = vand.u32 2147483647, %v2345_v4  ;;  %v2355_v44 = vand.u32 2147483648, %v479_v45  ;;  %v431_v54 = vld [vmem:[%s3069_s30 + $0x278] sm:$0xff] }
  0x9d   : > { %vm3684_vm8 = vcmp.lt.f32.partialorder %v2350_v41, 8388608.0  ;;  %1384 = vmatmul.bf16.gmra.mxu1 %v1040_v42  ;;  %v1004_v50 = vsub.f32 %v908_v43, %v3080_v15  ;;  %v2353_v9 = vcvt.s32.f32 %v2352_v46  ;;  %v2374_v33 = vand.u32 2147483647, %v482_v38  ;;  %v384_v46 = vld [vmem:[%s3069_s30 + $0x100] sm:$0xff] }
  0x9e   : > { %v2325_v34 = vsel %vm3666_vm6, %v2324_v1, %v475_v60  ;;  %v911_v49 = vmin.f32 %v3097_v22, %v814_v0  ;;  %v2348_v24 = vor.u32 %v2347_v31, %v2346_v47  ;;  %v2376_v52 = vcvt.f32.s32 %v482_v38 }
  0x9f   : > { %v668_v21 = vadd.f32 %v2325_v34, %v3080_v15  ;;  %v2354_v56 = vand.u32 2147483647, %v2353_v9  ;;  %vm3695_vm9 = vcmp.lt.f32.partialorder %v2374_v33, 8388608.0  ;;  %v2379_v57 = vand.u32 2147483648, %v482_v38  ;;  %v387_v33 = vld [vmem:[%s3069_s30 + $0x118] sm:$0xff] }
  0xa0   : > { %v480_v59 = vmul.f32 %v3052_v7, %v383_v23  ;;  %v1007_v35 = vsub.f32 %v911_v49, %v3080_v15  ;;  %v2349_v60 = vsel %vm3673_vm7, %v2348_v24, %v478_v11  ;;  %v2377_v3 = vcvt.s32.f32 %v2376_v52 }
  0xa1   : > { %v764_v62 = vmax.f32 %v668_v21, 0.0  ;;  %v671_v6 = vadd.f32 %v2349_v60, %v3080_v15  ;;  %v2356_v10 = vor.u32 %v2355_v44, %v2354_v56  ;;  %v483_v26 = vmul.f32 %v3052_v7, %v386_v55 }
  0xa2   : > { %v2358_v53 = vand.u32 2147483647, %v480_v59  ;;  %v1064_v58 = vpack.c.bf16 %v1007_v35, %v1004_v50  ;;  %v2378_v40 = vand.u32 2147483647, %v2377_v3  ;;  %v2360_v12 = vcvt.f32.s32 %v480_v59 }
  0xa3   : > { %v861_v51 = vmin.f32 %v3097_v22, %v764_v62  ;;  %v767_v39 = vmax.f32 %v671_v6, 0.0  ;;  %v2357_v18 = vsel %vm3684_vm8, %v2356_v10, %v479_v45  ;;  %v2363_v2 = vand.u32 2147483648, %v480_v59 }
  0xa4   : > { %vm3708_vm10 = vcmp.lt.f32.partialorder %v2358_v53, 8388608.0  ;;  %1424 = vmatmul.bf16.vlgmr.msrb.gmra.mxu3 %v1064_v58  ;;  %v2380_v19 = vor.u32 %v2379_v57, %v2378_v40  ;;  %v672_v13 = vadd.f32 %v2357_v18, %v3080_v15  ;;  %v2361_v16 = vcvt.s32.f32 %v2360_v12  ;;  %v388_v12 = vld [vmem:[%s3069_s30 + $0x120] sm:$0xff] }
  0xa5   : > { %v957_v20 = vsub.f32 %v861_v51, %v3080_v15  ;;  %v864_v25 = vmin.f32 %v3097_v22, %v767_v39  ;;  %v2382_v28 = vand.u32 2147483647, %v483_v26  ;;  %v2384_v27 = vcvt.f32.s32 %v483_v26 }
  0xa6   : > { %v2387_v30 = vand.u32 2147483648, %v483_v26  ;;  %v2381_v14 = vsel %vm3695_vm9, %v2380_v19, %v482_v38  ;;  %v768_v8 = vmax.f32 %v672_v13, 0.0  ;;  %v2362_v63 = vand.u32 2147483647, %v2361_v16  ;;  %v391_v16 = vld [vmem:[%s3069_s30 + $0x138] sm:$0xff] }
  0xa7   : > { %v528_v31 = vmul.f32 %v3052_v7, %v431_v54  ;;  %v960_v45 = vsub.f32 %v864_v25, %v3080_v15  ;;  %v675_v29 = vadd.f32 %v2381_v14, %v3080_v15  ;;  %vm3722_vm11 = vcmp.lt.f32.partialorder %v2382_v28, 8388608.0 }
  0xa8   : > { %v2385_v5 = vcvt.s32.f32 %v2384_v27  ;;  %v865_v36 = vmin.f32 %v3097_v22, %v768_v8  ;;  %v2364_v37 = vor.u32 %v2363_v2, %v2362_v63  ;;  %v531_v4 = vmul.f32 %v3052_v7, %v434_v61 }
  0xa9   : > { %v2742_v38 = vand.u32 2147483647, %v528_v31  ;;  %v1041_v41 = vpack.c.bf16 %v960_v45, %v957_v20  ;;  %v771_v42 = vmax.f32 %v675_v29, 0.0  ;;  %v2744_v1 = vcvt.f32.s32 %v528_v31 }
  0xaa   : > { %v2386_v43 = vand.u32 2147483647, %v2385_v5  ;;  %v961_v0 = vsub.f32 %v865_v36, %v3080_v15  ;;  %v2365_v47 = vsel %vm3708_vm10, %v2364_v37, %v480_v59  ;;  %v2747_v44 = vand.u32 2147483648, %v528_v31 }
  0xab   : > { %vm3732_vm12 = vcmp.lt.f32.partialorder %v2742_v38, 8388608.0  ;;  %1473 = vmatmul.bf16.gmra.mxu2 %v1041_v41  ;;  %v868_v23 = vmin.f32 %v3097_v22, %v771_v42  ;;  %v673_v34 = vadd.f32 %v2365_v47, %v3080_v15  ;;  %v2745_v9 = vcvt.s32.f32 %v2744_v1  ;;  %v389_v1 = vld [vmem:[%s3069_s30 + $0x128] sm:$0xff] }
  0xac   : > { %v2388_v50 = vor.u32 %v2387_v30, %v2386_v43  ;;  %v2766_v49 = vand.u32 2147483647, %v531_v4  ;;  %v2768_v24 = vcvt.f32.s32 %v531_v4  ;;  %v2771_v21 = vand.u32 2147483648, %v531_v4 }
  0xad   : > { %v481_v52 = vmul.f32 %v3052_v7, %v384_v46  ;;  %v964_v55 = vsub.f32 %v868_v23, %v3080_v15  ;;  %v769_v32 = vmax.f32 %v673_v34, 0.0  ;;  %v2746_v57 = vand.u32 2147483647, %v2745_v9  ;;  %v392_v9 = vld [vmem:[%s3069_s30 + $0x140] sm:$0xff] }
  0xae   : > { %v2389_v56 = vsel %vm3722_vm11, %v2388_v50, %v483_v26  ;;  %vm3744_vm13 = vcmp.lt.f32.partialorder %v2766_v49, 8388608.0  ;;  %v2769_v60 = vcvt.s32.f32 %v2768_v24  ;;  %v484_v62 = vmul.f32 %v3052_v7, %v387_v33 }
  0xaf   : > { %v676_v59 = vadd.f32 %v2389_v56, %v3080_v15  ;;  %v1042_v3 = vpack.c.bf16 %v964_v55, %v961_v0  ;;  %v866_v6 = vmin.f32 %v3097_v22, %v769_v32  ;;  %v2748_v10 = vor.u32 %v2747_v44, %v2746_v57 }
  0xb0   : > { %v2366_v53 = vand.u32 2147483647, %v481_v52  ;;  %v2770_v51 = vand.u32 2147483647, %v2769_v60  ;;  %v2368_v26 = vcvt.f32.s32 %v481_v52  ;;  %v2371_v40 = vand.u32 2147483648, %v481_v52 }
  0xb1   : > { %v772_v58 = vmax.f32 %v676_v59, 0.0  ;;  %1300 = vmatmul.bf16.gmra.mxu0 %v1042_v3  ;;  %v962_v39 = vsub.f32 %v866_v6, %v3080_v15  ;;  %v2749_v18 = vsel %vm3732_vm12, %v2748_v10, %v528_v31  ;;  %v2390_v2 = vand.u32 2147483647, %v484_v62 }
  0xb2   : > { %vm3754_vm14 = vcmp.lt.f32.partialorder %v2366_v53, 8388608.0  ;;  %v2772_v20 = vor.u32 %v2771_v21, %v2770_v51  ;;  %v721_v19 = vadd.f32 %v2749_v18, %v3080_v15  ;;  %v2369_v13 = vcvt.s32.f32 %v2368_v26 }
  0xb3   : > { %v869_v54 = vmin.f32 %v3097_v22, %v772_v58  ;;  %vm3761_vm15 = vcmp.lt.f32.partialorder %v2390_v2, 8388608.0  ;;  %v2392_v28 = vcvt.f32.s32 %v484_v62  ;;  %v2395_v27 = vand.u32 2147483648, %v484_v62 }
  0xb4   : > { %v485_v30 = vmul.f32 %v3052_v7, %v388_v12  ;;  %v2773_v14 = vsel %vm3744_vm13, %v2772_v20, %v531_v4  ;;  %v817_v8 = vmax.f32 %v721_v19, 0.0  ;;  %v2370_v63 = vand.u32 2147483647, %v2369_v13  ;;  %v440_v13 = vld [vmem:[%s3069_s30 + $0x2c0] sm:$0xff] }
  0xb5   : > { %v965_v61 = vsub.f32 %v869_v54, %v3080_v15  ;;  %v724_v31 = vadd.f32 %v2773_v14, %v3080_v15  ;;  %v2393_v45 = vcvt.s32.f32 %v2392_v28  ;;  %v488_v29 = vmul.f32 %v3052_v7, %v391_v16 }
  0xb6   : > { %v2398_v17 = vand.u32 2147483647, %v485_v30  ;;  %v914_v36 = vmin.f32 %v3097_v22, %v817_v8  ;;  %v2372_v37 = vor.u32 %v2371_v40, %v2370_v63  ;;  %v2400_v38 = vcvt.f32.s32 %v485_v30  ;;  %v437_v40 = vld [vmem:[%s3069_s30 + $0x2a8] sm:$0xff] }
  0xb7   : > { %v1043_v5 = vpack.c.bf16 %v965_v61, %v962_v39  ;;  %v820_v41 = vmax.f32 %v724_v31, 0.0  ;;  %v2394_v42 = vand.u32 2147483647, %v2393_v45  ;;  %v2403_v4 = vand.u32 2147483648, %v485_v30 }
  0xb8   : > { %vm3772_vm0 = vcmp.lt.f32.partialorder %v2398_v17, 8388608.0  ;;  %v1010_v46 = vsub.f32 %v914_v36, %v3080_v15  ;;  %v2373_v0 = vsel %vm3754_vm14, %v2372_v37, %v481_v52  ;;  %v2401_v47 = vcvt.s32.f32 %v2400_v38  ;;  %v390_v38 = vld [vmem:[%s3069_s30 + $0x130] sm:$0xff] }
  0xb9   : > { %1389 = vmatmul.bf16.gmra.mxu1 %v1043_v5  ;;  %v2422_v48 = vand.u32 2147483647, %v488_v29  ;;  %v917_v44 = vmin.f32 %v3097_v22, %v820_v41  ;;  %v2396_v23 = vor.u32 %v2395_v27, %v2394_v42  ;;  %v674_v50 = vadd.f32 %v2373_v0, %v3080_v15 }
  0xba   : > { %v2424_v34 = vcvt.f32.s32 %v488_v29  ;;  %v2402_v33 = vand.u32 2147483647, %v2401_v47  ;;  %v2427_v24 = vand.u32 2147483648, %v488_v29  ;;  %v486_v21 = vmul.f32 %v3052_v7, %v389_v1 }
  0xbb   : > { %vm3783_vm1 = vcmp.lt.f32.partialorder %v2422_v48, 8388608.0  ;;  %v1013_v55 = vsub.f32 %v917_v44, %v3080_v15  ;;  %v2397_v52 = vsel %vm3761_vm15, %v2396_v23, %v484_v62  ;;  %v770_v56 = vmax.f32 %v674_v50, 0.0  ;;  %v393_v48 = vld [vmem:[%s3069_s30 + $0x148] sm:$0xff] }
  0xbc   : > { %v2425_v32 = vcvt.s32.f32 %v2424_v34  ;;  %v677_v57 = vadd.f32 %v2397_v52, %v3080_v15  ;;  %v2404_v59 = vor.u32 %v2403_v4, %v2402_v33  ;;  %v489_v35 = vmul.f32 %v3052_v7, %v392_v9 }
  0xbd   : > { %v2406_v60 = vand.u32 2147483647, %v486_v21  ;;  %v1067_v3 = vpack.c.bf16 %v1013_v55, %v1010_v46  ;;  %v867_v6 = vmin.f32 %v3097_v22, %v770_v56  ;;  %v2408_v53 = vcvt.f32.s32 %v486_v21 }
  0xbe   : > { %v2426_v10 = vand.u32 2147483647, %v2425_v32  ;;  %v773_v58 = vmax.f32 %v677_v57, 0.0  ;;  %v2405_v51 = vsel %vm3772_vm0, %v2404_v59, %v485_v30  ;;  %v2411_v26 = vand.u32 2147483648, %v486_v21 }
  0xbf   : > { %vm3796_vm2 = vcmp.lt.f32.partialorder %v2406_v60, 8388608.0  ;;  %1429 = vmatmul.bf16.gmra.mxu3 %v1067_v3  ;;  %v963_v12 = vsub.f32 %v867_v6, %v3080_v15  ;;  %v678_v18 = vadd.f32 %v2405_v51, %v3080_v15  ;;  %v2409_v11 = vcvt.s32.f32 %v2408_v53  ;;  %v394_v53 = vld [vmem:[%s3069_s30 + $0x150] sm:$0xff] }
  0xc0   : > { %v2428_v39 = vor.u32 %v2427_v24, %v2426_v10  ;;  %v870_v2 = vmin.f32 %v3097_v22, %v773_v58  ;;  %v2430_v54 = vand.u32 2147483647, %v489_v35  ;;  %v2432_v20 = vcvt.f32.s32 %v489_v35 }
  0xc1   : > { %v2435_v19 = vand.u32 2147483648, %v489_v35  ;;  %v774_v25 = vmax.f32 %v678_v18, 0.0  ;;  %v2410_v28 = vand.u32 2147483647, %v2409_v11  ;;  %v534_v27 = vmul.f32 %v3052_v7, %v437_v40  ;;  %v397_v11 = vld [vmem:[%s3069_s30 + $0x168] sm:$0xff] }
  0xc2   : > { %v2429_v16 = vsel %vm3783_vm1, %v2428_v39, %v488_v29  ;;  %v966_v30 = vsub.f32 %v870_v2, %v3080_v15  ;;  %vm3810_vm3 = vcmp.lt.f32.partialorder %v2430_v54, 8388608.0  ;;  %v2433_v8 = vcvt.s32.f32 %v2432_v20 }
  0xc3   : > { %v681_v61 = vadd.f32 %v2429_v16, %v3080_v15  ;;  %v871_v63 = vmin.f32 %v3097_v22, %v774_v25  ;;  %v2412_v31 = vor.u32 %v2411_v26, %v2410_v28  ;;  %v537_v45 = vmul.f32 %v3052_v7, %v440_v13 }
  0xc4   : > { %v2790_v29 = vand.u32 2147483647, %v534_v27  ;;  %v1044_v17 = vpack.c.bf16 %v966_v30, %v963_v12  ;;  %v2434_v36 = vand.u32 2147483647, %v2433_v8  ;;  %v2792_v37 = vcvt.f32.s32 %v534_v27 }
  0xc5   : > { %v777_v5 = vmax.f32 %v681_v61, 0.0  ;;  %v967_v41 = vsub.f32 %v871_v63, %v3080_v15  ;;  %v2413_v42 = vsel %vm3796_vm2, %v2412_v31, %v486_v21  ;;  %v2795_v4 = vand.u32 2147483648, %v534_v27 }
  0xc6   : > { %vm3820_vm4 = vcmp.lt.f32.partialorder %v2790_v29, 8388608.0  ;;  %1478 = vmatmul.bf16.gmra.mxu2 %v1044_v17  ;;  %v2436_v46 = vor.u32 %v2435_v19, %v2434_v36  ;;  %v679_v0 = vadd.f32 %v2413_v42, %v3080_v15  ;;  %v2793_v47 = vcvt.s32.f32 %v2792_v37  ;;  %v395_v37 = vld [vmem:[%s3069_s30 + $0x158] sm:$0xff] }
  0xc7   : > { %v874_v1 = vmin.f32 %v3097_v22, %v777_v5  ;;  %v2814_v44 = vand.u32 2147483647, %v537_v45  ;;  %v2816_v23 = vcvt.f32.s32 %v537_v45  ;;  %v2819_v50 = vand.u32 2147483648, %v537_v45 }
  0xc8   : > { %v487_v34 = vmul.f32 %v3052_v7, %v390_v38  ;;  %v2437_v33 = vsel %vm3810_vm3, %v2436_v46, %v489_v35  ;;  %v775_v49 = vmax.f32 %v679_v0, 0.0  ;;  %v2794_v24 = vand.u32 2147483647, %v2793_v47  ;;  %v398_v47 = vld [vmem:[%s3069_s30 + $0x170] sm:$0xff] }
  0xc9   : > { %v970_v9 = vsub.f32 %v874_v1, %v3080_v15  ;;  %v682_v21 = vadd.f32 %v2437_v33, %v3080_v15  ;;  %vm3832_vm5 = vcmp.lt.f32.partialorder %v2814_v44, 8388608.0  ;;  %v2817_v52 = vcvt.s32.f32 %v2816_v23 }
  0xca   : > { %v490_v56 = vmul.f32 %v3052_v7, %v393_v48  ;;  %v872_v57 = vmin.f32 %v3097_v22, %v775_v49  ;;  %v2796_v59 = vor.u32 %v2795_v4, %v2794_v24  ;;  %v2414_v60 = vand.u32 2147483647, %v487_v34 }
  0xcb   : > { %v1045_v32 = vpack.c.bf16 %v970_v9, %v967_v41  ;;  %v778_v3 = vmax.f32 %v682_v21, 0.0  ;;  %v2818_v6 = vand.u32 2147483647, %v2817_v52  ;;  %v2416_v35 = vcvt.f32.s32 %v487_v34 }
  0xcc   : > { %v2419_v10 = vand.u32 2147483648, %v487_v34  ;;  %v968_v58 = vsub.f32 %v872_v57, %v3080_v15  ;;  %v2797_v51 = vsel %vm3820_vm4, %v2796_v59, %v534_v27  ;;  %vm3842_vm6 = vcmp.lt.f32.partialorder %v2414_v60, 8388608.0 }
  0xcd   : > { %1305 = vmatmul.bf16.gmra.mxu0 %v1045_v32  ;;  %v2438_v26 = vand.u32 2147483647, %v490_v56  ;;  %v875_v40 = vmin.f32 %v3097_v22, %v778_v3  ;;  %v2820_v12 = vor.u32 %v2819_v50, %v2818_v6  ;;  %v727_v39 = vadd.f32 %v2797_v51, %v3080_v15 }
  0xce   : > { %v2417_v18 = vcvt.s32.f32 %v2416_v35  ;;  %v2440_v54 = vcvt.f32.s32 %v490_v56  ;;  %v2443_v20 = vand.u32 2147483648, %v490_v56  ;;  %v491_v19 = vmul.f32 %v3052_v7, %v394_v53 }
  0xcf   : > { %vm3849_vm7 = vcmp.lt.f32.partialorder %v2438_v26, 8388608.0  ;;  %v971_v13 = vsub.f32 %v875_v40, %v3080_v15  ;;  %v2821_v16 = vsel %vm3832_vm5, %v2820_v12, %v537_v45  ;;  %v823_v25 = vmax.f32 %v727_v39, 0.0 }
  0xd0   : > { %v2418_v28 = vand.u32 2147483647, %v2417_v18  ;;  %v730_v27 = vadd.f32 %v2821_v16, %v3080_v15  ;;  %v2441_v30 = vcvt.s32.f32 %v2440_v54  ;;  %v494_v61 = vmul.f32 %v3052_v7, %v397_v11  ;;  %v446_v18 = vld [vmem:[%s3069_s30 + $0x2f0] sm:$0xff] }
  0xd1   : > { %v2446_v14 = vand.u32 2147483647, %v491_v19  ;;  %v1046_v8 = vpack.c.bf16 %v971_v13, %v968_v58  ;;  %v920_v63 = vmin.f32 %v3097_v22, %v823_v25  ;;  %v2448_v29 = vcvt.f32.s32 %v491_v19 }
  0xd2   : > { %v2420_v31 = vor.u32 %v2419_v10, %v2418_v28  ;;  %v826_v17 = vmax.f32 %v730_v27, 0.0  ;;  %v2442_v5 = vand.u32 2147483647, %v2441_v30  ;;  %v2451_v45 = vand.u32 2147483648, %v491_v19  ;;  %v443_v10 = vld [vmem:[%s3069_s30 + $0x2d8] sm:$0xff] }
  0xd3   : > { %vm3860_vm8 = vcmp.lt.f32.partialorder %v2446_v14, 8388608.0  ;;  %1394 = vmatmul.bf16.gmra.mxu1 %v1046_v8  ;;  %v1016_v38 = vsub.f32 %v920_v63, %v3080_v15  ;;  %v2449_v42 = vcvt.s32.f32 %v2448_v29  ;;  %v2470_v43 = vand.u32 2147483647, %v494_v61  ;;  %v396_v29 = vld [vmem:[%s3069_s30 + $0x160] sm:$0xff] }
  0xd4   : > { %v2421_v41 = vsel %vm3842_vm6, %v2420_v31, %v487_v34  ;;  %v923_v4 = vmin.f32 %v3097_v22, %v826_v17  ;;  %v2444_v1 = vor.u32 %v2443_v20, %v2442_v5  ;;  %v2472_v0 = vcvt.f32.s32 %v494_v61 }
  0xd5   : > { %v680_v46 = vadd.f32 %v2421_v41, %v3080_v15  ;;  %v2450_v48 = vand.u32 2147483647, %v2449_v42  ;;  %vm3871_vm9 = vcmp.lt.f32.partialorder %v2470_v43, 8388608.0  ;;  %v2475_v23 = vand.u32 2147483648, %v494_v61  ;;  %v399_v43 = vld [vmem:[%s3069_s30 + $0x178] sm:$0xff] }
  0xd6   : > { %v492_v50 = vmul.f32 %v3052_v7, %v395_v37  ;;  %v1019_v9 = vsub.f32 %v923_v4, %v3080_v15  ;;  %v2445_v34 = vsel %vm3849_vm7, %v2444_v1, %v490_v56  ;;  %v2473_v49 = vcvt.s32.f32 %v2472_v0 }
  0xd7   : > { %v776_v33 = vmax.f32 %v680_v46, 0.0  ;;  %v683_v24 = vadd.f32 %v2445_v34, %v3080_v15  ;;  %v2452_v21 = vor.u32 %v2451_v45, %v2450_v48  ;;  %v495_v55 = vmul.f32 %v3052_v7, %v398_v47 }
  0xd8   : > { %v2454_v52 = vand.u32 2147483647, %v492_v50  ;;  %v1070_v32 = vpack.c.bf16 %v1019_v9, %v1016_v38  ;;  %v2474_v59 = vand.u32 2147483647, %v2473_v49  ;;  %v2456_v60 = vcvt.f32.s32 %v492_v50 }
  0xd9   : > { %v873_v57 = vmin.f32 %v3097_v22, %v776_v33  ;;  %v779_v3 = vmax.f32 %v683_v24, 0.0  ;;  %v2453_v6 = vsel %vm3860_vm8, %v2452_v21, %v491_v19  ;;  %v2459_v35 = vand.u32 2147483648, %v492_v50 }
  0xda   : > { %vm3884_vm10 = vcmp.lt.f32.partialorder %v2454_v52, 8388608.0  ;;  %1434 = vmatmul.bf16.gmra.mxu3 %v1070_v32  ;;  %v2476_v58 = vor.u32 %v2475_v23, %v2474_v59  ;;  %v684_v51 = vadd.f32 %v2453_v6, %v3080_v15  ;;  %v2457_v62 = vcvt.s32.f32 %v2456_v60 }
  0xdb   : > { %v969_v53 = vsub.f32 %v873_v57, %v3080_v15  ;;  %v876_v26 = vmin.f32 %v3097_v22, %v779_v3  ;;  %v2478_v40 = vand.u32 2147483647, %v495_v55  ;;  %v2480_v12 = vcvt.f32.s32 %v495_v55 }
  0xdc   : > { %v2483_v39 = vand.u32 2147483648, %v495_v55  ;;  %v2477_v11 = vsel %vm3871_vm9, %v2476_v58, %v494_v61  ;;  %v780_v2 = vmax.f32 %v684_v51, 0.0  ;;  %v2458_v54 = vand.u32 2147483647, %v2457_v62  ;;  %v1276_v51 = vpop.f32.mrf.mxu0  ;;  %v1365_v62 = vpop.f32.mrf.mxu1 }
  0xdd   : > { %v540_v20 = vmul.f32 %v3052_v7, %v443_v10  ;;  %v972_v19 = vsub.f32 %v876_v26, %v3080_v15  ;;  %v687_v13 = vadd.f32 %v2477_v11, %v3080_v15  ;;  %vm3898_vm11 = vcmp.lt.f32.partialorder %v2478_v40, 8388608.0  ;;  %v400_v26 = vld [vmem:[%s3069_s30 + $0x180] sm:$0xff]  ;;  %v403_v40 = vld [vmem:[%s3069_s30 + $0x198] sm:$0xff] }
  0xde   : > { %v2481_v25 = vcvt.s32.f32 %v2480_v12  ;;  %v877_v28 = vmin.f32 %v3097_v22, %v780_v2  ;;  %v2460_v27 = vor.u32 %v2459_v35, %v2458_v54  ;;  %v543_v30 = vmul.f32 %v3052_v7, %v446_v18  ;;  %v401_v2 = vld [vmem:[%s3069_s30 + $0x188] sm:$0xff] }
  0xdf   : > { %v2838_v61 = vand.u32 2147483647, %v540_v20  ;;  %v1047_v14 = vpack.c.bf16 %v972_v19, %v969_v53  ;;  %v783_v8 = vmax.f32 %v687_v13, 0.0  ;;  %v2840_v31 = vcvt.f32.s32 %v540_v20 }
  0xe0   : > { %v2482_v63 = vand.u32 2147483647, %v2481_v25  ;;  %v973_v17 = vsub.f32 %v877_v28, %v3080_v15  ;;  %v2461_v5 = vsel %vm3884_vm10, %v2460_v27, %v492_v50  ;;  %v2843_v45 = vand.u32 2147483648, %v540_v20 }
  0xe1   : > { %vm3908_vm12 = vcmp.lt.f32.partialorder %v2838_v61, 8388608.0  ;;  %1483 = vmatmul.bf16.gmra.mxu2 %v1047_v14  ;;  %v880_v37 = vmin.f32 %v3097_v22, %v783_v8  ;;  %v685_v41 = vadd.f32 %v2461_v5, %v3080_v15  ;;  %v2841_v42 = vcvt.s32.f32 %v2840_v31 }
  0xe2   : > { %v2484_v38 = vor.u32 %v2483_v39, %v2482_v63  ;;  %v2862_v4 = vand.u32 2147483647, %v543_v30  ;;  %v2864_v1 = vcvt.f32.s32 %v543_v30  ;;  %v2867_v46 = vand.u32 2147483648, %v543_v30 }
  0xe3   : > { %v493_v0 = vmul.f32 %v3052_v7, %v396_v29  ;;  %v976_v47 = vsub.f32 %v880_v37, %v3080_v15  ;;  %v781_v44 = vmax.f32 %v685_v41, 0.0  ;;  %v2842_v23 = vand.u32 2147483647, %v2841_v42 }
  0xe4   : > { %v2485_v48 = vsel %vm3898_vm11, %v2484_v38, %v495_v55  ;;  %vm3920_vm13 = vcmp.lt.f32.partialorder %v2862_v4, 8388608.0  ;;  %v2865_v34 = vcvt.s32.f32 %v2864_v1  ;;  %v496_v33 = vmul.f32 %v3052_v7, %v399_v43  ;;  %v404_v38 = vld [vmem:[%s3069_s30 + $0x1a0] sm:$0xff] }
  0xe5   : > { %v688_v50 = vadd.f32 %v2485_v48, %v3080_v15  ;;  %v1048_v49 = vpack.c.bf16 %v976_v47, %v973_v17  ;;  %v878_v24 = vmin.f32 %v3097_v22, %v781_v44  ;;  %v2844_v21 = vor.u32 %v2843_v45, %v2842_v23 }
  0xe6   : > { %v2462_v52 = vand.u32 2147483647, %v493_v0  ;;  %v2866_v55 = vand.u32 2147483647, %v2865_v34  ;;  %v2464_v57 = vcvt.f32.s32 %v493_v0  ;;  %v2467_v59 = vand.u32 2147483648, %v493_v0 }
  0xe7   : > { %v784_v32 = vmax.f32 %v688_v50, 0.0  ;;  %1310 = vmatmul.bf16.gmra.mxu0 %v1048_v49  ;;  %v974_v60 = vsub.f32 %v878_v24, %v3080_v15  ;;  %v2845_v3 = vsel %vm3908_vm12, %v2844_v21, %v540_v20  ;;  %v2486_v56 = vand.u32 2147483647, %v496_v33 }
  0xe8   : > { %vm3929_vm14 = vcmp.lt.f32.partialorder %v2462_v52, 8388608.0  ;;  %v2868_v10 = vor.u32 %v2867_v46, %v2866_v55  ;;  %v733_v53 = vadd.f32 %v2845_v3, %v3080_v15  ;;  %v2465_v58 = vcvt.s32.f32 %v2464_v57  ;;  %v1278_v46 = vpop.f32.mrf.mxu0 }
  0xe9   : > { %v881_v35 = vmin.f32 %v3097_v22, %v784_v32  ;;  %vm3937_vm15 = vcmp.lt.f32.partialorder %v2486_v56, 8388608.0  ;;  %v2488_v39 = vcvt.f32.s32 %v496_v33  ;;  %v2491_v18 = vand.u32 2147483648, %v496_v33 }
  0xea   : > { %v3941_v11 = vadd.f32 %v1365_v62, %v1276_v51  ;;  %v2869_v20 = vsel %vm3920_vm13, %v2868_v10, %v543_v30  ;;  %v829_v19 = vmax.f32 %v733_v53, 0.0  ;;  %v2466_v13 = vand.u32 2147483647, %v2465_v58  ;;  %v402_v10 = vld [vmem:[%s3069_s30 + $0x190] sm:$0xff]  ;;  %v405_v53 = vld [vmem:[%s3069_s30 + $0x1a8] sm:$0xff] }
  0xeb   : > { %v977_v54 = vsub.f32 %v881_v35, %v3080_v15  ;;  %v736_v16 = vadd.f32 %v2869_v20, %v3080_v15  ;;  %v2489_v25 = vcvt.s32.f32 %v2488_v39  ;;  %v497_v28 = vmul.f32 %v3052_v7, %v400_v26 }
  0xec   : > { %v500_v27 = vmul.f32 %v3052_v7, %v403_v40  ;;  %v926_v14 = vmin.f32 %v3097_v22, %v829_v19  ;;  %v2468_v8 = vor.u32 %v2467_v59, %v2466_v13  ;;  %v3952_v63 = vmul.f32 %v3052_v7, %v401_v2 }
  0xed   : > { %v1049_v61 = vpack.c.bf16 %v977_v54, %v974_v60  ;;  %v832_v31 = vmax.f32 %v736_v16, 0.0  ;;  %v2490_v29 = vand.u32 2147483647, %v2489_v25  ;;  %v2494_v30 = vand.u32 2147483647, %v497_v28 }
  0xee   : > { %v2496_v17 = vcvt.f32.s32 %v497_v28  ;;  %v1022_v5 = vsub.f32 %v926_v14, %v3080_v15  ;;  %v2469_v36 = vsel %vm3929_vm14, %v2468_v8, %v493_v0  ;;  %v2499_v45 = vand.u32 2147483648, %v497_v28 }
  0xef   : > { %1399 = vmatmul.bf16.gmra.mxu1 %v1049_v61  ;;  %v2518_v37 = vand.u32 2147483647, %v500_v27  ;;  %v929_v41 = vmin.f32 %v3097_v22, %v832_v31  ;;  %v2492_v42 = vor.u32 %v2491_v18, %v2490_v29  ;;  %v686_v43 = vadd.f32 %v2469_v36, %v3080_v15 }
  0xf0   : > { %vm3960_vm0 = vcmp.lt.f32.partialorder %v2494_v30, 8388608.0  ;;  %v2497_v1 = vcvt.s32.f32 %v2496_v17  ;;  %v2520_v47 = vcvt.f32.s32 %v500_v27  ;;  %v2523_v48 = vand.u32 2147483648, %v500_v27 }
  0xf1   : > { %vm3964_vm1 = vcmp.lt.f32.partialorder %v2518_v37, 8388608.0  ;;  %v1025_v0 = vsub.f32 %v929_v41, %v3080_v15  ;;  %v2493_v44 = vsel %vm3937_vm15, %v2492_v42, %v496_v33  ;;  %v782_v23 = vmax.f32 %v686_v43, 0.0  ;;  %v1454_v41 = vpop.f32.mrf.mxu2 }
  0xf2   : > { %v501_v50 = vmul.f32 %v3052_v7, %v404_v38  ;;  %v689_v9 = vadd.f32 %v2493_v44, %v3080_v15  ;;  %v2498_v34 = vand.u32 2147483647, %v2497_v1  ;;  %v2521_v49 = vcvt.s32.f32 %v2520_v47  ;;  %v426_v38 = vld [vmem:[%s3069_s30 + $0x250] sm:$0xff]  ;;  %v429_v1 = vld [vmem:[%s3069_s30 + $0x268] sm:$0xff]  ;;  %v1367_v47 = vpop.f32.mrf.mxu1 }
  0xf3   : > { %v2502_v24 = vand.u32 2147483647, %v3952_v63  ;;  %v1073_v21 = vpack.c.bf16 %v1025_v0, %v1022_v5  ;;  %v879_v52 = vmin.f32 %v3097_v22, %v782_v23  ;;  %v2504_v32 = vcvt.f32.s32 %v3952_v63 }
  0xf4   : > { %v2507_v55 = vand.u32 2147483648, %v3952_v63  ;;  %v785_v57 = vmax.f32 %v689_v9, 0.0  ;;  %v2500_v33 = vor.u32 %v2499_v45, %v2498_v34  ;;  %v2522_v59 = vand.u32 2147483647, %v2521_v49 }
  0xf5   : > { %vm3977_vm2 = vcmp.lt.f32.partialorder %v2502_v24, 8388608.0  ;;  %1439 = vmatmul.bf16.gmra.mxu3 %v1073_v21  ;;  %v975_v3 = vsub.f32 %v879_v52, %v3080_v15  ;;  %v2505_v6 = vcvt.s32.f32 %v2504_v32  ;;  %v2526_v56 = vand.u32 2147483647, %v501_v50 }
  0xf6   : > { %v2528_v35 = vcvt.f32.s32 %v501_v50  ;;  %v882_v58 = vmin.f32 %v3097_v22, %v785_v57  ;;  %v2501_v51 = vsel %vm3960_vm0, %v2500_v33, %v497_v28  ;;  %v2524_v62 = vor.u32 %v2523_v48, %v2522_v59 }
  0xf7   : > { %v2531_v26 = vand.u32 2147483648, %v501_v50  ;;  %v690_v40 = vadd.f32 %v2501_v51, %v3080_v15  ;;  %v2506_v12 = vand.u32 2147483647, %v2505_v6  ;;  %vm3988_vm3 = vcmp.lt.f32.partialorder %v2526_v56, 8388608.0  ;;  %v4041_v51 = vld [vmem:[%s4563_s3] ss:$0 sm:$0xff] }
  0xf8   : > { %v2529_v18 = vcvt.s32.f32 %v2528_v35  ;;  %v978_v2 = vsub.f32 %v882_v58, %v3080_v15  ;;  %v2525_v54 = vsel %vm3964_vm1, %v2524_v62, %v500_v27  ;;  %v499_v20 = vmul.f32 %v3052_v7, %v402_v10 }
  0xf9   : > { %v3997_v19 = vmul.f32 %v3052_v7, %v405_v53  ;;  %v693_v13 = vadd.f32 %v2525_v54, %v3080_v15  ;;  %v786_v16 = vmax.f32 %v690_v40, 0.0  ;;  %v2508_v25 = vor.u32 %v2507_v55, %v2506_v12 }
  0xfa   : > { %v2530_v28 = vand.u32 2147483647, %v2529_v18  ;;  %v1050_v61 = vpack.c.bf16 %v978_v2, %v975_v3  ;;  %v2510_v14 = vand.u32 2147483647, %v499_v20  ;;  %v2512_v8 = vcvt.f32.s32 %v499_v20 }
  0xfb   : > { %v2515_v31 = vand.u32 2147483648, %v499_v20  ;;  %v789_v29 = vmax.f32 %v693_v13, 0.0  ;;  %v883_v30 = vmin.f32 %v3097_v22, %v786_v16  ;;  %v2509_v27 = vsel %vm3977_vm2, %v2508_v25, %v3952_v63  ;;  %v406_v13 = vld [vmem:[%s3069_s30 + $0x1b0] sm:$0xff] }
  0xfc   : > { %v2532_v17 = vor.u32 %v2531_v26, %v2530_v28  ;;  %1488 = vmatmul.bf16.gmra.mxu2 %v1050_v61  ;;  %v691_v5 = vadd.f32 %v2509_v27, %v3080_v15  ;;  %vm4005_vm4 = vcmp.lt.f32.partialorder %v2510_v14, 8388608.0  ;;  %v2513_v45 = vcvt.s32.f32 %v2512_v8  ;;  %v409_v27 = vld [vmem:[%s3069_s30 + $0x1c8] sm:$0xff]  ;;  %v4111_v28 = vpop.f32.mrf.mxu3 }
  0xfd   : > { %v2534_v37 = vand.u32 2147483647, %v3997_v19  ;;  %v886_v42 = vmin.f32 %v3097_v22, %v789_v29  ;;  %v979_v43 = vsub.f32 %v883_v30, %v3080_v15  ;;  %v2536_v4 = vcvt.f32.s32 %v3997_v19  ;;  %v1281_v29 = vpop.f32.mrf.mxu0  ;;  %v1370_v30 = vpop.f32.mrf.mxu1 }
  0xfe   : > { %v2533_v63 = vsel %vm3988_vm3, %v2532_v17, %v501_v50  ;;  %v787_v0 = vmax.f32 %v691_v5, 0.0  ;;  %v2514_v44 = vand.u32 2147483647, %v2513_v45  ;;  %v2539_v49 = vand.u32 2147483648, %v3997_v19 }
  0xff   : > { %v694_v48 = vadd.f32 %v2533_v63, %v3080_v15  ;;  %vm4018_vm5 = vcmp.lt.f32.partialorder %v2534_v37, 8388608.0  ;;  %v982_v9 = vsub.f32 %v886_v42, %v3080_v15  ;;  %v2537_v34 = vcvt.s32.f32 %v2536_v4 }
 0x100   : > { %v523_v50 = vmul.f32 %v3052_v7, %v426_v38  ;;  %v884_v21 = vmin.f32 %v3097_v22, %v787_v0  ;;  %v2516_v52 = vor.u32 %v2515_v31, %v2514_v44  ;;  %v4027_v32 = vmul.f32 %v3052_v7, %v429_v1 }
 0x101   : > { %v790_v24 = vmax.f32 %v694_v48, 0.0  ;;  %v1051_v55 = vpack.c.bf16 %v982_v9, %v979_v43  ;;  %v2538_v57 = vand.u32 2147483647, %v2537_v34  ;;  %v1455_v54 = vadd.f32 %v1454_v41, %v3941_v11 }
 0x102   : > { %v2702_v33 = vand.u32 2147483647, %v523_v50  ;;  %v2704_v59 = vcvt.f32.s32 %v523_v50  ;;  %v980_v3 = vsub.f32 %v884_v21, %v3080_v15  ;;  %v2517_v6 = vsel %vm4005_vm4, %v2516_v52, %v499_v20  ;;  %v4055_v20 = vld [vmem:[%s4564_s4] ss:$0 sm:$0xff] }
 0x103   : > { %v887_v60 = vmin.f32 %v3097_v22, %v790_v24  ;;  %v2707_v56 = vand.u32 2147483648, %v523_v50  ;;  %1315 = vmatmul.bf16.gmra.mxu0 %v1051_v55  ;;  %v2540_v35 = vor.u32 %v2539_v49, %v2538_v57  ;;  %v692_v10 = vadd.f32 %v2517_v6, %v3080_v15  ;;  %v407_v49 = vld [vmem:[%s3069_s30 + $0x1b8] sm:$0xff]  ;;  %v410_v55 = vld [vmem:[%s3069_s30 + $0x1d0] sm:$0xff]  ;;  %v408_v57 = vld [vmem:[%s3069_s30 + $0x1c0] sm:$0xff] }
 0x104   : > { %vm4034_vm6 = vcmp.lt.f32.partialorder %v2702_v33, 8388608.0  ;;  %v2705_v58 = vcvt.s32.f32 %v2704_v59  ;;  %v2726_v26 = vand.u32 2147483647, %v4027_v32  ;;  %v2728_v40 = vcvt.f32.s32 %v4027_v32 }
 0x105   : > { %v983_v62 = vsub.f32 %v887_v60, %v3080_v15  ;;  %v2731_v12 = vand.u32 2147483648, %v4027_v32  ;;  %v2541_v39 = vsel %vm4018_vm5, %v2540_v35, %v3997_v19  ;;  %v788_v18 = vmax.f32 %v692_v10, 0.0  ;;  %v1456_v19 = vpop.f32.mrf.mxu2 }
 0x106   : > { %v2706_v2 = vand.u32 2147483647, %v2705_v58  ;;  %v695_v25 = vadd.f32 %v2541_v39, %v3080_v15  ;;  %vm4059_vm7 = vcmp.lt.f32.partialorder %v2726_v26, 8388608.0  ;;  %v2729_v61 = vcvt.s32.f32 %v2728_v40 }
 0x107   : > { %v1052_v16 = vpack.c.bf16 %v983_v62, %v980_v3  ;;  %v885_v14 = vmin.f32 %v3097_v22, %v788_v18  ;;  %v1709_v11 = vmul.f32 %v4041_v51, %v1455_v54  ;;  %v1368_v31 = vadd.f32 %v1367_v47, %v1278_v46 }
 0x108   : > { %v2708_v8 = vor.u32 %v2707_v56, %v2706_v2  ;;  %v791_v17 = vmax.f32 %v695_v25, 0.0  ;;  %v2730_v5 = vand.u32 2147483647, %v2729_v61  ;;  %v4071_v36 = vadd.f32 %v1370_v30, %v1281_v29 }
 0x109   : > { %1404 = vmatmul.bf16.gmra.mxu1 %v1052_v16  ;;  %v503_v45 = vmul.f32 %v3052_v7, %v406_v13  ;;  %v981_v37 = vsub.f32 %v885_v14, %v3080_v15  ;;  %v1745_v41 = vadd.f32 %v4055_v20, %v1709_v11  ;;  %v1457_v42 = vadd.f32 %v1456_v19, %v1368_v31  ;;  %v411_v16 = vld [vmem:[%s3069_s30 + $0x1d8] sm:$0xff] }
 0x10a   : > { %v2709_v38 = vsel %vm4034_vm6, %v2708_v8, %v523_v50  ;;  %v888_v43 = vmin.f32 %v3097_v22, %v791_v17  ;;  %v2732_v63 = vor.u32 %v2731_v12, %v2730_v5  ;;  %v506_v1 = vmul.f32 %v3052_v7, %v409_v27 }
 0x10b   : > { %v716_v4 = vadd.f32 %v2709_v38, %v3080_v15  ;;  %1777 = vst [vmem:[%s4069_s26] sm:$0xff] %v1745_v41  ;;  %v1710_v46 = vmul.f32 %v4041_v51, %v1457_v42  ;;  %v2542_v47 = vand.u32 2147483647, %v503_v45  ;;  %v2544_v48 = vcvt.f32.s32 %v503_v45 }
 0x10c   : > { %v2547_v0 = vand.u32 2147483648, %v503_v45  ;;  %v984_v44 = vsub.f32 %v888_v43, %v3080_v15  ;;  %v2733_v23 = vsel %vm4059_vm7, %v2732_v63, %v4027_v32  ;;  %v2566_v34 = vand.u32 2147483647, %v506_v1 }
 0x10d   : > { %v812_v9 = vmax.f32 %v716_v4, 0.0  ;;  %v719_v50 = vadd.f32 %v2733_v23, %v3080_v15  ;;  %v1746_v24 = vadd.f32 %v4055_v20, %v1710_v46  ;;  %vm4090_vm8 = vcmp.lt.f32.partialorder %v2542_v47, 8388608.0 }
 0x10e   : > { %v2545_v52 = vcvt.s32.f32 %v2544_v48  ;;  %v1053_v33 = vpack.c.bf16 %v984_v44, %v981_v37  ;;  %vm4097_vm9 = vcmp.lt.f32.partialorder %v2566_v34, 8388608.0  ;;  %v2568_v32 = vcvt.f32.s32 %v506_v1  ;;  %v432_v34 = vld [vmem:[%s3069_s30 + $0x280] sm:$0xff] }
 0x10f   : > { %v909_v59 = vmin.f32 %v3097_v22, %v812_v9  ;;  %v815_v3 = vmax.f32 %v719_v50, 0.0  ;;  %1778 = vst [vmem:[%s4069_s26 + $0x8] sm:$0xff] %v1746_v24  ;;  %v2571_v56 = vand.u32 2147483648, %v506_v1  ;;  %v504_v35 = vmul.f32 %v3052_v7, %v407_v49  ;;  %v435_v49 = vld [vmem:[%s3069_s30 + $0x298] sm:$0xff]  ;;  %v1459_v50 = vpop.f32.mrf.mxu2 }
 0x110   : > { %v2546_v6 = vand.u32 2147483647, %v2545_v52  ;;  %1493 = vmatmul.bf16.gmra.mxu2 %v1053_v33  ;;  %v2569_v53 = vcvt.s32.f32 %v2568_v32  ;;  %v507_v58 = vmul.f32 %v3052_v7, %v410_v55  ;;  %v4106_v62 = vmul.f32 %v3052_v7, %v408_v57  ;;  %v1283_v57 = vpop.f32.mrf.mxu0  ;;  %v1372_v33 = vpop.f32.mrf.mxu1 }
 0x111   : > { %v1005_v10 = vsub.f32 %v909_v59, %v3080_v15  ;;  %v912_v26 = vmin.f32 %v3097_v22, %v815_v3  ;;  %v2550_v12 = vand.u32 2147483647, %v504_v35  ;;  %v2552_v39 = vcvt.f32.s32 %v504_v35 }
 0x112   : > { %v2548_v40 = vor.u32 %v2547_v0, %v2546_v6  ;;  %v2570_v18 = vand.u32 2147483647, %v2569_v53  ;;  %v2555_v2 = vand.u32 2147483648, %v504_v35  ;;  %v2574_v54 = vand.u32 2147483647, %v507_v58  ;;  %v4154_v53 = vpop.f32.mrf.mxu3 }
 0x113   : > { %v2576_v13 = vcvt.f32.s32 %v507_v58  ;;  %v1008_v25 = vsub.f32 %v912_v26, %v3080_v15  ;;  %vm4115_vm10 = vcmp.lt.f32.partialorder %v2550_v12, 8388608.0  ;;  %v2553_v14 = vcvt.s32.f32 %v2552_v39 }
 0x114   : > { %v2549_v61 = vsel %vm4090_vm8, %v2548_v40, %v503_v45  ;;  %v2572_v8 = vor.u32 %v2571_v56, %v2570_v18  ;;  %vm4120_vm11 = vcmp.lt.f32.partialorder %v2574_v54, 8388608.0  ;;  %v2579_v17 = vand.u32 2147483648, %v507_v58 }
 0x115   : > { %v696_v11 = vadd.f32 %v2549_v61, %v3080_v15  ;;  %v2577_v29 = vcvt.s32.f32 %v2576_v13  ;;  %v1065_v30 = vpack.c.bf16 %v1008_v25, %v1005_v10  ;;  %v2554_v27 = vand.u32 2147483647, %v2553_v14 }
 0x116   : > { %v508_v5 = vmul.f32 %v3052_v7, %v411_v16  ;;  %v2573_v45 = vsel %vm4097_vm9, %v2572_v8, %v506_v1  ;;  %v2558_v41 = vand.u32 2147483647, %v4106_v62  ;;  %v2560_v63 = vcvt.f32.s32 %v4106_v62 }
 0x117   : > { %v792_v37 = vmax.f32 %v696_v11, 0.0  ;;  %v2578_v38 = vand.u32 2147483647, %v2577_v29  ;;  %1513 = vmatmul.bf16.vlgmr.msra.gmra.mxu3 %v1065_v30  ;;  %v699_v42 = vadd.f32 %v2573_v45, %v3080_v15  ;;  %v2556_v43 = vor.u32 %v2555_v2, %v2554_v27 }
 0x118   : > { %v2563_v4 = vand.u32 2147483648, %v4106_v62  ;;  %vm4132_vm12 = vcmp.lt.f32.partialorder %v2558_v41, 8388608.0  ;;  %v2582_v1 = vand.u32 2147483647, %v508_v5  ;;  %v2561_v23 = vcvt.s32.f32 %v2560_v63  ;;  %v1461_v63 = vpop.f32.mrf.mxu2 }
 0x119   : > { %v889_v46 = vmin.f32 %v3097_v22, %v792_v37  ;;  %v2580_v47 = vor.u32 %v2579_v17, %v2578_v38  ;;  %v795_v0 = vmax.f32 %v699_v42, 0.0  ;;  %v2557_v44 = vsel %vm4115_vm10, %v2556_v43, %v504_v35  ;;  %v412_v38 = vld [vmem:[%s3069_s30 + $0x1e0] sm:$0xff] }
 0x11a   : > { %v2584_v9 = vcvt.f32.s32 %v508_v5  ;;  %v697_v52 = vadd.f32 %v2557_v44, %v3080_v15  ;;  %vm4144_vm13 = vcmp.lt.f32.partialorder %v2582_v1, 8388608.0  ;;  %v2562_v32 = vand.u32 2147483647, %v2561_v23  ;;  %v1286_v1 = vpop.f32.mrf.mxu0  ;;  %v415_v44 = vld [vmem:[%s3069_s30 + $0x1f8] sm:$0xff] }
 0x11b   : > { %v985_v24 = vsub.f32 %v889_v46, %v3080_v15  ;;  %v2581_v21 = vsel %vm4120_vm11, %v2580_v47, %v507_v58  ;;  %v892_v59 = vmin.f32 %v3097_v22, %v795_v0  ;;  %v2587_v56 = vand.u32 2147483648, %v508_v5  ;;  %v1375_v0 = vpop.f32.mrf.mxu1 }
 0x11c   : > { %v700_v60 = vadd.f32 %v2581_v21, %v3080_v15  ;;  %v2585_v3 = vcvt.s32.f32 %v2584_v9  ;;  %v793_v6 = vmax.f32 %v697_v52, 0.0  ;;  %v529_v35 = vmul.f32 %v3052_v7, %v432_v34 }
 0x11d   : > { %v4152_v10 = vmul.f32 %v3052_v7, %v435_v49  ;;  %v988_v58 = vsub.f32 %v892_v59, %v3080_v15  ;;  %v2564_v40 = vor.u32 %v2563_v4, %v2562_v32  ;;  %v1373_v48 = vadd.f32 %v1372_v33, %v1283_v57  ;;  %v4192_v57 = vpop.f32.mrf.mxu3 }
 0x11e   : > { %v796_v26 = vmax.f32 %v700_v60, 0.0  ;;  %v2586_v12 = vand.u32 2147483647, %v2585_v3  ;;  %v890_v39 = vmin.f32 %v3097_v22, %v793_v6  ;;  %v2750_v18 = vand.u32 2147483647, %v529_v35 }
 0x11f   : > { %v2752_v2 = vcvt.f32.s32 %v529_v35  ;;  %v2755_v54 = vand.u32 2147483648, %v529_v35  ;;  %v1054_v13 = vpack.c.bf16 %v988_v58, %v985_v24  ;;  %v2565_v25 = vsel %vm4132_vm12, %v2564_v40, %v4106_v62 }
 0x120   : > { %v893_v16 = vmin.f32 %v3097_v22, %v796_v26  ;;  %v2588_v61 = vor.u32 %v2587_v56, %v2586_v12  ;;  %v986_v19 = vsub.f32 %v890_v39, %v3080_v15  ;;  %v698_v14 = vadd.f32 %v2565_v25, %v3080_v15  ;;  %v413_v56 = vld [vmem:[%s3069_s30 + $0x1e8] sm:$0xff]  ;;  %v416_v12 = vld [vmem:[%s3069_s30 + $0x200] sm:$0xff] }
 0x121   : > { %vm4164_vm14 = vcmp.lt.f32.partialorder %v2750_v18, 8388608.0  ;;  %v2753_v11 = vcvt.s32.f32 %v2752_v2  ;;  %1320 = vmatmul.bf16.gmra.mxu0 %v1054_v13  ;;  %v2774_v30 = vand.u32 2147483647, %v4152_v10  ;;  %v2776_v62 = vcvt.f32.s32 %v4152_v10  ;;  %v414_v13 = vld [vmem:[%s3069_s30 + $0x1f0] sm:$0xff] }
 0x122   : > { %v989_v31 = vsub.f32 %v893_v16, %v3080_v15  ;;  %v2589_v29 = vsel %vm4144_vm13, %v2588_v61, %v508_v5  ;;  %v794_v17 = vmax.f32 %v698_v14, 0.0  ;;  %v2779_v37 = vand.u32 2147483648, %v4152_v10 }
 0x123   : > { %v701_v27 = vadd.f32 %v2589_v29, %v3080_v15  ;;  %v2754_v45 = vand.u32 2147483647, %v2753_v11  ;;  %vm4176_vm15 = vcmp.lt.f32.partialorder %v2774_v30, 8388608.0  ;;  %v2777_v43 = vcvt.s32.f32 %v2776_v62 }
 0x124   : > { %v1055_v41 = vpack.c.bf16 %v989_v31, %v986_v19  ;;  %v1460_v5 = vadd.f32 %v1459_v50, %v4071_v36  ;;  %v891_v46 = vmin.f32 %v3097_v22, %v794_v17  ;;  %v4184_v34 = vadd.f32 %v1375_v0, %v1286_v1 }
 0x125   : > { %v797_v4 = vmax.f32 %v701_v27, 0.0  ;;  %v2756_v47 = vor.u32 %v2755_v54, %v2754_v45  ;;  %v2778_v23 = vand.u32 2147483647, %v2777_v43  ;;  %v509_v49 = vmul.f32 %v3052_v7, %v412_v38 }
 0x126   : > { %1409 = vmatmul.bf16.gmra.mxu1 %v1055_v41  ;;  %v1711_v9 = vmul.f32 %v4041_v51, %v1460_v5  ;;  %v987_v50 = vsub.f32 %v891_v46, %v3080_v15  ;;  %v1462_v21 = vadd.f32 %v1461_v63, %v1373_v48  ;;  %v512_v59 = vmul.f32 %v3052_v7, %v415_v44  ;;  %v417_v5 = vld [vmem:[%s3069_s30 + $0x208] sm:$0xff]  ;;  %v4230_v48 = vpop.f32.mrf.mxu3 }
 0x127   : > { %v894_v36 = vmin.f32 %v3097_v22, %v797_v4  ;;  %v2757_v24 = vsel %vm4164_vm14, %v2756_v47, %v529_v35  ;;  %v2780_v52 = vor.u32 %v2779_v37, %v2778_v23  ;;  %v2590_v3 = vand.u32 2147483647, %v509_v49 }
 0x128   : > { %v722_v55 = vadd.f32 %v2757_v24, %v3080_v15  ;;  %v1747_v33 = vadd.f32 %v4055_v20, %v1711_v9  ;;  %v1712_v32 = vmul.f32 %v4041_v51, %v1462_v21  ;;  %v2592_v6 = vcvt.f32.s32 %v509_v49 }
 0x129   : > { %v990_v60 = vsub.f32 %v894_v36, %v3080_v15  ;;  %v2781_v35 = vsel %vm4176_vm15, %v2780_v52, %v4152_v10  ;;  %v2595_v26 = vand.u32 2147483648, %v509_v49  ;;  %v2614_v40 = vand.u32 2147483647, %v512_v59  ;;  %v1288_v10 = vpop.f32.mrf.mxu0 }
 0x12a   : > { %v818_v58 = vmax.f32 %v722_v55, 0.0  ;;  %1779 = vst [vmem:[%s4069_s26 + $0x10] sm:$0xff] %v1747_v33  ;;  %v725_v18 = vadd.f32 %v2781_v35, %v3080_v15  ;;  %v1748_v2 = vadd.f32 %v4055_v20, %v1712_v32  ;;  %vm4206_vm0 = vcmp.lt.f32.partialorder %v2590_v3, 8388608.0 }
 0x12b   : > { %v1056_v39 = vpack.c.bf16 %v990_v60, %v987_v50  ;;  %v2593_v25 = vcvt.s32.f32 %v2592_v6  ;;  %vm4212_vm1 = vcmp.lt.f32.partialorder %v2614_v40, 8388608.0  ;;  %v2616_v61 = vcvt.f32.s32 %v512_v59 }
 0x12c   : > { %v915_v16 = vmin.f32 %v3097_v22, %v818_v58  ;;  %v821_v19 = vmax.f32 %v725_v18, 0.0  ;;  %1780 = vst [vmem:[%s4069_s26 + $0x18] sm:$0xff] %v1748_v2  ;;  %v2619_v14 = vand.u32 2147483648, %v512_v59  ;;  %v510_v8 = vmul.f32 %v3052_v7, %v413_v56  ;;  %v1464_v18 = vpop.f32.mrf.mxu2 }
 0x12d   : > { %1498 = vmatmul.bf16.gmra.mxu2 %v1056_v39  ;;  %v513_v11 = vmul.f32 %v3052_v7, %v416_v12  ;;  %v2594_v29 = vand.u32 2147483647, %v2593_v25  ;;  %v2617_v30 = vcvt.s32.f32 %v2616_v61  ;;  %v4221_v62 = vmul.f32 %v3052_v7, %v414_v13  ;;  %v438_v39 = vld [vmem:[%s3069_s30 + $0x2b0] sm:$0xff]  ;;  %v441_v25 = vld [vmem:[%s3069_s30 + $0x2c8] sm:$0xff]  ;;  %v1377_v61 = vpop.f32.mrf.mxu1 }
 0x12e   : > { %v1011_v31 = vsub.f32 %v915_v16, %v3080_v15  ;;  %v918_v27 = vmin.f32 %v3097_v22, %v821_v19  ;;  %v2598_v17 = vand.u32 2147483647, %v510_v8  ;;  %v2600_v45 = vcvt.f32.s32 %v510_v8 }
 0x12f   : > { %v2603_v37 = vand.u32 2147483648, %v510_v8  ;;  %v2596_v38 = vor.u32 %v2595_v26, %v2594_v29  ;;  %v2618_v41 = vand.u32 2147483647, %v2617_v30  ;;  %v2622_v42 = vand.u32 2147483647, %v513_v11 }
 0x130   : > { %v2624_v43 = vcvt.f32.s32 %v513_v11  ;;  %v1014_v63 = vsub.f32 %v918_v27, %v3080_v15  ;;  %vm4226_vm2 = vcmp.lt.f32.partialorder %v2598_v17, 8388608.0  ;;  %v2601_v46 = vcvt.s32.f32 %v2600_v45 }
 0x131   : > { %v2627_v47 = vand.u32 2147483648, %v513_v11  ;;  %v2597_v1 = vsel %vm4206_vm0, %v2596_v38, %v509_v49  ;;  %v2620_v0 = vor.u32 %v2619_v14, %v2618_v41  ;;  %vm4234_vm3 = vcmp.lt.f32.partialorder %v2622_v42, 8388608.0 }
 0x132   : > { %v2625_v23 = vcvt.s32.f32 %v2624_v43  ;;  %v1068_v9 = vpack.c.bf16 %v1014_v63, %v1011_v31  ;;  %v702_v36 = vadd.f32 %v2597_v1, %v3080_v15  ;;  %v2602_v50 = vand.u32 2147483647, %v2601_v46  ;;  %v4274_v63 = vpop.f32.mrf.mxu3 }
 0x133   : > { %v514_v24 = vmul.f32 %v3052_v7, %v417_v5  ;;  %v2621_v21 = vsel %vm4212_vm1, %v2620_v0, %v512_v59  ;;  %v2606_v55 = vand.u32 2147483647, %v4221_v62  ;;  %v2608_v49 = vcvt.f32.s32 %v4221_v62 }
 0x134   : > { %v2626_v52 = vand.u32 2147483647, %v2625_v23  ;;  %1518 = vmatmul.bf16.gmra.mxu3 %v1068_v9  ;;  %v705_v33 = vadd.f32 %v2621_v21, %v3080_v15  ;;  %v798_v60 = vmax.f32 %v702_v36, 0.0  ;;  %v2604_v32 = vor.u32 %v2603_v37, %v2602_v50  ;;  %v1466_v56 = vpop.f32.mrf.mxu2 }
 0x135   : > { %v2611_v3 = vand.u32 2147483648, %v4221_v62  ;;  %vm4246_vm4 = vcmp.lt.f32.partialorder %v2606_v55, 8388608.0  ;;  %v2609_v59 = vcvt.s32.f32 %v2608_v49  ;;  %v2630_v35 = vand.u32 2147483647, %v514_v24 }
 0x136   : > { %v2628_v6 = vor.u32 %v2627_v47, %v2626_v52  ;;  %v801_v58 = vmax.f32 %v705_v33, 0.0  ;;  %v895_v26 = vmin.f32 %v3097_v22, %v798_v60  ;;  %v2605_v40 = vsel %vm4226_vm2, %v2604_v32, %v510_v8  ;;  %v418_v60 = vld [vmem:[%s3069_s30 + $0x210] sm:$0xff] }
 0x137   : > { %v2632_v12 = vcvt.f32.s32 %v514_v24  ;;  %v703_v54 = vadd.f32 %v2605_v40, %v3080_v15  ;;  %v2610_v13 = vand.u32 2147483647, %v2609_v59  ;;  %vm4257_vm5 = vcmp.lt.f32.partialorder %v2630_v35, 8388608.0  ;;  %v1291_v40 = vpop.f32.mrf.mxu0 }
 0x138   : > { %v2629_v2 = vsel %vm4234_vm3, %v2628_v6, %v513_v11  ;;  %v898_v19 = vmin.f32 %v3097_v22, %v801_v58  ;;  %v991_v14 = vsub.f32 %v895_v26, %v3080_v15  ;;  %v2635_v11 = vand.u32 2147483648, %v514_v24 }
 0x139   : > { %v706_v8 = vadd.f32 %v2629_v2, %v3080_v15  ;;  %v2633_v31 = vcvt.s32.f32 %v2632_v12  ;;  %v799_v29 = vmax.f32 %v703_v54, 0.0  ;;  %v2612_v30 = vor.u32 %v2611_v3, %v2610_v13  ;;  %v1380_v12 = vpop.f32.mrf.mxu1 }
 0x13a   : > { %v535_v27 = vmul.f32 %v3052_v7, %v438_v39  ;;  %v994_v17 = vsub.f32 %v898_v19, %v3080_v15  ;;  %v4268_v38 = vmul.f32 %v3052_v7, %v441_v25  ;;  %v1378_v26 = vadd.f32 %v1377_v61, %v1288_v10  ;;  %v421_v39 = vld [vmem:[%s3069_s30 + $0x228] sm:$0xff] }
 0x13b   : > { %v802_v45 = vmax.f32 %v706_v8, 0.0  ;;  %v2634_v37 = vand.u32 2147483647, %v2633_v31  ;;  %v896_v41 = vmin.f32 %v3097_v22, %v799_v29  ;;  %v2613_v42 = vsel %vm4246_vm4, %v2612_v30, %v4221_v62  ;;  %v4312_v30 = vpop.f32.mrf.mxu3 }
 0x13c   : > { %v2798_v43 = vand.u32 2147483647, %v535_v27  ;;  %v2800_v5 = vcvt.f32.s32 %v535_v27  ;;  %v1057_v4 = vpack.c.bf16 %v994_v17, %v991_v14  ;;  %v704_v1 = vadd.f32 %v2613_v42, %v3080_v15 }
 0x13d   : > { %v899_v46 = vmin.f32 %v3097_v22, %v802_v45  ;;  %v2636_v47 = vor.u32 %v2635_v11, %v2634_v37  ;;  %v992_v0 = vsub.f32 %v896_v41, %v3080_v15  ;;  %v2803_v9 = vand.u32 2147483648, %v535_v27  ;;  %v422_v45 = vld [vmem:[%s3069_s30 + $0x230] sm:$0xff] }
 0x13e   : > { %vm4279_vm6 = vcmp.lt.f32.partialorder %v2798_v43, 8388608.0  ;;  %v2801_v23 = vcvt.s32.f32 %v2800_v5  ;;  %1325 = vmatmul.bf16.gmra.mxu0 %v1057_v4  ;;  %v800_v50 = vmax.f32 %v704_v1, 0.0  ;;  %v2822_v21 = vand.u32 2147483647, %v4268_v38  ;;  %v420_v1 = vld [vmem:[%s3069_s30 + $0x220] sm:$0xff] }
 0x13f   : > { %v995_v62 = vsub.f32 %v899_v46, %v3080_v15  ;;  %v2637_v36 = vsel %vm4257_vm5, %v2636_v47, %v514_v24  ;;  %v2824_v49 = vcvt.f32.s32 %v4268_v38  ;;  %v2827_v33 = vand.u32 2147483648, %v4268_v38 }
 0x140   : > { %v707_v52 = vadd.f32 %v2637_v36, %v3080_v15  ;;  %v2802_v55 = vand.u32 2147483647, %v2801_v23  ;;  %v897_v3 = vmin.f32 %v3097_v22, %v800_v50  ;;  %vm4292_vm7 = vcmp.lt.f32.partialorder %v2822_v21, 8388608.0 }
 0x141   : > { %v1058_v32 = vpack.c.bf16 %v995_v62, %v992_v0  ;;  %v1465_v24 = vadd.f32 %v1464_v18, %v4184_v34  ;;  %v2825_v58 = vcvt.s32.f32 %v2824_v49  ;;  %v4300_v13 = vadd.f32 %v1380_v12, %v1291_v40 }
 0x142   : > { %v803_v59 = vmax.f32 %v707_v52, 0.0  ;;  %v2804_v35 = vor.u32 %v2803_v9, %v2802_v55  ;;  %v993_v2 = vsub.f32 %v897_v3, %v3080_v15  ;;  %v515_v16 = vmul.f32 %v3052_v7, %v418_v60 }
 0x143   : > { %1414 = vmatmul.bf16.gmra.mxu1 %v1058_v32  ;;  %v1713_v54 = vmul.f32 %v4041_v51, %v1465_v24  ;;  %v2826_v25 = vand.u32 2147483647, %v2825_v58  ;;  %v1467_v10 = vadd.f32 %v1466_v56, %v1378_v26  ;;  %v4309_v14 = vmul.f32 %v3052_v7, %v421_v39 }
 0x144   : > { %v900_v34 = vmin.f32 %v3097_v22, %v803_v59  ;;  %v2805_v18 = vsel %vm4279_vm6, %v2804_v35, %v535_v27  ;;  %v2638_v8 = vand.u32 2147483647, %v515_v16  ;;  %v2640_v17 = vcvt.f32.s32 %v515_v16  ;;  %v419_v27 = vld [vmem:[%s3069_s30 + $0x218] sm:$0xff] }
 0x145   : > { %v728_v61 = vadd.f32 %v2805_v18, %v3080_v15  ;;  %v1749_v19 = vadd.f32 %v4055_v20, %v1713_v54  ;;  %v2828_v29 = vor.u32 %v2827_v33, %v2826_v25  ;;  %v1714_v11 = vmul.f32 %v4041_v51, %v1467_v10  ;;  %v423_v35 = vld [vmem:[%s3069_s30 + $0x238] sm:$0xff] }
 0x146   : > { %v996_v31 = vsub.f32 %v900_v34, %v3080_v15  ;;  %vm4318_vm8 = vcmp.lt.f32.partialorder %v2638_v8, 8388608.0  ;;  %v2643_v42 = vand.u32 2147483648, %v515_v16  ;;  %v2662_v43 = vand.u32 2147483647, %v4309_v14 }
 0x147   : > { %v824_v37 = vmax.f32 %v728_v61, 0.0  ;;  %1781 = vst [vmem:[%s4069_s26 + $0x20] sm:$0xff] %v1749_v19  ;;  %v2829_v4 = vsel %vm4292_vm7, %v2828_v29, %v4268_v38  ;;  %v1750_v46 = vadd.f32 %v4055_v20, %v1714_v11  ;;  %v2641_v47 = vcvt.s32.f32 %v2640_v17  ;;  %v4361_v61 = vpop.f32.mrf.mxu3  ;;  %v1469_v19 = vpop.f32.mrf.mxu2 }
 0x148   : > { %v1059_v5 = vpack.c.bf16 %v996_v31, %v993_v2  ;;  %v731_v0 = vadd.f32 %v2829_v4, %v3080_v15  ;;  %vm4330_vm9 = vcmp.lt.f32.partialorder %v2662_v43, 8388608.0  ;;  %v2664_v9 = vcvt.f32.s32 %v4309_v14  ;;  %v4367_v17 = vpop.f32.mrf.mxu0 }
 0x149   : > { %v921_v44 = vmin.f32 %v3097_v22, %v824_v37  ;;  %1782 = vst [vmem:[%s4069_s26 + $0x28] sm:$0xff] %v1750_v46  ;;  %v2642_v62 = vand.u32 2147483647, %v2641_v47  ;;  %v2667_v38 = vand.u32 2147483648, %v4309_v14  ;;  %v516_v36 = vmul.f32 %v3052_v7, %v419_v27  ;;  %v4369_v27 = vpop.f32.mrf.mxu1 }
 0x14a   : > { %1503 = vmatmul.bf16.gmra.mxu2 %v1059_v5  ;;  %v519_v50 = vmul.f32 %v3052_v7, %v422_v45  ;;  %v827_v21 = vmax.f32 %v731_v0, 0.0  ;;  %v2665_v55 = vcvt.s32.f32 %v2664_v9  ;;  %v4341_v49 = vmul.f32 %v3052_v7, %v420_v1 }
 0x14b   : > { %v1017_v52 = vsub.f32 %v921_v44, %v3080_v15  ;;  %v2644_v33 = vor.u32 %v2643_v42, %v2642_v62  ;;  %v2646_v60 = vand.u32 2147483647, %v516_v36  ;;  %v2648_v32 = vcvt.f32.s32 %v516_v36  ;;  %v444_v44 = vld [vmem:[%s3069_s30 + $0x2e0] sm:$0xff] }
 0x14c   : > { %v2651_v3 = vand.u32 2147483648, %v516_v36  ;;  %v924_v6 = vmin.f32 %v3097_v22, %v827_v21  ;;  %v2666_v24 = vand.u32 2147483647, %v2665_v55  ;;  %v2670_v56 = vand.u32 2147483647, %v519_v50  ;;  %v447_v21 = vld [vmem:[%s3069_s30 + $0x2f8] sm:$0xff] }
 0x14d   : > { %v2672_v59 = vcvt.f32.s32 %v519_v50  ;;  %v2645_v58 = vsel %vm4318_vm8, %v2644_v33, %v515_v16  ;;  %vm4347_vm10 = vcmp.lt.f32.partialorder %v2646_v60, 8388608.0  ;;  %v2649_v40 = vcvt.s32.f32 %v2648_v32 }
 0x14e   : > { %v2675_v12 = vand.u32 2147483648, %v519_v50  ;;  %v1020_v39 = vsub.f32 %v924_v6, %v3080_v15  ;;  %v2668_v2 = vor.u32 %v2667_v38, %v2666_v24  ;;  %v708_v54 = vadd.f32 %v2645_v58, %v3080_v15 }
 0x14f   : > { %vm4353_vm11 = vcmp.lt.f32.partialorder %v2670_v56, 8388608.0  ;;  %v2650_v18 = vand.u32 2147483647, %v2649_v40  ;;  %v2673_v25 = vcvt.s32.f32 %v2672_v59  ;;  %v4358_v10 = vmul.f32 %v3052_v7, %v423_v35  ;;  %v4399_v58 = vpop.f32.mrf.mxu3  ;;  %v1471_v26 = vpop.f32.mrf.mxu2 }
 0x150   : > { %v2654_v16 = vand.u32 2147483647, %v4341_v49  ;;  %v1071_v8 = vpack.c.bf16 %v1020_v39, %v1017_v52  ;;  %v2669_v31 = vsel %vm4330_vm9, %v2668_v2, %v4309_v14  ;;  %v804_v29 = vmax.f32 %v708_v54, 0.0  ;;  %v1296_v2 = vpop.f32.mrf.mxu0 }
 0x151   : > { %v2656_v11 = vcvt.f32.s32 %v4341_v49  ;;  %v711_v45 = vadd.f32 %v2669_v31, %v3080_v15  ;;  %v2652_v37 = vor.u32 %v2651_v3, %v2650_v18  ;;  %v2674_v41 = vand.u32 2147483647, %v2673_v25  ;;  %v1385_v54 = vpop.f32.mrf.mxu1 }
 0x152   : > { %vm4372_vm12 = vcmp.lt.f32.partialorder %v2654_v16, 8388608.0  ;;  %1523 = vmatmul.bf16.gmra.mxu3 %v1071_v8  ;;  %v901_v14 = vmin.f32 %v3097_v22, %v804_v29  ;;  %v2659_v5 = vand.u32 2147483648, %v4341_v49  ;;  %v2678_v4 = vand.u32 2147483647, %v4358_v10 }
 0x153   : > { %v2657_v43 = vcvt.s32.f32 %v2656_v11  ;;  %v807_v46 = vmax.f32 %v711_v45, 0.0  ;;  %v2653_v47 = vsel %vm4347_vm10, %v2652_v37, %v516_v36  ;;  %v2676_v1 = vor.u32 %v2675_v12, %v2674_v41 }
 0x154   : > { %v2680_v0 = vcvt.f32.s32 %v4358_v10  ;;  %v997_v23 = vsub.f32 %v901_v14, %v3080_v15  ;;  %v709_v9 = vadd.f32 %v2653_v47, %v3080_v15  ;;  %vm4385_vm13 = vcmp.lt.f32.partialorder %v2678_v4, 8388608.0 }
 0x155   : > { %v2658_v62 = vand.u32 2147483647, %v2657_v43  ;;  %v904_v52 = vmin.f32 %v3097_v22, %v807_v46  ;;  %v2677_v55 = vsel %vm4353_vm11, %v2676_v1, %v519_v50  ;;  %v2683_v33 = vand.u32 2147483648, %v4358_v10 }
 0x156   : > { %v2681_v36 = vcvt.s32.f32 %v2680_v0  ;;  %v712_v60 = vadd.f32 %v2677_v55, %v3080_v15  ;;  %v805_v32 = vmax.f32 %v709_v9, 0.0  ;;  %v541_v6 = vmul.f32 %v3052_v7, %v444_v44 }
 0x157   : > { %v2660_v3 = vor.u32 %v2659_v5, %v2658_v62  ;;  %v1000_v24 = vsub.f32 %v904_v52, %v3080_v15  ;;  %v544_v59 = vmul.f32 %v3052_v7, %v447_v21  ;;  %v1470_v35 = vadd.f32 %v1469_v19, %v4300_v13  ;;  %v1474_v9 = vpop.f32.mrf.mxu2 }
 0x158   : > { %v2682_v56 = vand.u32 2147483647, %v2681_v36  ;;  %v808_v50 = vmax.f32 %v712_v60, 0.0  ;;  %v902_v40 = vmin.f32 %v3097_v22, %v805_v32  ;;  %v2846_v39 = vand.u32 2147483647, %v541_v6  ;;  %v1298_v55 = vpop.f32.mrf.mxu0 }
 0x159   : > { %v2661_v12 = vsel %vm4372_vm12, %v2660_v3, %v4341_v49  ;;  %v1060_v34 = vpack.c.bf16 %v1000_v24, %v997_v23  ;;  %v2848_v7 = vcvt.f32.s32 %v541_v6  ;;  %v2851_v29 = vand.u32 2147483648, %v541_v6  ;;  %v4422_v23 = vpop.f32.mrf.mxu3  ;;  %v1387_v36 = vpop.f32.mrf.mxu1 }
 0x15a   : > { %v2684_v18 = vor.u32 %v2683_v33, %v2682_v56  ;;  %v710_v25 = vadd.f32 %v2661_v12, %v3080_v15  ;;  %v905_v13 = vmin.f32 %v3097_v22, %v808_v50  ;;  %v998_v16 = vsub.f32 %v902_v40, %v3080_v15 }
 0x15b   : > { %vm4408_vm14 = vcmp.lt.f32.partialorder %v2846_v39, 8388608.0  ;;  %1330 = vmatmul.bf16.gmra.mxu0 %v1060_v34  ;;  %v2849_v31 = vcvt.s32.f32 %v2848_v7  ;;  %v2870_v37 = vand.u32 2147483647, %v544_v59  ;;  %v2872_v41 = vcvt.f32.s32 %v544_v59 }
 0x15c   : > { %v2685_v49 = vsel %vm4385_vm13, %v2684_v18, %v4358_v10  ;;  %v806_v8 = vmax.f32 %v710_v25, 0.0  ;;  %v1001_v11 = vsub.f32 %v905_v13, %v3080_v15  ;;  %v2875_v43 = vand.u32 2147483648, %v544_v59 }
 0x15d   : > { %v713_v45 = vadd.f32 %v2685_v49, %v3080_v15  ;;  %v2850_v14 = vand.u32 2147483647, %v2849_v31  ;;  %v1715_v5 = vmul.f32 %v4041_v51, %v1470_v35  ;;  %v2873_v47 = vcvt.s32.f32 %v2872_v41 }
 0x15e   : > { %v903_v42 = vmin.f32 %v3097_v22, %v806_v8  ;;  %v1061_v4 = vpack.c.bf16 %v1001_v11, %v998_v16  ;;  %v1383_v10 = vadd.f32 %v4369_v27, %v4367_v17  ;;  %v1386_v44 = vadd.f32 %v1385_v54, %v1296_v2 }
 0x15f   : > { %v809_v46 = vmax.f32 %v713_v45, 0.0  ;;  %v2852_v1 = vor.u32 %v2851_v29, %v2850_v14  ;;  %v1751_v0 = vadd.f32 %v4055_v20, %v1715_v5  ;;  %v2874_v21 = vand.u32 2147483647, %v2873_v47  ;;  %v1476_v34 = vpop.f32.mrf.mxu2 }
 0x160   : > { %1419 = vmatmul.bf16.gmra.mxu1 %v1061_v4  ;;  %v999_v38 = vsub.f32 %v903_v42, %v3080_v15  ;;  %v1472_v52 = vadd.f32 %v1471_v26, %v1383_v10  ;;  %vm2871_vm15 = vcmp.lt.f32.partialorder %v2870_v37, 8388608.0  ;;  %v1475_v17 = vadd.f32 %v1474_v9, %v1386_v44 }
 0x161   : > { %v906_v62 = vmin.f32 %v3097_v22, %v809_v46  ;;  %v2853_v33 = vsel %vm4408_vm14, %v2852_v1, %v541_v6  ;;  %1783 = vst [vmem:[%s4069_s26 + $0x30] sm:$0xff] %v1751_v0  ;;  %v2876_v60 = vor.u32 %v2875_v43, %v2874_v21  ;;  %v1388_v39 = vadd.f32 %v1387_v36, %v1298_v55  ;;  %v4439_v54 = vpop.f32.mrf.mxu3  ;;  %v1390_v25 = vpop.f32.mrf.mxu1 }
 0x162   : > { %v734_v32 = vadd.f32 %v2853_v33, %v3080_v15  ;;  %v1716_v3 = vmul.f32 %v4041_v51, %v1472_v52  ;;  %v1717_v24 = vmul.f32 %v4041_v51, %v1475_v17 }
 0x163   : > { %v1002_v27 = vsub.f32 %v906_v62, %v3080_v15  ;;  %v2877_v35 = vsel %vm2871_vm15, %v2876_v60, %v544_v59  ;;  %v1477_v18 = vadd.f32 %v1476_v34, %v1388_v39  ;;  %v1301_v59 = vpop.f32.mrf.mxu0  ;;  %v4480_v39 = vld [vmem:[%s4564_s4] ss:$0 sm:$0xff] }
 0x164   : > { %v830_v26 = vmax.f32 %v734_v32, 0.0  ;;  %v1752_v50 = vadd.f32 %v4055_v20, %v1716_v3  ;;  %v737_v6 = vadd.f32 %v2877_v35, %v3080_v15  ;;  %v1753_v40 = vadd.f32 %v4055_v20, %v1717_v24  ;;  %v4468_v3 = vld [vmem:[%s4563_s3] ss:$0 sm:$0xff] }
 0x165   : > { %v1062_v56 = vpack.c.bf16 %v1002_v27, %v999_v38  ;;  %v1718_v16 = vmul.f32 %v4041_v51, %v1477_v18  ;;  %v1391_v8 = vadd.f32 %v1390_v25, %v1301_v59 }
 0x166   : > { %v927_v12 = vmin.f32 %v3097_v22, %v830_v26  ;;  %1784 = vst [vmem:[%s4069_s26 + $0x38] sm:$0xff] %v1752_v50  ;;  %v833_v2 = vmax.f32 %v737_v6, 0.0 }
 0x167   : > { %1508 = vmatmul.bf16.gmra.mxu2 %v1062_v56  ;;  %1785 = vst [vmem:[%s4069_s26 + $0x40] sm:$0xff] %v1753_v40  ;;  %v1754_v49 = vadd.f32 %v4055_v20, %v1718_v16  ;;  %v1479_v11 = vpop.f32.mrf.mxu2 }
 0x168   : > { %v930_v7 = vmin.f32 %v3097_v22, %v833_v2  ;;  %v1023_v13 = vsub.f32 %v927_v12, %v3080_v15  ;;  %v1480_v45 = vadd.f32 %v1479_v11, %v1391_v8 }
 0x169   : > { %1786 = vst [vmem:[%s4069_s26 + $0x48] sm:$0xff] %v1754_v49  ;;  %v4447_v29 = vpop.f32.mrf.mxu3  ;;  %v1392_v22 = vpop.f32.mrf.mxu1  ;;  %v1426_v49 = vadd.f32 %v4422_v23, %v4111_v28 }
 0x16a   : > { %v1026_v19 = vsub.f32 %v930_v7, %v3080_v15  ;;  %v1719_v41 = vmul.f32 %v4041_v51, %v1480_v45 }
 0x16b   : > { %v1303_v37 = vpop.f32.mrf.mxu0 }
 0x16c   : > { %v1074_v31 = vpack.c.bf16 %v1026_v19, %v1023_v13  ;;  %v1755_v42 = vadd.f32 %v4055_v20, %v1719_v41  ;;  %v1393_v14 = vadd.f32 %v1392_v22, %v1303_v37 }
 0x16e   : > { %1528 = vmatmul.bf16.gmra.mxu3 %v1074_v31  ;;  %1787 = vst [vmem:[%s4069_s26 + $0x50] sm:$0xff] %v1755_v42 }
 0x16f   : > { %v1481_v43 = vpop.f32.mrf.mxu2 }
 0x170   : > { %v1482_v5 = vadd.f32 %v1481_v43, %v1393_v14  ;;  %v1428_v43 = vadd.f32 %v4439_v54, %v4154_v53 }
 0x171   : > { %v4452_v15 = vpop.f32.mrf.mxu3  ;;  %v1395_v46 = vpop.f32.mrf.mxu1 }
 0x172   : > { %v1720_v47 = vmul.f32 %v4041_v51, %v1482_v5 }
 0x173   : > { %v1306_v4 = vpop.f32.mrf.mxu0 }
 0x174   : > { %v1756_v10 = vadd.f32 %v4055_v20, %v1720_v47  ;;  %v1396_v1 = vadd.f32 %v1395_v46, %v1306_v4 }
 0x176   : > { %1788 = vst [vmem:[%s4069_s26 + $0x58] sm:$0xff] %v1756_v10 }
 0x177   : > { %v1484_v44 = vpop.f32.mrf.mxu2 }
 0x178   : > { %v1485_v9 = vadd.f32 %v1484_v44, %v1396_v1 }
 0x179   : > { %v4457_v0 = vpop.f32.mrf.mxu3  ;;  %v1397_v38 = vpop.f32.mrf.mxu1 }
 0x17a   : > { %v1721_v21 = vmul.f32 %v4041_v51, %v1485_v9 }
 0x17b   : > { %v1308_v62 = vpop.f32.mrf.mxu0 }
 0x17c   : > { %v1757_v52 = vadd.f32 %v4055_v20, %v1721_v21  ;;  %v1398_v55 = vadd.f32 %v1397_v38, %v1308_v62 }
 0x17e   : > { %1789 = vst [vmem:[%s4069_s26 + $0x60] sm:$0xff] %v1757_v52 }
 0x17f   : > { %v1486_v33 = vpop.f32.mrf.mxu2 }
 0x180   : > { %v1487_v27 = vadd.f32 %v1486_v33, %v1398_v55  ;;  %v1431_v33 = vadd.f32 %v4447_v29, %v4192_v57 }
 0x181   : > { %v1437_v36 = vpop.f32.mrf.mxu3  ;;  %v1400_v32 = vpop.f32.mrf.mxu1 }
 0x182   : > { %v4463_v17 = vadd.f32 %v1437_v36, %v4312_v30  ;;  %v1722_v51 = vmul.f32 %v4468_v3, %v1487_v27 }
 0x183   : > { %v1311_v60 = vpop.f32.mrf.mxu0 }
 0x184   : > { %v1758_v24 = vadd.f32 %v4055_v20, %v1722_v51  ;;  %v1401_v56 = vadd.f32 %v1400_v32, %v1311_v60 }
 0x186   : > { %1790 = vst [vmem:[%s4069_s26 + $0x68] sm:$0xff] %v1758_v24 }
 0x187   : > { %v1489_v26 = vpop.f32.mrf.mxu2 }
 0x188   : > { %v1490_v50 = vadd.f32 %v1489_v26, %v1401_v56 }
 0x189   : > { %v1440_v35 = vpop.f32.mrf.mxu3  ;;  %v1402_v40 = vpop.f32.mrf.mxu1 }
 0x18a   : > { %v4474_v30 = vadd.f32 %v1440_v35, %v4361_v61  ;;  %v1723_v12 = vmul.f32 %v4468_v3, %v1490_v50 }
 0x18b   : > { %v1313_v6 = vpop.f32.mrf.mxu0 }
 0x18c   : > { %v1759_v20 = vadd.f32 %v4480_v39, %v1723_v12  ;;  %v1403_v2 = vadd.f32 %v1402_v40, %v1313_v6  ;;  %v1433_v6 = vadd.f32 %v4452_v15, %v4230_v48 }
 0x18e   : > { %1791 = vst [vmem:[%s4069_s26 + $0x70] sm:$0xff] %v1759_v20 }
 0x18f   : > { %v1491_v18 = vpop.f32.mrf.mxu2 }
 0x190   : > { %v1492_v59 = vadd.f32 %v1491_v18, %v1403_v2 }
 0x191   : > { %v1442_v34 = vpop.f32.mrf.mxu3  ;;  %v1405_v7 = vpop.f32.mrf.mxu1 }
 0x192   : > { %v4485_v61 = vadd.f32 %v1442_v34, %v4399_v58  ;;  %v1724_v13 = vmul.f32 %v4468_v3, %v1492_v59 }
 0x193   : > { %v1316_v25 = vpop.f32.mrf.mxu0 }
 0x194   : > { %v1760_v16 = vadd.f32 %v4480_v39, %v1724_v13  ;;  %v1406_v19 = vadd.f32 %v1405_v7, %v1316_v25 }
 0x196   : > { %1792 = vst [vmem:[%s4069_s26 + $0x78] sm:$0xff] %v1760_v16  ;;  %v1436_v16 = vadd.f32 %v4457_v0, %v4274_v63 }
 0x197   : > { %v1494_v8 = vpop.f32.mrf.mxu2 }
 0x198   : > { %v1495_v11 = vadd.f32 %v1494_v8, %v1406_v19 }
 0x199   : > { %v1407_v37 = vpop.f32.mrf.mxu1 }
 0x19a   : > { %v1514_v31 = vpop.f32.mrf.mxu3  ;;  %v1725_v22 = vmul.f32 %v4468_v3, %v1495_v11 }
 0x19b   : > { %v1515_v45 = vadd.f32 %v1514_v31, %v1426_v49  ;;  %v1318_v58 = vpop.f32.mrf.mxu0 }
 0x19c   : > { %v1761_v42 = vadd.f32 %v4480_v39, %v1725_v22  ;;  %v1408_v28 = vadd.f32 %v1407_v37, %v1318_v58 }
 0x19d   : > { %v1733_v41 = vmul.f32 %v4468_v3, %v1515_v45 }
 0x19e   : > { %1793 = vst [vmem:[%s4069_s26 + $0x80] sm:$0xff] %v1761_v42 }
 0x19f   : > { %v1769_v14 = vadd.f32 %v4480_v39, %v1733_v41  ;;  %v1496_v23 = vpop.f32.mrf.mxu2 }
 0x1a0   : > { %v1497_v4 = vadd.f32 %v1496_v23, %v1408_v28 }
 0x1a1   : > { %1801 = vst [vmem:[%s4069_s26 + $0xc0] sm:$0xff] %v1769_v14 }
 0x1a2   : > { %v1516_v5 = vpop.f32.mrf.mxu3  ;;  %v1726_v1 = vmul.f32 %v4468_v3, %v1497_v4 }
 0x1a3   : > { %v1517_v46 = vadd.f32 %v1516_v5, %v1428_v43  ;;  %v1321_v47 = vpop.f32.mrf.mxu0  ;;  %v1410_v10 = vpop.f32.mrf.mxu1 }
 0x1a4   : > { %v1762_v9 = vadd.f32 %v4480_v39, %v1726_v1  ;;  %v1411_v53 = vadd.f32 %v1410_v10, %v1321_v47 }
 0x1a5   : > { %v1734_v44 = vmul.f32 %v4468_v3, %v1517_v46 }
 0x1a6   : > { %1794 = vst [vmem:[%s4069_s26 + $0x88] sm:$0xff] %v1762_v9 }
 0x1a7   : > { %v1770_v62 = vadd.f32 %v4480_v39, %v1734_v44 }
 0x1a9   : > { %1802 = vst [vmem:[%s4069_s26 + $0xc8] sm:$0xff] %v1770_v62 }
 0x1ab   : > { %v1323_v52 = vpop.f32.mrf.mxu0  ;;  %v1412_v55 = vpop.f32.mrf.mxu1 }
 0x1ac   : > { %v1413_v27 = vadd.f32 %v1412_v55, %v1323_v52 }
 0x1b0   : > { %v1499_v54 = vpop.f32.mrf.mxu2 }
 0x1b1   : > { %v1500_v38 = vadd.f32 %v1499_v54, %v1411_v53 }
 0x1b3   : > { %v1727_v21 = vmul.f32 %v4468_v3, %v1500_v38 }
 0x1b5   : > { %v1763_v36 = vadd.f32 %v4480_v39, %v1727_v21 }
 0x1b7   : > { %1795 = vst [vmem:[%s4069_s26 + $0x90] sm:$0xff] %v1763_v36  ;;  %v1519_v60 = vpop.f32.mrf.mxu3 }
 0x1b8   : > { %v1501_v32 = vpop.f32.mrf.mxu2  ;;  %v1520_v51 = vadd.f32 %v1519_v60, %v1431_v33 }
 0x1b9   : > { %v1502_v24 = vadd.f32 %v1501_v32, %v1413_v27 }
 0x1ba   : > { %v1735_v56 = vmul.f32 %v4468_v3, %v1520_v51 }
 0x1bb   : > { %v1728_v35 = vmul.f32 %v4468_v3, %v1502_v24  ;;  %v1326_v20 = vpop.f32.mrf.mxu0 }
 0x1bc   : > { %v1771_v26 = vadd.f32 %v4480_v39, %v1735_v56 }
 0x1bd   : > { %v1764_v50 = vadd.f32 %v4480_v39, %v1728_v35 }
 0x1be   : > { %1803 = vst [vmem:[%s4069_s26 + $0xd0] sm:$0xff] %v1771_v26 }
 0x1bf   : > { %1796 = vst [vmem:[%s4069_s26 + $0x98] sm:$0xff] %v1764_v50  ;;  %v1521_v57 = vpop.f32.mrf.mxu3 }
 0x1c0   : > { %v1522_v29 = vadd.f32 %v1521_v57, %v1433_v6  ;;  %v1415_v2 = vpop.f32.mrf.mxu1 }
 0x1c1   : > { %v1416_v34 = vadd.f32 %v1415_v2, %v1326_v20 }
 0x1c2   : > { %v1736_v40 = vmul.f32 %v4468_v3, %v1522_v29 }
 0x1c3   : > { %v1328_v48 = vpop.f32.mrf.mxu0 }
 0x1c4   : > { %v1772_v12 = vadd.f32 %v4480_v39, %v1736_v40 }
 0x1c6   : > { %1804 = vst [vmem:[%s4069_s26 + $0xd8] sm:$0xff] %v1772_v12 }
 0x1c8   : > { %v1417_v15 = vpop.f32.mrf.mxu1 }
 0x1c9   : > { %v1418_v13 = vadd.f32 %v1417_v15, %v1328_v48 }
 0x1cd   : > { %v1504_v18 = vpop.f32.mrf.mxu2 }
 0x1ce   : > { %v1505_v59 = vadd.f32 %v1504_v18, %v1416_v34 }
 0x1d0   : > { %v1729_v25 = vmul.f32 %v4468_v3, %v1505_v59 }
 0x1d2   : > { %v1765_v7 = vadd.f32 %v4480_v39, %v1729_v25 }
 0x1d4   : > { %1797 = vst [vmem:[%s4069_s26 + $0xa0] sm:$0xff] %v1765_v7 }
 0x1d5   : > { %v1506_v19 = vpop.f32.mrf.mxu2  ;;  %v1524_v49 = vpop.f32.mrf.mxu3 }
 0x1d6   : > { %v1507_v8 = vadd.f32 %v1506_v19, %v1418_v13  ;;  %v1525_v31 = vadd.f32 %v1524_v49, %v1436_v16 }
 0x1d8   : > { %v1730_v11 = vmul.f32 %v4468_v3, %v1507_v8  ;;  %v1737_v45 = vmul.f32 %v4468_v3, %v1525_v31  ;;  %v1331_v42 = vpop.f32.mrf.mxu0 }
 0x1da   : > { %v1766_v58 = vadd.f32 %v4480_v39, %v1730_v11  ;;  %v1773_v37 = vadd.f32 %v4480_v39, %v1737_v45 }
 0x1dc   : > { %1798 = vst [vmem:[%s4069_s26 + $0xa8] sm:$0xff] %v1766_v58 }
 0x1dd   : > { %1805 = vst [vmem:[%s4069_s26 + $0xe0] sm:$0xff] %v1773_v37  ;;  %v1526_v22 = vpop.f32.mrf.mxu3  ;;  %v1420_v14 = vpop.f32.mrf.mxu1 }
 0x1de   : > { %v1527_v41 = vadd.f32 %v1526_v22, %v4463_v17  ;;  %v1421_v43 = vadd.f32 %v1420_v14, %v1331_v42 }
 0x1e0   : > { %v1738_v63 = vmul.f32 %v4468_v3, %v1527_v41  ;;  %v1333_v4 = vpop.f32.mrf.mxu0 }
 0x1e2   : > { %v1774_v0 = vadd.f32 %v4480_v39, %v1738_v63 }
 0x1e4   : > { %1806 = vst [vmem:[%s4069_s26 + $0xe8] sm:$0xff] %v1774_v0 }
 0x1e5   : > { %v1422_v46 = vpop.f32.mrf.mxu1 }
 0x1e6   : > { %v1423_v17 = vadd.f32 %v1422_v46, %v1333_v4 }
 0x1ea   : > { %v1509_v28 = vpop.f32.mrf.mxu2 }
 0x1eb   : > { %v1510_v23 = vadd.f32 %v1509_v28, %v1421_v43 }
 0x1ed   : > { %v1731_v5 = vmul.f32 %v4468_v3, %v1510_v23 }
 0x1ef   : > { %v1767_v47 = vadd.f32 %v4480_v39, %v1731_v5 }
 0x1f1   : > { %1799 = vst [vmem:[%s4069_s26 + $0xb0] sm:$0xff] %v1767_v47  ;;  %v1529_v1 = vpop.f32.mrf.mxu3 }
 0x1f2   : > { %v1511_v10 = vpop.f32.mrf.mxu2  ;;  %v1530_v9 = vadd.f32 %v1529_v1, %v4474_v30 }
 0x1f3   : > { %v1512_v44 = vadd.f32 %v1511_v10, %v1423_v17 }
 0x1f4   : > { %v1739_v53 = vmul.f32 %v4468_v3, %v1530_v9 }
 0x1f5   : > { %v1732_v62 = vmul.f32 %v4468_v3, %v1512_v44 }
 0x1f6   : > { %v1775_v38 = vadd.f32 %v4480_v39, %v1739_v53 }
 0x1f7   : > { %v1768_v54 = vadd.f32 %v4480_v39, %v1732_v62 }
 0x1f8   : > { %1807 = vst [vmem:[%s4069_s26 + $0xf0] sm:$0xff] %v1775_v38 }
 0x1f9   : > { %1800 = vst [vmem:[%s4069_s26 + $0xb8] sm:$0xff] %v1768_v54  ;;  %v1531_v21 = vpop.f32.mrf.mxu3 }
 0x1fa   : > { %v1532_v52 = vadd.f32 %v1531_v21, %v4485_v61 }
 0x1fc   : > { %v1740_v55 = vmul.f32 %v4468_v3, %v1532_v52 }
 0x1fe   : > { %v1776_v36 = vadd.f32 %v4480_v39, %v1740_v55 }
 0x200   : > { %1808 = vst [vmem:[%s4069_s26 + $0xf8] sm:$0xff] %v1776_v36 }
 0x201 PF: > { %s16_s20 = sadd.s32 1, %s2958_s20   ;;  %s4756_s18 = smov %s2954_s19 }
 0x202   : > { %p13_p8 = scmp.ge.s32.totalorder %s16_s20, 4   ;;  %s4757_s19 = smov %s4759_s22 }
 0x204   :  { %15 = sbr.rel (!%p13_p8) target bundleno = 2 (0x2), region = 96 }
 0x209   :  { %1837 = vsyncpa [#allocation3], 1 }
 0x20a   :  { %1839 = vsyncpa [#allocation3 + $0x1], 1 }

</bundles_post_ra>
